<compile_context>
chip_gen: v7x
topology: tpu7x:2x2x1
jax: 0.10.0
libtpu: 0.0.40
codegen_flags: <defaults>
</compile_context>

<pallas_src>
import numpy as np
import jax
import jax.numpy as jnp
from jax.experimental import pallas as pl
from jax.experimental.pallas import tpu as pltpu

EPS = 1e-5
LEAKY_SLOPE = 0.2


# -----------------------------------------------------------------------------
# Host-side (one-time) parameter repacking.
# -----------------------------------------------------------------------------
def _build_bigw_down(w, w_out):
    """Torch (Cout, Cin, 4, 4) -> banded (4, (2*w_out+2)*Cin, w_out*Cout).

    big[di, wcol*Cin+ci, wo*Cout+co] = w[co, ci, di, wcol - 2*wo] for 0<=wcol-2wo<4,
    so a padded-input row (W*Cin flattened on lanes) @ big[di] gives the di-th row
    tap of the 4x4 / stride-2 / pad-1 conv for all (wo, co) at once.
    """
    cout, cin, kh, kw = (int(s) for s in w.shape)
    wp = 2 * w_out + 2
    wn = np.asarray(w, np.float32)
    big = np.zeros((kh, wp * cin, w_out * cout), np.float32)
    for di in range(kh):
        for wo in range(w_out):
            for dj in range(kw):
                col = 2 * wo + dj
                big[di, col * cin:(col + 1) * cin,
                    wo * cout:(wo + 1) * cout] = wn[:, :, di, dj].T
    return big


def _build_bigw_final(w, w_out):
    """Torch (1, Cin, 3, 3) -> banded (3, (w_out+2)*Cin, w_out) for the 3x3/s1 conv."""
    cout, cin, kh, kw = (int(s) for s in w.shape)
    wp = w_out + 2
    wn = np.asarray(w, np.float32)
    big = np.zeros((kh, wp * cin, w_out), np.float32)
    for di in range(kh):
        for wo in range(w_out):
            for dj in range(kw):
                col = wo + dj
                big[di, col * cin:(col + 1) * cin, wo] = wn[0, :, di, dj]
    return big


def _sel_parity(h_out):
    """0/1 selectors extracting even / odd output rows via an exact matmul."""
    sel = np.zeros((2, h_out // 2, h_out), np.float32)
    for t in range(h_out // 2):
        sel[0, t, 2 * t] = 1.0
        sel[1, t, 2 * t + 1] = 1.0
    return sel


def _group_mats(w_out, cout):
    """G sums the W-groups per channel; Gt broadcasts per-channel stats back."""
    g = np.zeros((w_out * cout, cout), np.float32)
    for wo in range(w_out):
        for c in range(cout):
            g[wo * cout + c, c] = 1.0
    return g, np.ascontiguousarray(g.T)


# -----------------------------------------------------------------------------
# Input prep (cheap XLA glue, same element count as the image + a padding ring).
# -----------------------------------------------------------------------------
def _prep_input_rowsplit(x_nhwc):
    """(N,H,W,C) -> (N, 2, (H+2)/2, (W+2)*C): zero padded, row-parity split,
    width & channels flattened onto the lane axis."""
    n, h, w, c = x_nhwc.shape
    xp = jnp.pad(x_nhwc.astype(jnp.float32), ((0, 0), (1, 1), (1, 1), (0, 0)))
    hp, wp = h + 2, w + 2
    xp = xp.reshape(n, hp // 2, 2, wp, c).transpose(0, 2, 1, 3, 4)
    return xp.reshape(n, 2, hp // 2, wp * c)


# -----------------------------------------------------------------------------
# Fused PatchGAN kernel (one grid step == one sample, all layers).
# -----------------------------------------------------------------------------
def _make_patchgan_kernel(layer_cfg, final_cfg, num_inputs):

    def kernel(*refs):
        in_refs = refs[:num_inputs]
        o_ref = refs[num_inputs]
        scratch = refs[num_inputs + 1:]

        ii = 0
        src_ref = in_refs[ii]; ii += 1
        src_has_batch = True                     # layer-0 input block is (1,2,Hp/2,Wp*C)

        for l, cfg in enumerate(layer_cfg):
            h_out, w_out, cout = cfg["h_out"], cfg["w_out"], cfg["cout"]
            bw_ref = in_refs[ii]; ii += 1
            bias_ref = in_refs[ii]; ii += 1
            if cfg["norm"]:
                g_ref = in_refs[ii]; ii += 1
                gt_ref = in_refs[ii]; ii += 1
            if cfg["split"]:
                sel_ref = in_refs[ii]; ii += 1

            # 4x4 / stride-2 conv == 4 banded bf16 matmuls over unstrided row slices.
            acc = jnp.zeros((h_out, w_out * cout), jnp.float32)
            for di in range(4):
                a, m0 = di % 2, di // 2
                if src_has_batch:
                    rows = src_ref[0, a, pl.ds(m0, h_out), :]
                else:
                    rows = src_ref[a, pl.ds(m0, h_out), :]
                acc = acc + jnp.dot(rows.astype(jnp.bfloat16), bw_ref[di],
                                    preferred_element_type=jnp.float32)
            acc = acc + bias_ref[...]                          # (1, Wout*Cout) bcast

            if cfg["norm"]:
                # InstanceNorm2d(affine=False): one-pass per-channel stats.
                inv_n = 1.0 / float(h_out * w_out)
                col_s = jnp.sum(acc, axis=0, keepdims=True)
                col_sq = jnp.sum(acc * acc, axis=0, keepdims=True)
                ch_s = jnp.dot(col_s, g_ref[...], preferred_element_type=jnp.float32)
                ch_sq = jnp.dot(col_sq, g_ref[...], preferred_element_type=jnp.float32)
                mean = ch_s * inv_n
                var = ch_sq * inv_n - mean * mean
                inv_std = jax.lax.rsqrt(var + EPS)
                mean_row = jnp.dot(mean, gt_ref[...], preferred_element_type=jnp.float32)
                scl_row = jnp.dot(inv_std, gt_ref[...], preferred_element_type=jnp.float32)
                acc = (acc - mean_row) * scl_row

            acc = jnp.where(acc >= 0.0, acc, LEAKY_SLOPE * acc)  # LeakyReLU(0.2)

            dst = scratch[l]
            dst[...] = jnp.zeros_like(dst)                     # zero padding border
            if cfg["split"]:
                # Store padded + row-parity split for the next stride-2 conv.
                half = h_out // 2
                even = jnp.dot(sel_ref[0], acc, preferred_element_type=jnp.float32)
                odd = jnp.dot(sel_ref[1], acc, preferred_element_type=jnp.float32)
                dst[1, 0:half, cout:(w_out + 1) * cout] = even
                dst[0, 1:half + 1, cout:(w_out + 1) * cout] = odd
            else:
                # Last down block feeds the stride-1 final conv: plain padded store.
                dst[1:h_out + 1, cout:(w_out + 1) * cout] = acc
            src_ref = dst
            src_has_batch = False

        # Final 3x3 / stride-1 / pad-1 conv to 1 channel; output is lane-dense (H, W).
        h_l, w_l = final_cfg["h"], final_cfg["w"]
        bwf_ref = in_refs[ii]; ii += 1
        bf_ref = in_refs[ii]; ii += 1
        acc = jnp.zeros((h_l, w_l), jnp.float32)
        for di in range(3):
            rows = src_ref[pl.ds(di, h_l), :]
            acc = acc + jnp.dot(rows.astype(jnp.bfloat16), bwf_ref[di],
                                preferred_element_type=jnp.float32)
        o_ref[0] = acc + bf_ref[...]

    return kernel


# -----------------------------------------------------------------------------
# Wrapper: builds the fused kernel for one scale.
# -----------------------------------------------------------------------------
def patchgan_forward(params, x_nhwc):
    """params: list of (w, b) in torch Conv2d layout; x_nhwc: (N,H,W,Cin) float32.
    Returns (N, H/2^num_downs, W/2^num_downs) patch logits."""
    n, h, w, cin0 = (int(s) for s in x_nhwc.shape)
    assert h % 2 == 0 and w % 2 == 0
    num_downs = len(params) - 1

    inputs = [_prep_input_rowsplit(x_nhwc)]
    layer_cfg = []
    s_h, s_w, cin = h, w, cin0
    for l in range(num_downs):
        wgt, bias = params[l]
        cout = int(wgt.shape[0])
        h_out, w_out = s_h // 2, s_w // 2
        cfg = dict(h_out=h_out, w_out=w_out, cin=cin, cout=cout,
                   norm=(l >= 1), split=(l < num_downs - 1))
        layer_cfg.append(cfg)
        inputs.append(jnp.asarray(_build_bigw_down(wgt, w_out), jnp.bfloat16))
        inputs.append(jnp.asarray(np.tile(np.asarray(bias, np.float32), w_out)[None, :]))
        if cfg["norm"]:
            g, gt = _group_mats(w_out, cout)
            inputs.append(jnp.asarray(g))
            inputs.append(jnp.asarray(gt))
        if cfg["split"]:
            inputs.append(jnp.asarray(_sel_parity(h_out)))
        s_h, s_w, cin = h_out, w_out, cout

    wgt_f, bias_f = params[num_downs]
    h_l, w_l, c_l = s_h, s_w, cin
    final_cfg = dict(h=h_l, w=w_l, cin=c_l)
    inputs.append(jnp.asarray(_build_bigw_final(wgt_f, w_l), jnp.bfloat16))
    inputs.append(jnp.full((1, w_l), float(np.asarray(bias_f)[0]), jnp.float32))

    num_inputs = len(inputs)
    kernel = _make_patchgan_kernel(layer_cfg, final_cfg, num_inputs)

    in_specs = [pl.BlockSpec((1,) + inputs[0].shape[1:], lambda nn: (nn, 0, 0, 0))]
    for arr in inputs[1:]:
        in_specs.append(pl.BlockSpec(arr.shape, lambda nn, nd=arr.ndim: (0,) * nd))

    scratch_shapes = []
    for l in range(1, num_downs):
        ph, pw = layer_cfg[l - 1]["h_out"], layer_cfg[l - 1]["w_out"]
        cin_l = layer_cfg[l]["cin"]
        scratch_shapes.append(pltpu.VMEM((2, ph // 2 + 1, (pw + 2) * cin_l), jnp.float32))
    scratch_shapes.append(pltpu.VMEM((h_l + 2, (w_l + 2) * c_l), jnp.float32))

    return pl.pallas_call(
        kernel,
        out_shape=jax.ShapeDtypeStruct((n, h_l, w_l), jnp.float32),
        grid=(n,),
        in_specs=in_specs,
        out_specs=pl.BlockSpec((1, h_l, w_l), lambda nn: (nn, 0, 0)),
        scratch_shapes=scratch_shapes,
        compiler_params=pltpu.CompilerParams(
            dimension_semantics=("parallel",),
            vmem_limit_bytes=32 * 1024 * 1024),
    )(*inputs)


# -----------------------------------------------------------------------------
# Multi-scale wrapper + synthetic params.
# -----------------------------------------------------------------------------
def downsample_half(x_nhwc):
    """bilinear(scale=0.5, align_corners=False) == 2x2 average pool for even sizes."""
    # TODO(synk): fold this tiny 2x2 average pool into the next scale's input prep.
    n, h, w, c = x_nhwc.shape
    return x_nhwc.reshape(n, h // 2, 2, w // 2, 2, c).mean(axis=(2, 4))


def multiscale_discriminator_forward(all_params, x_nchw):
    """x_nchw: (N, C, H, W) like the PyTorch module. Returns list of NCHW outputs."""
    x = jnp.transpose(x_nchw, (0, 2, 3, 1)).astype(jnp.float32)
    outputs = []
    for params in all_params:
        o = patchgan_forward(params, x)            # (N, Hs, Ws)
        outputs.append(o[:, None, :, :])           # (N, 1, Hs, Ws)
        x = downsample_half(x)
    return outputs


def init_patchgan_params(key, in_channels, base_features, num_downs):
    """Deterministic synthetic params matching PatchGAN.__init__ shapes (torch layout)."""
    specs = []
    cin, feats = in_channels, base_features
    specs.append((cin, feats, 4))                   # first down block (no norm)
    for _ in range(1, num_downs):
        specs.append((feats, feats * 2, 4))         # down blocks with InstanceNorm
        feats *= 2
    specs.append((feats, 1, 3))                     # final 3x3 stride-1 conv
    params = []
    for (ci, co, k) in specs:
        key, wk, bk = jax.random.split(key, 3)
        wgt = jax.random.normal(wk, (co, ci, k, k), jnp.float32) * 0.05
        b = jax.random.normal(bk, (co,), jnp.float32) * 0.05
        params.append((wgt, b))
    return params


if __name__ == "__main__":
    # MultiScaleDiscriminator(in_channels=3, base_features=8, num_downs=3, num_scales=3)
    IN_CHANNELS, BASE_FEATURES, NUM_DOWNS, NUM_SCALES = 3, 8, 3, 3
    key = jax.random.PRNGKey(0)
    key, xk = jax.random.split(key)
    x = jax.random.normal(xk, (2, IN_CHANNELS, 64, 64), jnp.float32)

    all_params = []
    for _ in range(NUM_SCALES):
        key, pk = jax.random.split(key)
        all_params.append(init_patchgan_params(pk, IN_CHANNELS, BASE_FEATURES, NUM_DOWNS))

    outs = multiscale_discriminator_forward(all_params, x)
    for o in outs:
        jax.block_until_ready(o)
    # Expected shapes: (2,1,8,8), (2,1,4,4), (2,1,2,2)
    print("KERNEL_OK")
</pallas_src>

<mosaic_0001>
module attributes {stable_mosaic.version = 11 : i64} {
  func.func @kernel(%arg0: i32, %arg1: memref<1x2x33x198xf32, #tpu.memory_space<vmem>>, %arg2: memref<4x198x256xbf16, #tpu.memory_space<vmem>>, %arg3: memref<1x256xf32, #tpu.memory_space<vmem>>, %arg4: memref<2x16x32xf32, #tpu.memory_space<vmem>>, %arg5: memref<4x272x256xbf16, #tpu.memory_space<vmem>>, %arg6: memref<1x256xf32, #tpu.memory_space<vmem>>, %arg7: memref<256x16xf32, #tpu.memory_space<vmem>>, %arg8: memref<16x256xf32, #tpu.memory_space<vmem>>, %arg9: memref<2x8x16xf32, #tpu.memory_space<vmem>>, %arg10: memref<4x288x256xbf16, #tpu.memory_space<vmem>>, %arg11: memref<1x256xf32, #tpu.memory_space<vmem>>, %arg12: memref<256x32xf32, #tpu.memory_space<vmem>>, %arg13: memref<32x256xf32, #tpu.memory_space<vmem>>, %arg14: memref<3x320x8xbf16, #tpu.memory_space<vmem>>, %arg15: memref<1x8xf32, #tpu.memory_space<vmem>>, %arg16: memref<1x8x8xf32, #tpu.memory_space<vmem>>, %arg17: memref<2x17x272xf32, #tpu.memory_space<vmem>>, %arg18: memref<2x9x288xf32, #tpu.memory_space<vmem>>, %arg19: memref<10x320xf32, #tpu.memory_space<vmem>>) attributes {dimension_semantics = [#tpu.dimension_semantics<parallel>], iteration_bounds = array<i64: 2>, scalar_prefetch = 0 : i64, scratch_operands = 3 : i64, tpu.core_type = #tpu.core_type<tc>, window_params = [{transform_indices = @transform_0, window_bounds = array<i64: 1, 2, 33, 198>}, {pipeline_mode = #tpu.pipeline_mode<synchronous>, transform_indices = @transform_1, window_bounds = array<i64: 4, 198, 256>}, {pipeline_mode = #tpu.pipeline_mode<synchronous>, transform_indices = @transform_2, window_bounds = array<i64: 1, 256>}, {pipeline_mode = #tpu.pipeline_mode<synchronous>, transform_indices = @transform_3, window_bounds = array<i64: 2, 16, 32>}, {pipeline_mode = #tpu.pipeline_mode<synchronous>, transform_indices = @transform_4, window_bounds = array<i64: 4, 272, 256>}, {pipeline_mode = #tpu.pipeline_mode<synchronous>, transform_indices = @transform_5, window_bounds = array<i64: 1, 256>}, {pipeline_mode = #tpu.pipeline_mode<synchronous>, transform_indices = @transform_6, window_bounds = array<i64: 256, 16>}, {pipeline_mode = #tpu.pipeline_mode<synchronous>, transform_indices = @transform_7, window_bounds = array<i64: 16, 256>}, {pipeline_mode = #tpu.pipeline_mode<synchronous>, transform_indices = @transform_8, window_bounds = array<i64: 2, 8, 16>}, {pipeline_mode = #tpu.pipeline_mode<synchronous>, transform_indices = @transform_9, window_bounds = array<i64: 4, 288, 256>}, {pipeline_mode = #tpu.pipeline_mode<synchronous>, transform_indices = @transform_10, window_bounds = array<i64: 1, 256>}, {pipeline_mode = #tpu.pipeline_mode<synchronous>, transform_indices = @transform_11, window_bounds = array<i64: 256, 32>}, {pipeline_mode = #tpu.pipeline_mode<synchronous>, transform_indices = @transform_12, window_bounds = array<i64: 32, 256>}, {pipeline_mode = #tpu.pipeline_mode<synchronous>, transform_indices = @transform_13, window_bounds = array<i64: 3, 320, 8>}, {pipeline_mode = #tpu.pipeline_mode<synchronous>, transform_indices = @transform_14, window_bounds = array<i64: 1, 8>}, {transform_indices = @transform_15, window_bounds = array<i64: 1, 8, 8>}]} {
    %cst = arith.constant 0.000000e+00 : f32
    %0 = vector.broadcast %cst : f32 to vector<32x256xf32>
    %c0 = arith.constant 0 : index
    %c0_0 = arith.constant 0 : index
    %c0_1 = arith.constant 0 : index
    %c0_2 = arith.constant 0 : index
    %1 = vector.load %arg1[%c0, %c0_0, %c0_1, %c0_2] : memref<1x2x33x198xf32, #tpu.memory_space<vmem>>, vector<1x1x32x198xf32>
    %2 = vector.shape_cast %1 : vector<1x1x32x198xf32> to vector<32x198xf32>
    %3 = arith.truncf %2 : vector<32x198xf32> to vector<32x198xbf16>
    %c0_3 = arith.constant 0 : index
    %c0_4 = arith.constant 0 : index
    %c0_5 = arith.constant 0 : index
    %4 = vector.load %arg2[%c0_3, %c0_4, %c0_5] : memref<4x198x256xbf16, #tpu.memory_space<vmem>>, vector<1x198x256xbf16>
    %5 = vector.shape_cast %4 : vector<1x198x256xbf16> to vector<198x256xbf16>
    %cst_6 = arith.constant dense<0.000000e+00> : vector<32x256xf32>
    %6 = tpu.matmul %3, %5, %cst_6 {dimension_numbers = #tpu.dot_dimension_numbers<[1], [0], [0], [1], [0, 0, 1, 1], [], []>} : vector<32x198xbf16>, vector<198x256xbf16>, vector<32x256xf32> -> vector<32x256xf32>
    %7 = arith.addf %0, %6 : vector<32x256xf32>
    %c0_7 = arith.constant 0 : index
    %c1 = arith.constant 1 : index
    %c0_8 = arith.constant 0 : index
    %c0_9 = arith.constant 0 : index
    %8 = vector.load %arg1[%c0_7, %c1, %c0_8, %c0_9] : memref<1x2x33x198xf32, #tpu.memory_space<vmem>>, vector<1x1x32x198xf32>
    %9 = vector.shape_cast %8 : vector<1x1x32x198xf32> to vector<32x198xf32>
    %10 = arith.truncf %9 : vector<32x198xf32> to vector<32x198xbf16>
    %c1_10 = arith.constant 1 : index
    %c0_11 = arith.constant 0 : index
    %c0_12 = arith.constant 0 : index
    %11 = vector.load %arg2[%c1_10, %c0_11, %c0_12] : memref<4x198x256xbf16, #tpu.memory_space<vmem>>, vector<1x198x256xbf16>
    %12 = vector.shape_cast %11 : vector<1x198x256xbf16> to vector<198x256xbf16>
    %cst_13 = arith.constant dense<0.000000e+00> : vector<32x256xf32>
    %13 = tpu.matmul %10, %12, %cst_13 {dimension_numbers = #tpu.dot_dimension_numbers<[1], [0], [0], [1], [0, 0, 1, 1], [], []>} : vector<32x198xbf16>, vector<198x256xbf16>, vector<32x256xf32> -> vector<32x256xf32>
    %14 = arith.addf %7, %13 : vector<32x256xf32>
    %c0_14 = arith.constant 0 : index
    %c0_15 = arith.constant 0 : index
    %c1_16 = arith.constant 1 : index
    %c0_17 = arith.constant 0 : index
    %15 = vector.load %arg1[%c0_14, %c0_15, %c1_16, %c0_17] : memref<1x2x33x198xf32, #tpu.memory_space<vmem>>, vector<1x1x32x198xf32>
    %16 = vector.shape_cast %15 : vector<1x1x32x198xf32> to vector<32x198xf32>
    %17 = arith.truncf %16 : vector<32x198xf32> to vector<32x198xbf16>
    %c2 = arith.constant 2 : index
    %c0_18 = arith.constant 0 : index
    %c0_19 = arith.constant 0 : index
    %18 = vector.load %arg2[%c2, %c0_18, %c0_19] : memref<4x198x256xbf16, #tpu.memory_space<vmem>>, vector<1x198x256xbf16>
    %19 = vector.shape_cast %18 : vector<1x198x256xbf16> to vector<198x256xbf16>
    %cst_20 = arith.constant dense<0.000000e+00> : vector<32x256xf32>
    %20 = tpu.matmul %17, %19, %cst_20 {dimension_numbers = #tpu.dot_dimension_numbers<[1], [0], [0], [1], [0, 0, 1, 1], [], []>} : vector<32x198xbf16>, vector<198x256xbf16>, vector<32x256xf32> -> vector<32x256xf32>
    %21 = arith.addf %14, %20 : vector<32x256xf32>
    %c0_21 = arith.constant 0 : index
    %c1_22 = arith.constant 1 : index
    %c1_23 = arith.constant 1 : index
    %c0_24 = arith.constant 0 : index
    %22 = vector.load %arg1[%c0_21, %c1_22, %c1_23, %c0_24] : memref<1x2x33x198xf32, #tpu.memory_space<vmem>>, vector<1x1x32x198xf32>
    %23 = vector.shape_cast %22 : vector<1x1x32x198xf32> to vector<32x198xf32>
    %24 = arith.truncf %23 : vector<32x198xf32> to vector<32x198xbf16>
    %c3 = arith.constant 3 : index
    %c0_25 = arith.constant 0 : index
    %c0_26 = arith.constant 0 : index
    %25 = vector.load %arg2[%c3, %c0_25, %c0_26] : memref<4x198x256xbf16, #tpu.memory_space<vmem>>, vector<1x198x256xbf16>
    %26 = vector.shape_cast %25 : vector<1x198x256xbf16> to vector<198x256xbf16>
    %cst_27 = arith.constant dense<0.000000e+00> : vector<32x256xf32>
    %27 = tpu.matmul %24, %26, %cst_27 {dimension_numbers = #tpu.dot_dimension_numbers<[1], [0], [0], [1], [0, 0, 1, 1], [], []>} : vector<32x198xbf16>, vector<198x256xbf16>, vector<32x256xf32> -> vector<32x256xf32>
    %28 = arith.addf %21, %27 : vector<32x256xf32>
    %c0_28 = arith.constant 0 : index
    %c0_29 = arith.constant 0 : index
    %29 = vector.load %arg3[%c0_28, %c0_29] : memref<1x256xf32, #tpu.memory_space<vmem>>, vector<1x256xf32>
    %30 = vector.broadcast %29 : vector<1x256xf32> to vector<32x256xf32>
    %31 = arith.addf %28, %30 : vector<32x256xf32>
    %cst_30 = arith.constant 0.000000e+00 : f32
    %32 = vector.broadcast %cst_30 : f32 to vector<32x256xf32>
    %33 = arith.cmpf oge, %31, %32 : vector<32x256xf32>
    %cst_31 = arith.constant 2.000000e-01 : f32
    %34 = vector.broadcast %cst_31 : f32 to vector<32x256xf32>
    %35 = arith.mulf %34, %31 : vector<32x256xf32>
    %36 = arith.select %33, %31, %35 : vector<32x256xi1>, vector<32x256xf32>
    %cst_32 = arith.constant 0.000000e+00 : f32
    %37 = vector.broadcast %cst_32 : f32 to vector<2x17x272xf32>
    %c0_33 = arith.constant 0 : index
    %c0_34 = arith.constant 0 : index
    %c0_35 = arith.constant 0 : index
    %38 = vector.load %arg17[%c0_33, %c0_34, %c0_35] : memref<2x17x272xf32, #tpu.memory_space<vmem>>, vector<2x17x272xf32>
    tpu.vector_store %arg17[%c0_33, %c0_34, %c0_35], %37 {strides = array<i32>} : memref<2x17x272xf32, #tpu.memory_space<vmem>>, vector<2x17x272xf32>,
    %c0_36 = arith.constant 0 : index
    %c0_37 = arith.constant 0 : index
    %c0_38 = arith.constant 0 : index
    %39 = vector.load %arg4[%c0_36, %c0_37, %c0_38] : memref<2x16x32xf32, #tpu.memory_space<vmem>>, vector<1x16x32xf32>
    %40 = vector.shape_cast %39 : vector<1x16x32xf32> to vector<16x32xf32>
    %cst_39 = arith.constant dense<0.000000e+00> : vector<16x256xf32>
    %41 = tpu.matmul %40, %36, %cst_39 {dimension_numbers = #tpu.dot_dimension_numbers<[1], [0], [0], [1], [0, 0, 1, 1], [], []>} : vector<16x32xf32>, vector<32x256xf32>, vector<16x256xf32> -> vector<16x256xf32>
    %c1_40 = arith.constant 1 : index
    %c0_41 = arith.constant 0 : index
    %c0_42 = arith.constant 0 : index
    %42 = vector.load %arg4[%c1_40, %c0_41, %c0_42] : memref<2x16x32xf32, #tpu.memory_space<vmem>>, vector<1x16x32xf32>
    %43 = vector.shape_cast %42 : vector<1x16x32xf32> to vector<16x32xf32>
    %cst_43 = arith.constant dense<0.000000e+00> : vector<16x256xf32>
    %44 = tpu.matmul %43, %36, %cst_43 {dimension_numbers = #tpu.dot_dimension_numbers<[1], [0], [0], [1], [0, 0, 1, 1], [], []>} : vector<16x32xf32>, vector<32x256xf32>, vector<16x256xf32> -> vector<16x256xf32>
    %c1_44 = arith.constant 1 : index
    %c0_45 = arith.constant 0 : index
    %c8 = arith.constant 8 : index
    %45 = vector.load %arg17[%c1_44, %c0_45, %c8] : memref<2x17x272xf32, #tpu.memory_space<vmem>>, vector<1x16x256xf32>
    %46 = vector.shape_cast %45 : vector<1x16x256xf32> to vector<16x256xf32>
    %47 = vector.shape_cast %41 : vector<16x256xf32> to vector<1x16x256xf32>
    tpu.vector_store %arg17[%c1_44, %c0_45, %c8], %47 {strides = array<i32>} : memref<2x17x272xf32, #tpu.memory_space<vmem>>, vector<1x16x256xf32>,
    %c0_46 = arith.constant 0 : index
    %c1_47 = arith.constant 1 : index
    %c8_48 = arith.constant 8 : index
    %48 = vector.load %arg17[%c0_46, %c1_47, %c8_48] : memref<2x17x272xf32, #tpu.memory_space<vmem>>, vector<1x16x256xf32>
    %49 = vector.shape_cast %48 : vector<1x16x256xf32> to vector<16x256xf32>
    %50 = vector.shape_cast %44 : vector<16x256xf32> to vector<1x16x256xf32>
    tpu.vector_store %arg17[%c0_46, %c1_47, %c8_48], %50 {strides = array<i32>} : memref<2x17x272xf32, #tpu.memory_space<vmem>>, vector<1x16x256xf32>,
    %cst_49 = arith.constant 0.000000e+00 : f32
    %51 = vector.broadcast %cst_49 : f32 to vector<16x256xf32>
    %c0_50 = arith.constant 0 : index
    %c0_51 = arith.constant 0 : index
    %c0_52 = arith.constant 0 : index
    %52 = vector.load %arg17[%c0_50, %c0_51, %c0_52] : memref<2x17x272xf32, #tpu.memory_space<vmem>>, vector<1x16x272xf32>
    %53 = vector.shape_cast %52 : vector<1x16x272xf32> to vector<16x272xf32>
    %54 = arith.truncf %53 : vector<16x272xf32> to vector<16x272xbf16>
    %c0_53 = arith.constant 0 : index
    %c0_54 = arith.constant 0 : index
    %c0_55 = arith.constant 0 : index
    %55 = vector.load %arg5[%c0_53, %c0_54, %c0_55] : memref<4x272x256xbf16, #tpu.memory_space<vmem>>, vector<1x272x256xbf16>
    %56 = vector.shape_cast %55 : vector<1x272x256xbf16> to vector<272x256xbf16>
    %cst_56 = arith.constant dense<0.000000e+00> : vector<16x256xf32>
    %57 = tpu.matmul %54, %56, %cst_56 {dimension_numbers = #tpu.dot_dimension_numbers<[1], [0], [0], [1], [0, 0, 1, 1], [], []>} : vector<16x272xbf16>, vector<272x256xbf16>, vector<16x256xf32> -> vector<16x256xf32>
    %58 = arith.addf %51, %57 : vector<16x256xf32>
    %c1_57 = arith.constant 1 : index
    %c0_58 = arith.constant 0 : index
    %c0_59 = arith.constant 0 : index
    %59 = vector.load %arg17[%c1_57, %c0_58, %c0_59] : memref<2x17x272xf32, #tpu.memory_space<vmem>>, vector<1x16x272xf32>
    %60 = vector.shape_cast %59 : vector<1x16x272xf32> to vector<16x272xf32>
    %61 = arith.truncf %60 : vector<16x272xf32> to vector<16x272xbf16>
    %c1_60 = arith.constant 1 : index
    %c0_61 = arith.constant 0 : index
    %c0_62 = arith.constant 0 : index
    %62 = vector.load %arg5[%c1_60, %c0_61, %c0_62] : memref<4x272x256xbf16, #tpu.memory_space<vmem>>, vector<1x272x256xbf16>
    %63 = vector.shape_cast %62 : vector<1x272x256xbf16> to vector<272x256xbf16>
    %cst_63 = arith.constant dense<0.000000e+00> : vector<16x256xf32>
    %64 = tpu.matmul %61, %63, %cst_63 {dimension_numbers = #tpu.dot_dimension_numbers<[1], [0], [0], [1], [0, 0, 1, 1], [], []>} : vector<16x272xbf16>, vector<272x256xbf16>, vector<16x256xf32> -> vector<16x256xf32>
    %65 = arith.addf %58, %64 : vector<16x256xf32>
    %c0_64 = arith.constant 0 : index
    %c1_65 = arith.constant 1 : index
    %c0_66 = arith.constant 0 : index
    %66 = vector.load %arg17[%c0_64, %c1_65, %c0_66] : memref<2x17x272xf32, #tpu.memory_space<vmem>>, vector<1x16x272xf32>
    %67 = vector.shape_cast %66 : vector<1x16x272xf32> to vector<16x272xf32>
    %68 = arith.truncf %67 : vector<16x272xf32> to vector<16x272xbf16>
    %c2_67 = arith.constant 2 : index
    %c0_68 = arith.constant 0 : index
    %c0_69 = arith.constant 0 : index
    %69 = vector.load %arg5[%c2_67, %c0_68, %c0_69] : memref<4x272x256xbf16, #tpu.memory_space<vmem>>, vector<1x272x256xbf16>
    %70 = vector.shape_cast %69 : vector<1x272x256xbf16> to vector<272x256xbf16>
    %cst_70 = arith.constant dense<0.000000e+00> : vector<16x256xf32>
    %71 = tpu.matmul %68, %70, %cst_70 {dimension_numbers = #tpu.dot_dimension_numbers<[1], [0], [0], [1], [0, 0, 1, 1], [], []>} : vector<16x272xbf16>, vector<272x256xbf16>, vector<16x256xf32> -> vector<16x256xf32>
    %72 = arith.addf %65, %71 : vector<16x256xf32>
    %c1_71 = arith.constant 1 : index
    %c1_72 = arith.constant 1 : index
    %c0_73 = arith.constant 0 : index
    %73 = vector.load %arg17[%c1_71, %c1_72, %c0_73] : memref<2x17x272xf32, #tpu.memory_space<vmem>>, vector<1x16x272xf32>
    %74 = vector.shape_cast %73 : vector<1x16x272xf32> to vector<16x272xf32>
    %75 = arith.truncf %74 : vector<16x272xf32> to vector<16x272xbf16>
    %c3_74 = arith.constant 3 : index
    %c0_75 = arith.constant 0 : index
    %c0_76 = arith.constant 0 : index
    %76 = vector.load %arg5[%c3_74, %c0_75, %c0_76] : memref<4x272x256xbf16, #tpu.memory_space<vmem>>, vector<1x272x256xbf16>
    %77 = vector.shape_cast %76 : vector<1x272x256xbf16> to vector<272x256xbf16>
    %cst_77 = arith.constant dense<0.000000e+00> : vector<16x256xf32>
    %78 = tpu.matmul %75, %77, %cst_77 {dimension_numbers = #tpu.dot_dimension_numbers<[1], [0], [0], [1], [0, 0, 1, 1], [], []>} : vector<16x272xbf16>, vector<272x256xbf16>, vector<16x256xf32> -> vector<16x256xf32>
    %79 = arith.addf %72, %78 : vector<16x256xf32>
    %c0_78 = arith.constant 0 : index
    %c0_79 = arith.constant 0 : index
    %80 = vector.load %arg6[%c0_78, %c0_79] : memref<1x256xf32, #tpu.memory_space<vmem>>, vector<1x256xf32>
    %81 = vector.broadcast %80 : vector<1x256xf32> to vector<16x256xf32>
    %82 = arith.addf %79, %81 : vector<16x256xf32>
    %cst_80 = arith.constant dense<0.000000e+00> : vector<256xf32>
    %83 = vector.multi_reduction <add>, %82, %cst_80 [0] : vector<16x256xf32> to vector<256xf32>
    %84 = vector.shape_cast %83 : vector<256xf32> to vector<1x256xf32>
    %85 = arith.mulf %82, %82 : vector<16x256xf32>
    %cst_81 = arith.constant dense<0.000000e+00> : vector<256xf32>
    %86 = vector.multi_reduction <add>, %85, %cst_81 [0] : vector<16x256xf32> to vector<256xf32>
    %87 = vector.shape_cast %86 : vector<256xf32> to vector<1x256xf32>
    %c0_82 = arith.constant 0 : index
    %c0_83 = arith.constant 0 : index
    %88 = vector.load %arg7[%c0_82, %c0_83] : memref<256x16xf32, #tpu.memory_space<vmem>>, vector<256x16xf32>
    %cst_84 = arith.constant dense<0.000000e+00> : vector<1x16xf32>
    %89 = tpu.matmul %84, %88, %cst_84 {dimension_numbers = #tpu.dot_dimension_numbers<[1], [0], [0], [1], [0, 0, 1, 1], [], []>} : vector<1x256xf32>, vector<256x16xf32>, vector<1x16xf32> -> vector<1x16xf32>
    %c0_85 = arith.constant 0 : index
    %c0_86 = arith.constant 0 : index
    %90 = vector.load %arg7[%c0_85, %c0_86] : memref<256x16xf32, #tpu.memory_space<vmem>>, vector<256x16xf32>
    %cst_87 = arith.constant dense<0.000000e+00> : vector<1x16xf32>
    %91 = tpu.matmul %87, %90, %cst_87 {dimension_numbers = #tpu.dot_dimension_numbers<[1], [0], [0], [1], [0, 0, 1, 1], [], []>} : vector<1x256xf32>, vector<256x16xf32>, vector<1x16xf32> -> vector<1x16xf32>
    %cst_88 = arith.constant 3.906250e-03 : f32
    %92 = vector.broadcast %cst_88 : f32 to vector<1x16xf32>
    %93 = arith.mulf %89, %92 : vector<1x16xf32>
    %cst_89 = arith.constant 3.906250e-03 : f32
    %94 = vector.broadcast %cst_89 : f32 to vector<1x16xf32>
    %95 = arith.mulf %91, %94 : vector<1x16xf32>
    %96 = arith.mulf %93, %93 : vector<1x16xf32>
    %97 = arith.subf %95, %96 : vector<1x16xf32>
    %cst_90 = arith.constant 9.99999974E-6 : f32
    %98 = vector.broadcast %cst_90 : f32 to vector<1x16xf32>
    %99 = arith.addf %97, %98 : vector<1x16xf32>
    %100 = math.rsqrt %99 : vector<1x16xf32>
    %c0_91 = arith.constant 0 : index
    %c0_92 = arith.constant 0 : index
    %101 = vector.load %arg8[%c0_91, %c0_92] : memref<16x256xf32, #tpu.memory_space<vmem>>, vector<16x256xf32>
    %cst_93 = arith.constant dense<0.000000e+00> : vector<1x256xf32>
    %102 = tpu.matmul %93, %101, %cst_93 {dimension_numbers = #tpu.dot_dimension_numbers<[1], [0], [0], [1], [0, 0, 1, 1], [], []>} : vector<1x16xf32>, vector<16x256xf32>, vector<1x256xf32> -> vector<1x256xf32>
    %c0_94 = arith.constant 0 : index
    %c0_95 = arith.constant 0 : index
    %103 = vector.load %arg8[%c0_94, %c0_95] : memref<16x256xf32, #tpu.memory_space<vmem>>, vector<16x256xf32>
    %cst_96 = arith.constant dense<0.000000e+00> : vector<1x256xf32>
    %104 = tpu.matmul %100, %103, %cst_96 {dimension_numbers = #tpu.dot_dimension_numbers<[1], [0], [0], [1], [0, 0, 1, 1], [], []>} : vector<1x16xf32>, vector<16x256xf32>, vector<1x256xf32> -> vector<1x256xf32>
    %105 = vector.broadcast %102 : vector<1x256xf32> to vector<16x256xf32>
    %106 = arith.subf %82, %105 : vector<16x256xf32>
    %107 = vector.broadcast %104 : vector<1x256xf32> to vector<16x256xf32>
    %108 = arith.mulf %106, %107 : vector<16x256xf32>
    %cst_97 = arith.constant 0.000000e+00 : f32
    %109 = vector.broadcast %cst_97 : f32 to vector<16x256xf32>
    %110 = arith.cmpf oge, %108, %109 : vector<16x256xf32>
    %cst_98 = arith.constant 2.000000e-01 : f32
    %111 = vector.broadcast %cst_98 : f32 to vector<16x256xf32>
    %112 = arith.mulf %111, %108 : vector<16x256xf32>
    %113 = arith.select %110, %108, %112 : vector<16x256xi1>, vector<16x256xf32>
    %cst_99 = arith.constant 0.000000e+00 : f32
    %114 = vector.broadcast %cst_99 : f32 to vector<2x9x288xf32>
    %c0_100 = arith.constant 0 : index
    %c0_101 = arith.constant 0 : index
    %c0_102 = arith.constant 0 : index
    %115 = vector.load %arg18[%c0_100, %c0_101, %c0_102] : memref<2x9x288xf32, #tpu.memory_space<vmem>>, vector<2x9x288xf32>
    tpu.vector_store %arg18[%c0_100, %c0_101, %c0_102], %114 {strides = array<i32>} : memref<2x9x288xf32, #tpu.memory_space<vmem>>, vector<2x9x288xf32>,
    %c0_103 = arith.constant 0 : index
    %c0_104 = arith.constant 0 : index
    %c0_105 = arith.constant 0 : index
    %116 = vector.load %arg9[%c0_103, %c0_104, %c0_105] : memref<2x8x16xf32, #tpu.memory_space<vmem>>, vector<1x8x16xf32>
    %117 = vector.shape_cast %116 : vector<1x8x16xf32> to vector<8x16xf32>
    %cst_106 = arith.constant dense<0.000000e+00> : vector<8x256xf32>
    %118 = tpu.matmul %117, %113, %cst_106 {dimension_numbers = #tpu.dot_dimension_numbers<[1], [0], [0], [1], [0, 0, 1, 1], [], []>} : vector<8x16xf32>, vector<16x256xf32>, vector<8x256xf32> -> vector<8x256xf32>
    %c1_107 = arith.constant 1 : index
    %c0_108 = arith.constant 0 : index
    %c0_109 = arith.constant 0 : index
    %119 = vector.load %arg9[%c1_107, %c0_108, %c0_109] : memref<2x8x16xf32, #tpu.memory_space<vmem>>, vector<1x8x16xf32>
    %120 = vector.shape_cast %119 : vector<1x8x16xf32> to vector<8x16xf32>
    %cst_110 = arith.constant dense<0.000000e+00> : vector<8x256xf32>
    %121 = tpu.matmul %120, %113, %cst_110 {dimension_numbers = #tpu.dot_dimension_numbers<[1], [0], [0], [1], [0, 0, 1, 1], [], []>} : vector<8x16xf32>, vector<16x256xf32>, vector<8x256xf32> -> vector<8x256xf32>
    %c1_111 = arith.constant 1 : index
    %c0_112 = arith.constant 0 : index
    %c16 = arith.constant 16 : index
    %122 = vector.load %arg18[%c1_111, %c0_112, %c16] : memref<2x9x288xf32, #tpu.memory_space<vmem>>, vector<1x8x256xf32>
    %123 = vector.shape_cast %122 : vector<1x8x256xf32> to vector<8x256xf32>
    %124 = vector.shape_cast %118 : vector<8x256xf32> to vector<1x8x256xf32>
    tpu.vector_store %arg18[%c1_111, %c0_112, %c16], %124 {strides = array<i32>} : memref<2x9x288xf32, #tpu.memory_space<vmem>>, vector<1x8x256xf32>,
    %c0_113 = arith.constant 0 : index
    %c1_114 = arith.constant 1 : index
    %c16_115 = arith.constant 16 : index
    %125 = vector.load %arg18[%c0_113, %c1_114, %c16_115] : memref<2x9x288xf32, #tpu.memory_space<vmem>>, vector<1x8x256xf32>
    %126 = vector.shape_cast %125 : vector<1x8x256xf32> to vector<8x256xf32>
    %127 = vector.shape_cast %121 : vector<8x256xf32> to vector<1x8x256xf32>
    tpu.vector_store %arg18[%c0_113, %c1_114, %c16_115], %127 {strides = array<i32>} : memref<2x9x288xf32, #tpu.memory_space<vmem>>, vector<1x8x256xf32>,
    %cst_116 = arith.constant 0.000000e+00 : f32
    %128 = vector.broadcast %cst_116 : f32 to vector<8x256xf32>
    %c0_117 = arith.constant 0 : index
    %c0_118 = arith.constant 0 : index
    %c0_119 = arith.constant 0 : index
    %129 = vector.load %arg18[%c0_117, %c0_118, %c0_119] : memref<2x9x288xf32, #tpu.memory_space<vmem>>, vector<1x8x288xf32>
    %130 = vector.shape_cast %129 : vector<1x8x288xf32> to vector<8x288xf32>
    %131 = arith.truncf %130 : vector<8x288xf32> to vector<8x288xbf16>
    %c0_120 = arith.constant 0 : index
    %c0_121 = arith.constant 0 : index
    %c0_122 = arith.constant 0 : index
    %132 = vector.load %arg10[%c0_120, %c0_121, %c0_122] : memref<4x288x256xbf16, #tpu.memory_space<vmem>>, vector<1x288x256xbf16>
    %133 = vector.shape_cast %132 : vector<1x288x256xbf16> to vector<288x256xbf16>
    %cst_123 = arith.constant dense<0.000000e+00> : vector<8x256xf32>
    %134 = tpu.matmul %131, %133, %cst_123 {dimension_numbers = #tpu.dot_dimension_numbers<[1], [0], [0], [1], [0, 0, 1, 1], [], []>} : vector<8x288xbf16>, vector<288x256xbf16>, vector<8x256xf32> -> vector<8x256xf32>
    %135 = arith.addf %128, %134 : vector<8x256xf32>
    %c1_124 = arith.constant 1 : index
    %c0_125 = arith.constant 0 : index
    %c0_126 = arith.constant 0 : index
    %136 = vector.load %arg18[%c1_124, %c0_125, %c0_126] : memref<2x9x288xf32, #tpu.memory_space<vmem>>, vector<1x8x288xf32>
    %137 = vector.shape_cast %136 : vector<1x8x288xf32> to vector<8x288xf32>
    %138 = arith.truncf %137 : vector<8x288xf32> to vector<8x288xbf16>
    %c1_127 = arith.constant 1 : index
    %c0_128 = arith.constant 0 : index
    %c0_129 = arith.constant 0 : index
    %139 = vector.load %arg10[%c1_127, %c0_128, %c0_129] : memref<4x288x256xbf16, #tpu.memory_space<vmem>>, vector<1x288x256xbf16>
    %140 = vector.shape_cast %139 : vector<1x288x256xbf16> to vector<288x256xbf16>
    %cst_130 = arith.constant dense<0.000000e+00> : vector<8x256xf32>
    %141 = tpu.matmul %138, %140, %cst_130 {dimension_numbers = #tpu.dot_dimension_numbers<[1], [0], [0], [1], [0, 0, 1, 1], [], []>} : vector<8x288xbf16>, vector<288x256xbf16>, vector<8x256xf32> -> vector<8x256xf32>
    %142 = arith.addf %135, %141 : vector<8x256xf32>
    %c0_131 = arith.constant 0 : index
    %c1_132 = arith.constant 1 : index
    %c0_133 = arith.constant 0 : index
    %143 = vector.load %arg18[%c0_131, %c1_132, %c0_133] : memref<2x9x288xf32, #tpu.memory_space<vmem>>, vector<1x8x288xf32>
    %144 = vector.shape_cast %143 : vector<1x8x288xf32> to vector<8x288xf32>
    %145 = arith.truncf %144 : vector<8x288xf32> to vector<8x288xbf16>
    %c2_134 = arith.constant 2 : index
    %c0_135 = arith.constant 0 : index
    %c0_136 = arith.constant 0 : index
    %146 = vector.load %arg10[%c2_134, %c0_135, %c0_136] : memref<4x288x256xbf16, #tpu.memory_space<vmem>>, vector<1x288x256xbf16>
    %147 = vector.shape_cast %146 : vector<1x288x256xbf16> to vector<288x256xbf16>
    %cst_137 = arith.constant dense<0.000000e+00> : vector<8x256xf32>
    %148 = tpu.matmul %145, %147, %cst_137 {dimension_numbers = #tpu.dot_dimension_numbers<[1], [0], [0], [1], [0, 0, 1, 1], [], []>} : vector<8x288xbf16>, vector<288x256xbf16>, vector<8x256xf32> -> vector<8x256xf32>
    %149 = arith.addf %142, %148 : vector<8x256xf32>
    %c1_138 = arith.constant 1 : index
    %c1_139 = arith.constant 1 : index
    %c0_140 = arith.constant 0 : index
    %150 = vector.load %arg18[%c1_138, %c1_139, %c0_140] : memref<2x9x288xf32, #tpu.memory_space<vmem>>, vector<1x8x288xf32>
    %151 = vector.shape_cast %150 : vector<1x8x288xf32> to vector<8x288xf32>
    %152 = arith.truncf %151 : vector<8x288xf32> to vector<8x288xbf16>
    %c3_141 = arith.constant 3 : index
    %c0_142 = arith.constant 0 : index
    %c0_143 = arith.constant 0 : index
    %153 = vector.load %arg10[%c3_141, %c0_142, %c0_143] : memref<4x288x256xbf16, #tpu.memory_space<vmem>>, vector<1x288x256xbf16>
    %154 = vector.shape_cast %153 : vector<1x288x256xbf16> to vector<288x256xbf16>
    %cst_144 = arith.constant dense<0.000000e+00> : vector<8x256xf32>
    %155 = tpu.matmul %152, %154, %cst_144 {dimension_numbers = #tpu.dot_dimension_numbers<[1], [0], [0], [1], [0, 0, 1, 1], [], []>} : vector<8x288xbf16>, vector<288x256xbf16>, vector<8x256xf32> -> vector<8x256xf32>
    %156 = arith.addf %149, %155 : vector<8x256xf32>
    %c0_145 = arith.constant 0 : index
    %c0_146 = arith.constant 0 : index
    %157 = vector.load %arg11[%c0_145, %c0_146] : memref<1x256xf32, #tpu.memory_space<vmem>>, vector<1x256xf32>
    %158 = vector.broadcast %157 : vector<1x256xf32> to vector<8x256xf32>
    %159 = arith.addf %156, %158 : vector<8x256xf32>
    %cst_147 = arith.constant dense<0.000000e+00> : vector<256xf32>
    %160 = vector.multi_reduction <add>, %159, %cst_147 [0] : vector<8x256xf32> to vector<256xf32>
    %161 = vector.shape_cast %160 : vector<256xf32> to vector<1x256xf32>
    %162 = arith.mulf %159, %159 : vector<8x256xf32>
    %cst_148 = arith.constant dense<0.000000e+00> : vector<256xf32>
    %163 = vector.multi_reduction <add>, %162, %cst_148 [0] : vector<8x256xf32> to vector<256xf32>
    %164 = vector.shape_cast %163 : vector<256xf32> to vector<1x256xf32>
    %c0_149 = arith.constant 0 : index
    %c0_150 = arith.constant 0 : index
    %165 = vector.load %arg12[%c0_149, %c0_150] : memref<256x32xf32, #tpu.memory_space<vmem>>, vector<256x32xf32>
    %cst_151 = arith.constant dense<0.000000e+00> : vector<1x32xf32>
    %166 = tpu.matmul %161, %165, %cst_151 {dimension_numbers = #tpu.dot_dimension_numbers<[1], [0], [0], [1], [0, 0, 1, 1], [], []>} : vector<1x256xf32>, vector<256x32xf32>, vector<1x32xf32> -> vector<1x32xf32>
    %c0_152 = arith.constant 0 : index
    %c0_153 = arith.constant 0 : index
    %167 = vector.load %arg12[%c0_152, %c0_153] : memref<256x32xf32, #tpu.memory_space<vmem>>, vector<256x32xf32>
    %cst_154 = arith.constant dense<0.000000e+00> : vector<1x32xf32>
    %168 = tpu.matmul %164, %167, %cst_154 {dimension_numbers = #tpu.dot_dimension_numbers<[1], [0], [0], [1], [0, 0, 1, 1], [], []>} : vector<1x256xf32>, vector<256x32xf32>, vector<1x32xf32> -> vector<1x32xf32>
    %cst_155 = arith.constant 1.562500e-02 : f32
    %169 = vector.broadcast %cst_155 : f32 to vector<1x32xf32>
    %170 = arith.mulf %166, %169 : vector<1x32xf32>
    %cst_156 = arith.constant 1.562500e-02 : f32
    %171 = vector.broadcast %cst_156 : f32 to vector<1x32xf32>
    %172 = arith.mulf %168, %171 : vector<1x32xf32>
    %173 = arith.mulf %170, %170 : vector<1x32xf32>
    %174 = arith.subf %172, %173 : vector<1x32xf32>
    %cst_157 = arith.constant 9.99999974E-6 : f32
    %175 = vector.broadcast %cst_157 : f32 to vector<1x32xf32>
    %176 = arith.addf %174, %175 : vector<1x32xf32>
    %177 = math.rsqrt %176 : vector<1x32xf32>
    %c0_158 = arith.constant 0 : index
    %c0_159 = arith.constant 0 : index
    %178 = vector.load %arg13[%c0_158, %c0_159] : memref<32x256xf32, #tpu.memory_space<vmem>>, vector<32x256xf32>
    %cst_160 = arith.constant dense<0.000000e+00> : vector<1x256xf32>
    %179 = tpu.matmul %170, %178, %cst_160 {dimension_numbers = #tpu.dot_dimension_numbers<[1], [0], [0], [1], [0, 0, 1, 1], [], []>} : vector<1x32xf32>, vector<32x256xf32>, vector<1x256xf32> -> vector<1x256xf32>
    %c0_161 = arith.constant 0 : index
    %c0_162 = arith.constant 0 : index
    %180 = vector.load %arg13[%c0_161, %c0_162] : memref<32x256xf32, #tpu.memory_space<vmem>>, vector<32x256xf32>
    %cst_163 = arith.constant dense<0.000000e+00> : vector<1x256xf32>
    %181 = tpu.matmul %177, %180, %cst_163 {dimension_numbers = #tpu.dot_dimension_numbers<[1], [0], [0], [1], [0, 0, 1, 1], [], []>} : vector<1x32xf32>, vector<32x256xf32>, vector<1x256xf32> -> vector<1x256xf32>
    %182 = vector.broadcast %179 : vector<1x256xf32> to vector<8x256xf32>
    %183 = arith.subf %159, %182 : vector<8x256xf32>
    %184 = vector.broadcast %181 : vector<1x256xf32> to vector<8x256xf32>
    %185 = arith.mulf %183, %184 : vector<8x256xf32>
    %cst_164 = arith.constant 0.000000e+00 : f32
    %186 = vector.broadcast %cst_164 : f32 to vector<8x256xf32>
    %187 = arith.cmpf oge, %185, %186 : vector<8x256xf32>
    %cst_165 = arith.constant 2.000000e-01 : f32
    %188 = vector.broadcast %cst_165 : f32 to vector<8x256xf32>
    %189 = arith.mulf %188, %185 : vector<8x256xf32>
    %190 = arith.select %187, %185, %189 : vector<8x256xi1>, vector<8x256xf32>
    %cst_166 = arith.constant 0.000000e+00 : f32
    %191 = vector.broadcast %cst_166 : f32 to vector<10x320xf32>
    %c0_167 = arith.constant 0 : index
    %c0_168 = arith.constant 0 : index
    %192 = vector.load %arg19[%c0_167, %c0_168] : memref<10x320xf32, #tpu.memory_space<vmem>>, vector<10x320xf32>
    tpu.vector_store %arg19[%c0_167, %c0_168], %191 {strides = array<i32>} : memref<10x320xf32, #tpu.memory_space<vmem>>, vector<10x320xf32>,
    %c1_169 = arith.constant 1 : index
    %c32 = arith.constant 32 : index
    %193 = vector.load %arg19[%c1_169, %c32] : memref<10x320xf32, #tpu.memory_space<vmem>>, vector<8x256xf32>
    tpu.vector_store %arg19[%c1_169, %c32], %190 {strides = array<i32>} : memref<10x320xf32, #tpu.memory_space<vmem>>, vector<8x256xf32>,
    %cst_170 = arith.constant 0.000000e+00 : f32
    %194 = vector.broadcast %cst_170 : f32 to vector<8x8xf32>
    %c0_171 = arith.constant 0 : index
    %c0_172 = arith.constant 0 : index
    %195 = vector.load %arg19[%c0_171, %c0_172] : memref<10x320xf32, #tpu.memory_space<vmem>>, vector<8x320xf32>
    %196 = arith.truncf %195 : vector<8x320xf32> to vector<8x320xbf16>
    %c0_173 = arith.constant 0 : index
    %c0_174 = arith.constant 0 : index
    %c0_175 = arith.constant 0 : index
    %197 = vector.load %arg14[%c0_173, %c0_174, %c0_175] : memref<3x320x8xbf16, #tpu.memory_space<vmem>>, vector<1x320x8xbf16>
    %198 = vector.shape_cast %197 : vector<1x320x8xbf16> to vector<320x8xbf16>
    %cst_176 = arith.constant dense<0.000000e+00> : vector<8x8xf32>
    %199 = tpu.matmul %196, %198, %cst_176 {dimension_numbers = #tpu.dot_dimension_numbers<[1], [0], [0], [1], [0, 0, 1, 1], [], []>} : vector<8x320xbf16>, vector<320x8xbf16>, vector<8x8xf32> -> vector<8x8xf32>
    %200 = arith.addf %194, %199 : vector<8x8xf32>
    %c1_177 = arith.constant 1 : index
    %c0_178 = arith.constant 0 : index
    %201 = vector.load %arg19[%c1_177, %c0_178] : memref<10x320xf32, #tpu.memory_space<vmem>>, vector<8x320xf32>
    %202 = arith.truncf %201 : vector<8x320xf32> to vector<8x320xbf16>
    %c1_179 = arith.constant 1 : index
    %c0_180 = arith.constant 0 : index
    %c0_181 = arith.constant 0 : index
    %203 = vector.load %arg14[%c1_179, %c0_180, %c0_181] : memref<3x320x8xbf16, #tpu.memory_space<vmem>>, vector<1x320x8xbf16>
    %204 = vector.shape_cast %203 : vector<1x320x8xbf16> to vector<320x8xbf16>
    %cst_182 = arith.constant dense<0.000000e+00> : vector<8x8xf32>
    %205 = tpu.matmul %202, %204, %cst_182 {dimension_numbers = #tpu.dot_dimension_numbers<[1], [0], [0], [1], [0, 0, 1, 1], [], []>} : vector<8x320xbf16>, vector<320x8xbf16>, vector<8x8xf32> -> vector<8x8xf32>
    %206 = arith.addf %200, %205 : vector<8x8xf32>
    %c2_183 = arith.constant 2 : index
    %c0_184 = arith.constant 0 : index
    %207 = vector.load %arg19[%c2_183, %c0_184] : memref<10x320xf32, #tpu.memory_space<vmem>>, vector<8x320xf32>
    %208 = arith.truncf %207 : vector<8x320xf32> to vector<8x320xbf16>
    %c2_185 = arith.constant 2 : index
    %c0_186 = arith.constant 0 : index
    %c0_187 = arith.constant 0 : index
    %209 = vector.load %arg14[%c2_185, %c0_186, %c0_187] : memref<3x320x8xbf16, #tpu.memory_space<vmem>>, vector<1x320x8xbf16>
    %210 = vector.shape_cast %209 : vector<1x320x8xbf16> to vector<320x8xbf16>
    %cst_188 = arith.constant dense<0.000000e+00> : vector<8x8xf32>
    %211 = tpu.matmul %208, %210, %cst_188 {dimension_numbers = #tpu.dot_dimension_numbers<[1], [0], [0], [1], [0, 0, 1, 1], [], []>} : vector<8x320xbf16>, vector<320x8xbf16>, vector<8x8xf32> -> vector<8x8xf32>
    %212 = arith.addf %206, %211 : vector<8x8xf32>
    %c0_189 = arith.constant 0 : index
    %c0_190 = arith.constant 0 : index
    %213 = vector.load %arg15[%c0_189, %c0_190] : memref<1x8xf32, #tpu.memory_space<vmem>>, vector<1x8xf32>
    %214 = vector.broadcast %213 : vector<1x8xf32> to vector<8x8xf32>
    %215 = arith.addf %212, %214 : vector<8x8xf32>
    %c0_191 = arith.constant 0 : index
    %c0_192 = arith.constant 0 : index
    %c0_193 = arith.constant 0 : index
    %216 = vector.load %arg16[%c0_191, %c0_192, %c0_193] : memref<1x8x8xf32, #tpu.memory_space<vmem>>, vector<1x8x8xf32>
    %217 = vector.shape_cast %216 : vector<1x8x8xf32> to vector<8x8xf32>
    %218 = vector.shape_cast %215 : vector<8x8xf32> to vector<1x8x8xf32>
    tpu.vector_store %arg16[%c0_191, %c0_192, %c0_193], %218 {strides = array<i32>} : memref<1x8x8xf32, #tpu.memory_space<vmem>>, vector<1x8x8xf32>,
    return
  }
  func.func @transform_0(%arg0: i32) -> (i32, i32, i32, i32) {
    %c0_i32 = arith.constant 0 : i32
    %c0_i32_0 = arith.constant 0 : i32
    %c0_i32_1 = arith.constant 0 : i32
    %c0_i32_2 = arith.constant 0 : i32
    return %arg0, %c0_i32, %c0_i32_0, %c0_i32_1 : i32, i32, i32, i32
  }
  func.func @transform_1(%arg0: i32) -> (i32, i32, i32) {
    %c0_i32 = arith.constant 0 : i32
    %c0_i32_0 = arith.constant 0 : i32
    %c0_i32_1 = arith.constant 0 : i32
    %c0_i32_2 = arith.constant 0 : i32
    return %c0_i32, %c0_i32_0, %c0_i32_1 : i32, i32, i32
  }
  func.func @transform_2(%arg0: i32) -> (i32, i32) {
    %c0_i32 = arith.constant 0 : i32
    %c0_i32_0 = arith.constant 0 : i32
    %c0_i32_1 = arith.constant 0 : i32
    return %c0_i32, %c0_i32_0 : i32, i32
  }
  func.func @transform_3(%arg0: i32) -> (i32, i32, i32) {
    %c0_i32 = arith.constant 0 : i32
    %c0_i32_0 = arith.constant 0 : i32
    %c0_i32_1 = arith.constant 0 : i32
    %c0_i32_2 = arith.constant 0 : i32
    return %c0_i32, %c0_i32_0, %c0_i32_1 : i32, i32, i32
  }
  func.func @transform_4(%arg0: i32) -> (i32, i32, i32) {
    %c0_i32 = arith.constant 0 : i32
    %c0_i32_0 = arith.constant 0 : i32
    %c0_i32_1 = arith.constant 0 : i32
    %c0_i32_2 = arith.constant 0 : i32
    return %c0_i32, %c0_i32_0, %c0_i32_1 : i32, i32, i32
  }
  func.func @transform_5(%arg0: i32) -> (i32, i32) {
    %c0_i32 = arith.constant 0 : i32
    %c0_i32_0 = arith.constant 0 : i32
    %c0_i32_1 = arith.constant 0 : i32
    return %c0_i32, %c0_i32_0 : i32, i32
  }
  func.func @transform_6(%arg0: i32) -> (i32, i32) {
    %c0_i32 = arith.constant 0 : i32
    %c0_i32_0 = arith.constant 0 : i32
    %c0_i32_1 = arith.constant 0 : i32
    return %c0_i32, %c0_i32_0 : i32, i32
  }
  func.func @transform_7(%arg0: i32) -> (i32, i32) {
    %c0_i32 = arith.constant 0 : i32
    %c0_i32_0 = arith.constant 0 : i32
    %c0_i32_1 = arith.constant 0 : i32
    return %c0_i32, %c0_i32_0 : i32, i32
  }
  func.func @transform_8(%arg0: i32) -> (i32, i32, i32) {
    %c0_i32 = arith.constant 0 : i32
    %c0_i32_0 = arith.constant 0 : i32
    %c0_i32_1 = arith.constant 0 : i32
    %c0_i32_2 = arith.constant 0 : i32
    return %c0_i32, %c0_i32_0, %c0_i32_1 : i32, i32, i32
  }
  func.func @transform_9(%arg0: i32) -> (i32, i32, i32) {
    %c0_i32 = arith.constant 0 : i32
    %c0_i32_0 = arith.constant 0 : i32
    %c0_i32_1 = arith.constant 0 : i32
    %c0_i32_2 = arith.constant 0 : i32
    return %c0_i32, %c0_i32_0, %c0_i32_1 : i32, i32, i32
  }
  func.func @transform_10(%arg0: i32) -> (i32, i32) {
    %c0_i32 = arith.constant 0 : i32
    %c0_i32_0 = arith.constant 0 : i32
    %c0_i32_1 = arith.constant 0 : i32
    return %c0_i32, %c0_i32_0 : i32, i32
  }
  func.func @transform_11(%arg0: i32) -> (i32, i32) {
    %c0_i32 = arith.constant 0 : i32
    %c0_i32_0 = arith.constant 0 : i32
    %c0_i32_1 = arith.constant 0 : i32
    return %c0_i32, %c0_i32_0 : i32, i32
  }
  func.func @transform_12(%arg0: i32) -> (i32, i32) {
    %c0_i32 = arith.constant 0 : i32
    %c0_i32_0 = arith.constant 0 : i32
    %c0_i32_1 = arith.constant 0 : i32
    return %c0_i32, %c0_i32_0 : i32, i32
  }
  func.func @transform_13(%arg0: i32) -> (i32, i32, i32) {
    %c0_i32 = arith.constant 0 : i32
    %c0_i32_0 = arith.constant 0 : i32
    %c0_i32_1 = arith.constant 0 : i32
    %c0_i32_2 = arith.constant 0 : i32
    return %c0_i32, %c0_i32_0, %c0_i32_1 : i32, i32, i32
  }
  func.func @transform_14(%arg0: i32) -> (i32, i32) {
    %c0_i32 = arith.constant 0 : i32
    %c0_i32_0 = arith.constant 0 : i32
    %c0_i32_1 = arith.constant 0 : i32
    return %c0_i32, %c0_i32_0 : i32, i32
  }
  func.func @transform_15(%arg0: i32) -> (i32, i32, i32) {
    %c0_i32 = arith.constant 0 : i32
    %c0_i32_0 = arith.constant 0 : i32
    %c0_i32_1 = arith.constant 0 : i32
    return %arg0, %c0_i32, %c0_i32_0 : i32, i32, i32
  }
}

</mosaic_0001>

<bundles_post_ra>
// kernel: tpu_custom_call.1
= control target key start
LH: loop header
LB: loop body
LE: loop exit
PB: predicated region body
PF: predicated region fallthrough
CT: control target
= control target key end

     0   :  { %20 = vsyncpa [#allocation6], 0  ;;  %s10586_s0 = inlined_call_operand.vmem [shape: f32[2,2,33,198], index: 0, kind: input, shape index: {}]   ;;  %s10587_s1 = inlined_call_operand.vmem [shape: bf16[4,198,256], index: 1, kind: input, shape index: {}]   ;;  %s10588_s2 = inlined_call_operand.vmem [shape: f32[1,256], index: 2, kind: input, shape index: {}]   ;;  %s10589_s3 = inlined_call_operand.vmem [shape: f32[2,16,32], index: 3, kind: input, shape index: {}]   ;;  %s10590_s4 = inlined_call_operand.vmem [shape: bf16[4,272,256], index: 4, kind: input, shape index: {}]   ;;  %s10591_s5 = inlined_call_operand.vmem [shape: f32[1,256], index: 5, kind: input, shape index: {}]   ;;  %s10592_s6 = inlined_call_operand.vmem [shape: f32[256,16], index: 6, kind: input, shape index: {}]   ;;  %s10593_s7 = inlined_call_operand.vmem [shape: f32[16,256], index: 7, kind: input, shape index: {}]   ;;  %s10594_s8 = inlined_call_operand.vmem [shape: f32[2,8,16], index: 8, kind: input, shape index: {}]   ;;  %s10595_s9 = inlined_call_operand.vmem [shape: bf16[4,288,256], index: 9, kind: input, shape index: {}]   ;;  %s10596_s10 = inlined_call_operand.vmem [shape: f32[1,256], index: 10, kind: input, shape index: {}]   ;;  %s10597_s11 = inlined_call_operand.vmem [shape: f32[256,32], index: 11, kind: input, shape index: {}]   ;;  %s10598_s12 = inlined_call_operand.vmem [shape: f32[32,256], index: 12, kind: input, shape index: {}]   ;;  %s10599_s13 = inlined_call_operand.vmem [shape: bf16[3,320,8], index: 13, kind: input, shape index: {}]   ;;  %s10600_s14 = inlined_call_operand.vmem [shape: f32[1,8], index: 14, kind: input, shape index: {}]   ;;  %s10601_s15 = inlined_call_operand.hbm [shape: f32[2,8,8], index: 15, kind: output, shape index: {}]  }
   0x1   :  { %22 = vsyncpa [#allocation6 + $0x1], 0  ;;  %s8530_s18 = smov 0   ;;  %s8532_s19 = smov 0  }
   0x2   :  { %s8534_s20 = smov 0   ;;  %s8536_s21 = smov 0  }
   0x3 LB: > { %10608 = sst [smem:[#allocation8_spill]] %s8429_s18  ;;  %s8551_s22 = sadd.s32 4294967295, %s8441_s21   ;;  %s8441_s21 = sphi %s8536_s21, %s10619_s21   ;;  %s8437_s20 = sphi %s8534_s20, %s10624_s20   ;;  %s8433_s19 = sphi %s8532_s19, %s10623_s19   ;;  %s8429_s18 = sphi %s8530_s18, %s10622_s18  }
   0x4   : > { %10609 = sst [smem:[#allocation9_spill]] %s8437_s20  ;;  %s6336_s23 = sadd.s32 4294967294, %s8441_s21  }
   0x5   : > { %10610 = sst [smem:[#allocation10_spill]] %s8441_s21  ;;  %s8555_s24 = sadd.s32 1, %s8441_s21  }
   0x6   : > { %10611 = sst [smem:[#allocation11_spill]] %s8555_s24  ;;  %s355_s25 = sadd.s32 1, %s8437_s20 }
   0x7   : > { %s352_s26 = ssub.s32 %s8441_s21, %s8555_s24  ;;  %p365_p0 = scmp.ne.s32.totalorder %s8437_s20, %s8433_s19 }
   0x8   : > { %p353_p1 = scmp.eq.s32.totalorder %s352_s26, 0  ;;  %p366_p2 = scmp.eq.s32.totalorder %s8551_s22, 1 }
   0x9   : > { %p371_p3 = scmp.ne.s32.totalorder %s8433_s19, %s8429_s18  ;;  %p372_p4 = scmp.eq.s32.totalorder %s6336_s23, 1 }
   0xa   : > { %s8566_s27 = scalar_select %p353_p1, %s8437_s20, %s355_s25  }
   0xb   : > { %p8568_p5 = por %p366_p2, %p365_p0  ;;  %p8572_p6 = por %p372_p4, %p371_p3 }
   0xc   : > { %10612 = sst [smem:[#allocation12_spill]] %s8566_s27  ;;  %p6339_p7 = scmp.ge.s32.totalorder %s8441_s21, 1 }
   0xd   : > { %s10614_s29 = scalar_select %p8572_p6, 1, 0 }
   0xe   : > { %p440_p8 = scmp.lt.s32.totalorder %s8441_s21, 3 }
   0xf   : > { %10615 = sst [smem:[#allocation13_spill]] %s10614_s29 }
  0x10   : > { %p441_p9 = pnand %p6339_p7, %p440_p8 }
  0x11   : > { %v7741_v0 = vld [vmem:[%s10587_s1 + $0xcc] ss:$8 sps:$4 sm:$0xff] (!%p441_p9)   ;;  %v7743_v1 = vld [vmem:[%s10587_s1 + $0xc8] ss:$8 sps:$4 sm:$0xff] (!%p441_p9)   ;;  %p488_p10 = scmp.lt.s32.totalorder (!%p441_p9), %s8551_s22, 1  ;;  %vm695_vm0 = vcmask (!%p441_p9), 572416  }
  0x12   : > { %444 = sbr.rel (%p441_p9) target bundleno = 3352 (0xd18), region = 80  ;;  %709 = vmatprep.subr.bf16.mxu0 (!%p441_p9), %v7741_v0  ;;  %v7744_v2 = vld [vmem:[%s10587_s1 + $0xdc] ss:$8 sps:$4 sm:$0xff] (!%p441_p9)   ;;  %v7746_v3 = vld [vmem:[%s10587_s1 + $0xd8] ss:$8 sps:$4 sm:$0xff] (!%p441_p9)   ;;  %vm702_vm1 = vcmask (!%p441_p9), 1042432  }
  0x13   : > { %710 = vmatpush1.bf16.msra.mxu0 (!%p441_p9), %v7743_v1  ;;  %v7747_v4 = vld [vmem:[%s10587_s1 + $0xec] ss:$8 sps:$4 sm:$0xff] (!%p441_p9)   ;;  %v7749_v5 = vld [vmem:[%s10587_s1 + $0xe8] ss:$8 sps:$4 sm:$0xff] (!%p441_p9)   ;;  %v7750_v6 = vld [vmem:[%s10587_s1 + $0xfc] ss:$8 sps:$4 sm:$0xff] (!%p441_p9)  }
  0x14   : > { %711 = vmatprep.subr.bf16.mxu0 (!%p441_p9), %v7744_v2  ;;  %v7752_v7 = vld [vmem:[%s10587_s1 + $0xf8] ss:$8 sps:$4 sm:$0xff] (!%p441_p9)   ;;  %v7753_v8 = vld [vmem:[%s10587_s1 + $0x10c] ss:$8 sps:$4 sm:$0xff] (!%p441_p9)   ;;  %v7755_v9 = vld [vmem:[%s10587_s1 + $0x108] ss:$8 sps:$4 sm:$0xff] (!%p441_p9)  }
  0x15   : > { %v7756_v10 = vld [vmem:[%s10587_s1 + $0x11c] ss:$8 sps:$4 sm:$0xff] (!%p441_p9)   ;;  %v7758_v14 = vld [vmem:[%s10587_s1 + $0x118] ss:$8 sps:$4 sm:$0xff] (!%p441_p9)   ;;  %v7759_v15 = vld [vmem:[%s10587_s1 + $0x12c] ss:$8 sps:$4 sm:$0xff] (!%p441_p9)  }
  0x16   : > { %v7761_v16 = vld [vmem:[%s10587_s1 + $0x128] ss:$8 sps:$4 sm:$0xff] (!%p441_p9)   ;;  %v7762_v17 = vld [vmem:[%s10587_s1 + $0x13c] ss:$8 sps:$4 sm:$0xff] (!%p441_p9)   ;;  %v7764_v18 = vld [vmem:[%s10587_s1 + $0x138] ss:$8 sps:$4 sm:$0xff] (!%p441_p9)  }
  0x17   : > { %712 = vmatpush1.bf16.msra.mxu0 (!%p441_p9), %v7746_v3  ;;  %v7765_v19 = vld [vmem:[%s10587_s1 + $0x14c] ss:$8 sps:$4 sm:$0xff] (!%p441_p9)   ;;  %v7767_v20 = vld [vmem:[%s10587_s1 + $0x148] ss:$8 sps:$4 sm:$0xff] (!%p441_p9)   ;;  %v7768_v21 = vld [vmem:[%s10587_s1 + $0x15c] ss:$8 sps:$4 sm:$0xff] (!%p441_p9)  }
  0x18   : > { %713 = vmatprep.subr.bf16.mxu0 (!%p441_p9), %v7747_v4  ;;  %v7770_v22 = vld [vmem:[%s10587_s1 + $0x158] ss:$8 sps:$4 sm:$0xff] (!%p441_p9)   ;;  %v7771_v23 = vld [vmem:[%s10587_s1 + $0x16c] ss:$8 sps:$4 sm:$0xff] (!%p441_p9)   ;;  %v7773_v24 = vld [vmem:[%s10587_s1 + $0x168] ss:$8 sps:$4 sm:$0xff] (!%p441_p9)  }
  0x19   : > { %s489_s24 = scalar_select %p488_p10, %s8551_s22, 1  ;;  %v7774_v25 = vld [vmem:[%s10587_s1 + $0x17c] ss:$8 sps:$4 sm:$0xff]   ;;  %v6374_v26 = vld [vmem:[%s10587_s1 + $0x188] sm:$0x77]  ;;  %vm1583_vm3 = vcmask 261120  }
  0x1a   : > { %v7776_v27 = vld [vmem:[%s10587_s1 + $0x178] ss:$8 sps:$4 sm:$0xff]   ;;  %v6400_v28 = vcombine.high %v6374_v26, %v6374_v26  ;;  %v6399_v29 = vcombine.low %v6374_v26, %v6374_v26  ;;  %v7781_v30 = vld [vmem:[%s10587_s1 + $0x4] ss:$8 sps:$4 sm:$0xff]   ;;  %v7784_v39 = vld [vmem:[%s10587_s1 + $0x14] ss:$8 sps:$4 sm:$0xff]  }
  0x1b   : > { %s7695_s26 = smul.u32 160, %s489_s24  ;;  %714 = vmatpush1.bf16.msra.mxu0 %v7749_v5  ;;  %v7779_v37 = vld [vmem:[%s10587_s1] ss:$8 sps:$4 sm:$0xff]   ;;  %v7782_v40 = vld [vmem:[%s10587_s1 + $0x10] ss:$8 sps:$4 sm:$0xff]   ;;  %vm1563_vm12 = vcmask 130048  }
  0x1c   : > { %715 = vmatprep.subr.bf16.mxu0 %v7750_v6  ;;  %v704_v33 = vsel %vm702_vm1, %v6399_v29, 0  ;;  %v7787_v41 = vld [vmem:[%s10587_s1 + $0x24] ss:$8 sps:$4 sm:$0xff]   ;;  %v7785_v47 = vld [vmem:[%s10587_s1 + $0x20] ss:$8 sps:$4 sm:$0xff]   ;;  %vm1570_vm13 = vcmask 122880  }
  0x1d   : > { %s8610_s17 = scalar_lea.vmem %s10586_s0, %s7695_s26  ;;  %v7790_v49 = vld [vmem:[%s10587_s1 + $0x34] ss:$8 sps:$4 sm:$0xff]   ;;  %v7788_v50 = vld [vmem:[%s10587_s1 + $0x30] ss:$8 sps:$4 sm:$0xff]   ;;  %v7793_v51 = vld [vmem:[%s10587_s1 + $0x44] ss:$8 sps:$4 sm:$0xff]  }
  0x1e   : > { %v6343_v11 = vld [vmem:[%s8610_s17 + $0x58] sm:$0xff]  ;;  %v8620_v12 = vld [vmem:[%s8610_s17 + $0x68] sm:$0xff]  ;;  %v6342_v31 = vld [vmem:[%s8610_s17 + $0x50] sm:$0xff]  ;;  %vm994_vm2 = vsmask.f32 7424  ;;  %vm1786_vm14 = vcmask 1040384  }
  0x1f   : > { %716 = vmatpush1.bf16.msra.mxu0 %v7752_v7  ;;  %v541_v13 = vpack.c.bf16 %v8620_v12, %v6343_v11  ;;  %v6344_v32 = vld [vmem:[%s8610_s17 + $0x60] sm:$0xff]  ;;  %v6347_v34 = vld [vmem:[%s8610_s17 + $0x78] sm:$0xff]  ;;  %v6349_v35 = vld [vmem:[%s8610_s17 + $0x88] sm:$0xff]  ;;  %vm1775_vm15 = vcmask 1047616   ;;  %s8446_s23 = smov 16   ;;  %s8448_s27 = smov 32  }
  0x20   : > { %717 = vmatprep.subr.bf16.mxu0 %v7753_v8  ;;  %v540_v36 = vpack.c.bf16 %v6344_v32, %v6342_v31  ;;  %v8678_v38 = vpack.c.bf16 %v6349_v35, %v6347_v34  ;;  %v6346_v42 = vld [vmem:[%s8610_s17 + $0x70] sm:$0xff]  ;;  %v6348_v43 = vld [vmem:[%s8610_s17 + $0x80] sm:$0xff]  ;;  %v495_v44 = vld [vmem:[%s8610_s17 + $0x8] sm:$0xff]  ;;  %s485_s18 = sand.u32 1, %s8433_s19   ;;  %s7207_s20 = sshll.u32 %s8551_s22, 7 }
  0x21   : > { %6402 = vmatprep.mubr.msk.bf16.mxu0 %vm695_vm0, %v541_v13  ;;  %v8695_v45 = vld [vmem:[%s8610_s17 + $0x18] sm:$0xff]  ;;  %v8697_v46 = vpack.c.bf16 %v6348_v43, %v6346_v42  ;;  %v7791_v52 = vld [vmem:[%s10587_s1 + $0x40] ss:$8 sps:$4 sm:$0xff]   ;;  %v7799_v55 = vld [vmem:[%s10587_s1 + $0x64] ss:$8 sps:$4 sm:$0xff]   ;;  %s10543_s24 = scalar_lea.hbm %s10601_s15, %s7207_s20  ;;  %s8449_s22 = smov [#allocation5]  }
  0x22   : > { %v503_v48 = vpack.c.bf16 %v8695_v45, %v495_v44  ;;  %v7796_v53 = vld [vmem:[%s10587_s1 + $0x54] ss:$8 sps:$4 sm:$0xff]   ;;  %v7794_v54 = vld [vmem:[%s10587_s1 + $0x50] ss:$8 sps:$4 sm:$0xff]   ;;  %v7797_v60 = vld [vmem:[%s10587_s1 + $0x60] ss:$8 sps:$4 sm:$0xff]  }
  0x23   : > { %718 = vmatpush1.bf16.msra.mxu0 %v7755_v9  ;;  %v6488_v56 = vld [vmem:[%s8610_s17 + $0x58] sm:$0xfe]  ;;  %v6487_v57 = vld [vmem:[%s8610_s17 + $0x50] sm:$0xfe]  ;;  %v1297_v1 = vshll.u32 %v8678_v38, 16  ;;  %v1285_v8 = vshll.u32 %v8697_v46, 16 }
  0x24   : > { %719 = vmatprep.subr.bf16.mxu0 %v7756_v10  ;;  %v1246_v58 = vpack.c.bf16 %v8620_v12, %v6488_v56  ;;  %v1245_v59 = vpack.c.bf16 %v6344_v32, %v6487_v57  ;;  %v7802_v61 = vld [vmem:[%s10587_s1 + $0x74] ss:$8 sps:$4 sm:$0xff]   ;;  %v7800_v2 = vld [vmem:[%s10587_s1 + $0x70] ss:$8 sps:$4 sm:$0xff]   ;;  %v7805_v5 = vld [vmem:[%s10587_s1 + $0x84] ss:$8 sps:$4 sm:$0xff]  }
  0x25   : > { %v8742_v6 = vrot.slane %v1297_v1, 1  ;;  %v8745_v11 = vrot.slane %v1285_v8, 1  ;;  %v7803_v12 = vld [vmem:[%s10587_s1 + $0x80] ss:$8 sps:$4 sm:$0xff]   ;;  %v501_v29 = vld [vmem:[%s8610_s17 + $0x38] sm:$0xff]  ;;  %v500_v43 = vld [vmem:[%s8610_s17 + $0x30] sm:$0xff] }
  0x26   : > { %v1292_v62 = vshll.u32 %v1246_v58, 16  ;;  %v1280_v63 = vshll.u32 %v1245_v59, 16  ;;  %v1290_v0 = vshrl.u32 %v1246_v58, 16  ;;  %v1278_v4 = vshrl.u32 %v1245_v59, 16  ;;  %v494_v26 = vld [vmem:[%s8610_s17] sm:$0xff] }
  0x27   : > { %720 = vmatpush1.bf16.msra.mxu0 %v7758_v14  ;;  %v7808_v14 = vld [vmem:[%s10587_s1 + $0x94] ss:$8 sps:$4 sm:$0xff]   ;;  %v7822_v35 = vld [vmem:[%s10587_s1 + $0x1a4] ss:$8 sps:$4 sm:$0xff]   ;;  %v7832_v56 = vld [vmem:[%s10587_s1 + $0x1e0] ss:$8 sps:$4 sm:$0xff]  }
  0x28   : > { %721 = vmatprep.subr.bf16.mxu0 %v7759_v15  ;;  %v1294_v3 = vrot.slane %v1292_v62, 1  ;;  %v1282_v7 = vrot.slane %v1280_v63, 1  ;;  %v498_v42 = vld [vmem:[%s8610_s17 + $0x20] sm:$0xff]  ;;  %v7825_v44 = vld [vmem:[%s10587_s1 + $0x1b4] ss:$8 sps:$4 sm:$0xff]  }
  0x29   : > { %v7837_v57 = vld [vmem:[%s10587_s1 + $0x1f4] ss:$8 sps:$4 sm:$0xff]   ;;  %v7835_v58 = vld [vmem:[%s10587_s1 + $0x1f0] ss:$8 sps:$4 sm:$0xff]   ;;  %v7840_v59 = vld [vmem:[%s10587_s1 + $0x204] ss:$8 sps:$4 sm:$0xff]  }
  0x2a   : > { %v1295_v9 = vor.u32 %v1294_v3, %v1290_v0  ;;  %v1283_v10 = vor.u32 %v1282_v7, %v1278_v4  ;;  %v7841_v62 = vld [vmem:[%s10587_s1 + $0x210] ss:$8 sps:$4 sm:$0xff]   ;;  %v7846_v63 = vld [vmem:[%s10587_s1 + $0x224] ss:$8 sps:$4 sm:$0xff]   ;;  %v7844_v1 = vld [vmem:[%s10587_s1 + $0x220] ss:$8 sps:$4 sm:$0xff]  }
  0x2b   : > { %722 = vmatpush1.bf16.msra.mxu0 %v7761_v16  ;;  %v7806_v16 = vld [vmem:[%s10587_s1 + $0x90] ss:$8 sps:$4 sm:$0xff]   ;;  %v952_v0 = vld [vmem:[%s8610_s17] sm:$0xfe]  ;;  %v961_v4 = vld [vmem:[%s8610_s17 + $0x48] sm:$0x1] }
  0x2c   : > { %723 = vmatprep.subr.bf16.mxu0 %v7762_v17  ;;  %v8752_v13 = vsel %vm994_vm2, %v1295_v9, %v8742_v6  ;;  %v8759_v15 = vsel %vm994_vm2, %v1283_v10, %v8745_v11  ;;  %v7811_v17 = vld [vmem:[%s10587_s1 + $0xa4] ss:$8 sps:$4 sm:$0xff]   ;;  %v6457_v8 = vld [vmem:[%s10587_s1 + $0x250] sm:$0x77]  ;;  %v967_v10 = vpack.c.bf16 %v961_v4, %v961_v4  ;;  %v7885_v4 = vld [vmem:[%s10587_s1 + $0x2f8] ss:$8 sps:$4 sm:$0xff]  }
  0x2d   : > { %v7852_v7 = vld [vmem:[%s10587_s1 + $0x244] ss:$8 sps:$4 sm:$0xff]  }
  0x2f   : > { %724 = vmatpush1.bf16.msra.mxu0 %v7764_v18  ;;  %v7809_v18 = vld [vmem:[%s10587_s1 + $0xa0] ss:$8 sps:$4 sm:$0xff]  }
  0x30   : > { %725 = vmatprep.subr.bf16.mxu0 %v7765_v19  ;;  %v7814_v19 = vld [vmem:[%s10587_s1 + $0xb4] ss:$8 sps:$4 sm:$0xff]  }
  0x33   : > { %726 = vmatpush1.bf16.msra.mxu0 %v7767_v20  ;;  %v530_v20 = vld [vmem:[%s10587_s1 + $0xc0] sm:$0x77] }
  0x34   : > { %727 = vmatprep.subr.bf16.mxu0 %v7768_v21  ;;  %v953_v21 = vld [vmem:[%s8610_s17 + $0x8] sm:$0xfe] }
  0x37   : > { %728 = vmatpush1.bf16.msra.mxu0 %v7770_v22  ;;  %v7812_v22 = vld [vmem:[%s10587_s1 + $0xb0] ss:$8 sps:$4 sm:$0xff]  }
  0x38   : > { %729 = vmatprep.subr.bf16.mxu0 %v7771_v23  ;;  %v6429_v23 = vcombine.high %v530_v20, %v530_v20 }
  0x3b   : > { %730 = vmatpush1.bf16.msra.mxu0 %v7773_v24  ;;  %v6428_v24 = vcombine.low %v530_v20, %v530_v20  ;;  %v6482_v20 = vcombine.low %v6457_v8, %v6457_v8 }
  0x3c   : > { %731 = vmatprep.subr.bf16.mxu0 %v7774_v25  ;;  %v963_v25 = vpack.c.bf16 %v8695_v45, %v953_v21 }
  0x3d   : > { %v894_v31 = vsel %vm702_vm1, %v6428_v24, 0 }
  0x3e   : > { %v1010_v32 = vshll.u32 %v963_v25, 16 }
  0x3f   : > { %732 = vmatpush1.bf16.msra.mxu0 %v7776_v27  ;;  %v8783_v27 = vld [vmem:[%s8610_s17 + $0x10] sm:$0xff] }
  0x40   : > { %6401 = vmatprep.subr.msk.bf16.mxu0 %vm702_vm1, %v6400_v28  ;;  %v499_v28 = vld [vmem:[%s8610_s17 + $0x28] sm:$0xff]  ;;  %v502_v34 = vpack.c.bf16 %v8783_v27, %v494_v26  ;;  %v962_v3 = vpack.c.bf16 %v8783_v27, %v952_v0  ;;  %v1169_v27 = vsel %vm702_vm1, %v6482_v20, 0  ;;  %v7879_v0 = vld [vmem:[%s10587_s1 + $0x2d8] ss:$8 sps:$4 sm:$0xff]  }
  0x42   : > { %v998_v9 = vshll.u32 %v962_v3, 16 }
  0x43   : > { %734 = vmatpush1.bf16.msra.mxu0 %v704_v33  ;;  %v7817_v33 = vld [vmem:[%s10587_s1 + $0x190] ss:$8 sps:$4 sm:$0xff]  }
  0x44   : > { %899 = vmatprep.subr.bf16.mxu0 %v7781_v30  ;;  %v7819_v30 = vld [vmem:[%s10587_s1 + $0x194] ss:$8 sps:$4 sm:$0xff]  }
  0x46   : > { %742 = vmatmul.mubr.bf16.vlgmr.msra.gmra.mrb[0].mxu0 %v540_v36  ;;  %v8799_v36 = vpack.c.bf16 %v501_v29, %v499_v28 }
  0x47   : > { %900 = vmatpush1.bf16.msra.mxu0 %v7779_v37  ;;  %6403 = vmatprep.mubr.msk.bf16.mxu0 %vm695_vm0, %v8678_v38  ;;  %v1008_v37 = vshrl.u32 %v963_v25, 16 }
  0x48   : > { %901 = vmatprep.subr.bf16.mxu0 %v7784_v39  ;;  %v1012_v39 = vrot.slane %v1010_v32, 1  ;;  %v1027_v21 = vshrl.u32 %v8799_v36, 16 }
  0x4a   : > { %v1013_v45 = vor.u32 %v1012_v39, %v1008_v37  ;;  %v7858_v37 = vld [vmem:[%s10587_s1 + $0x268] ss:$8 sps:$4 sm:$0xff]   ;;  %v8908_v39 = vld [vmem:[%s10587_s1 + $0x318] sm:$0x77] }
  0x4b   : > { %902 = vmatpush1.bf16.msra.mxu0 %v7782_v40  ;;  %v1015_v40 = vshll.u32 %v8799_v36, 16 }
  0x4c   : > { %903 = vmatprep.subr.bf16.mxu0 %v7787_v41  ;;  %v7820_v41 = vld [vmem:[%s10587_s1 + $0x1a0] ss:$8 sps:$4 sm:$0xff]  }
  0x4e   : > { %752 = vmatmul.mubr.bf16.gmra.mrb[4].mxu0 %v8697_v46 }
  0x4f   : > { %904 = vmatpush1.bf16.msra.mxu0 %v7785_v47  ;;  %6431 = vmatprep.mubr.msk.bf16.mxu0 %vm695_vm0, %v503_v48  ;;  %v8812_v47 = vrot.slane %v1015_v40, 1  ;;  %v7823_v48 = vld [vmem:[%s10587_s1 + $0x1b0] ss:$8 sps:$4 sm:$0xff]   ;;  %v7863_v40 = vld [vmem:[%s10587_s1 + $0x27c] ss:$8 sps:$4 sm:$0xff]  }
  0x50   : > { %905 = vmatprep.subr.bf16.mxu0 %v7790_v49  ;;  %v7828_v49 = vld [vmem:[%s10587_s1 + $0x1c4] ss:$8 sps:$4 sm:$0xff]  }
  0x51   : > { %v1029_v28 = vor.u32 %v1027_v21, %v8812_v47 }
  0x53   : > { %906 = vmatpush1.bf16.msra.mxu0 %v7788_v50  ;;  %v8820_v50 = vpack.c.bf16 %v500_v43, %v498_v42 }
  0x54   : > { %907 = vmatprep.subr.bf16.mxu0 %v7793_v51  ;;  %v1018_v51 = vsel %vm994_vm2, %v1013_v45, %v8812_v47  ;;  %v7861_v45 = vld [vmem:[%s10587_s1 + $0x278] ss:$8 sps:$4 sm:$0xff]   ;;  %v7866_v47 = vld [vmem:[%s10587_s1 + $0x28c] ss:$8 sps:$4 sm:$0xff]  }
  0x57   : > { %908 = vmatpush1.bf16.msra.mxu0 %v7791_v52  ;;  %v7826_v52 = vld [vmem:[%s10587_s1 + $0x1c0] ss:$8 sps:$4 sm:$0xff]  }
  0x58   : > { %909 = vmatprep.subr.bf16.mxu0 %v7796_v53  ;;  %v7831_v53 = vld [vmem:[%s10587_s1 + $0x1d4] ss:$8 sps:$4 sm:$0xff]  }
  0x5b   : > { %910 = vmatpush1.bf16.msra.mxu0 %v7794_v54  ;;  %v7829_v54 = vld [vmem:[%s10587_s1 + $0x1d0] ss:$8 sps:$4 sm:$0xff]  }
  0x5c   : > { %911 = vmatprep.subr.bf16.mxu0 %v7799_v55  ;;  %v7834_v55 = vld [vmem:[%s10587_s1 + $0x1e4] ss:$8 sps:$4 sm:$0xff]  }
  0x5f   : > { %912 = vmatpush1.bf16.msra.mxu0 %v7797_v60  ;;  %v7838_v60 = vld [vmem:[%s10587_s1 + $0x200] ss:$8 sps:$4 sm:$0xff]  }
  0x60   : > { %913 = vmatprep.subr.bf16.mxu0 %v7802_v61  ;;  %v7843_v61 = vld [vmem:[%s10587_s1 + $0x214] ss:$8 sps:$4 sm:$0xff]  }
  0x63   : > { %914 = vmatpush1.bf16.msra.mxu0 %v7800_v2  ;;  %v7849_v2 = vld [vmem:[%s10587_s1 + $0x234] ss:$8 sps:$4 sm:$0xff]  }
  0x64   : > { %915 = vmatprep.subr.bf16.mxu0 %v7805_v5  ;;  %v7847_v5 = vld [vmem:[%s10587_s1 + $0x230] ss:$8 sps:$4 sm:$0xff]  }
  0x67   : > { %916 = vmatpush1.bf16.msra.mxu0 %v7803_v12  ;;  %v7850_v12 = vld [vmem:[%s10587_s1 + $0x240] ss:$8 sps:$4 sm:$0xff]  }
  0x68   : > { %917 = vmatprep.subr.bf16.mxu0 %v7808_v14  ;;  %v960_v14 = vld [vmem:[%s8610_s17 + $0x40] sm:$0x1] }
  0x69   : > { %v966_v26 = vpack.c.bf16 %v960_v14, %v960_v14 }
  0x6b   : > { %918 = vmatpush1.bf16.msra.mxu0 %v7806_v16  ;;  %v996_v16 = vshrl.u32 %v962_v3, 16  ;;  %v7887_v3 = vld [vmem:[%s10587_s1 + $0x2fc] ss:$8 sps:$4 sm:$0xff]  }
  0x6c   : > { %919 = vmatprep.subr.bf16.mxu0 %v7811_v17  ;;  %v1000_v17 = vrot.slane %v998_v9, 1 }
  0x6e   : > { %v1001_v24 = vor.u32 %v1000_v17, %v996_v16  ;;  %v8443_v17 = vmov 0.0  }
  0x6f   : > { %920 = vmatpush1.bf16.msra.mxu0 %v7809_v18  ;;  %v1003_v18 = vshll.u32 %v8820_v50, 16  ;;  %1654 = vmatprep.mubr.f32.mxu1 %v8443_v17  ;;  %1561 = vst [vmem:[#allocation2] sm:$0xff] %v8443_v17  ;;  %1562 = vst [vmem:[#allocation2 + $0x8] sm:$0xff] %v8443_v17 }
  0x70   : > { %921 = vmatprep.subr.bf16.mxu0 %v7814_v19  ;;  %v6483_v19 = vcombine.high %v6457_v8, %v6457_v8  ;;  %v6547_v8 = vcombine.high %v8908_v39, %v8908_v39  ;;  %1565 = vst [vmem:[#allocation2 + $0x18] sm:$0xff] %v8443_v17  ;;  %1568 = vst [vmem:[#allocation2 + $0x30] sm:$0x1] %v8443_v17 }
  0x71   : > { %v1005_v25 = vrot.slane %v1003_v18, 1  ;;  %1569 = vst [vmem:[#allocation2 + $0x38] sm:$0x1] %v8443_v17  ;;  %1572 = vst [vmem:[#allocation2 + $0x48] sm:$0xff] %v8443_v17  ;;  %v1517_v18 = vld [vmem:[%s10588_s2] sm:$0x3] }
  0x72   : > { %1575 = vst [vmem:[#allocation2 + $0x60] sm:$0xff] %v8443_v17  ;;  %1578 = vst [vmem:[#allocation2 + $0x78] sm:$0x1] %v8443_v17 }
  0x73   : > { %922 = vmatpush1.bf16.msra.mxu0 %v7812_v22  ;;  %v1031_v22 = vshll.u32 %v967_v10, 16  ;;  %v1006_v32 = vsel %vm994_vm2, %v1001_v24, %v1005_v25  ;;  %1579 = vst [vmem:[#allocation2 + $0x80] sm:$0x1] %v8443_v17  ;;  %3551 = vst [vmem:[#allocation3] sm:$0xff] %v8443_v17 }
  0x74   : > { %6430 = vmatprep.subr.msk.bf16.mxu0 %vm702_vm1, %v6429_v23  ;;  %v7857_v23 = vld [vmem:[%s10587_s1 + $0x25c] ss:$8 sps:$4 sm:$0xff]   ;;  %3552 = vst [vmem:[#allocation3 + $0x8] sm:$0xff] %v8443_v17  ;;  %3554 = vst [vmem:[#allocation3 + $0x18] sm:$0x1] %v8443_v17 }
  0x75   : > { %v1033_v29 = vrot.slane %v1031_v22, 1  ;;  %3555 = vst [vmem:[#allocation3 + $0x20] sm:$0x1] %v8443_v17  ;;  %3558 = vst [vmem:[#allocation3 + $0x30] sm:$0xff] %v8443_v17 }
  0x76   : > { %3561 = vst [vmem:[#allocation3 + $0x48] sm:$0x1] %v8443_v17  ;;  %3562 = vst [vmem:[#allocation3 + $0x50] sm:$0x1] %v8443_v17 }
  0x77   : > { %924 = vmatpush1.bf16.msra.mxu0 %v894_v31  ;;  %v7860_v31 = vld [vmem:[%s10587_s1 + $0x26c] ss:$8 sps:$4 sm:$0xff]   ;;  %5438 = vst [vmem:[#allocation4] sm:$0xff] %v8443_v17  ;;  %5439 = vst [vmem:[#allocation4 + $0x8] sm:$0xff] %v8443_v17 }
  0x78   : > { %1174 = vmatprep.subr.bf16.mxu0 %v7819_v30  ;;  %v7855_v30 = vld [vmem:[%s10587_s1 + $0x258] ss:$8 sps:$4 sm:$0xff]   ;;  %5442 = vst [vmem:[#allocation4 + $0x18] sm:$0x3] %v8443_v17  ;;  %5443 = vst [vmem:[#allocation4 + $0x20] sm:$0x3] %v8443_v17 }
  0x79   : > { %3553 = vst.msk [vmem:[#allocation3 + $0x10] sm:$0xff] %vm1583_vm3, %v8443_v17  ;;  %3560 = vst.msk [vmem:[#allocation3 + $0x40] sm:$0xff] %vm1583_vm3, %v8443_v17 }
  0x7a   : > { %932 = vmatmul.mubr.bf16.vlgmr.msra.gmra.mrb[0].mxu0 %v502_v34  ;;  %v1023_v34 = vshll.u32 %v966_v26, 16  ;;  %1574 = vst.msk [vmem:[#allocation2 + $0x58] sm:$0xff] %vm1563_vm12, %v8443_v17  ;;  %1564 = vst.msk [vmem:[#allocation2 + $0x10] sm:$0xff] %vm1563_vm12, %v8443_v17 }
  0x7b   : > { %1175 = vmatpush1.bf16.msra.mxu0 %v7817_v33  ;;  %6432 = vmatprep.mubr.msk.bf16.mxu0 %vm695_vm0, %v8799_v36  ;;  %v1019_v33 = vshrl.u32 %v8820_v50, 16  ;;  %v1034_v36 = vsel %vm994_vm2, %v1029_v28, %v1033_v29  ;;  %1567 = vst.msk [vmem:[#allocation2 + $0x28] sm:$0xff] %vm1563_vm12, %v8443_v17  ;;  %1577 = vst.msk [vmem:[#allocation2 + $0x70] sm:$0xff] %vm1563_vm12, %v8443_v17 }
  0x7c   : > { %1176 = vmatprep.subr.bf16.mxu0 %v7822_v35  ;;  %v6496_v35 = vld [vmem:[%s8610_s17 + $0x98] sm:$0x1]  ;;  %v1025_v43 = vrot.slane %v1023_v34, 1  ;;  %1571 = vst.msk [vmem:[#allocation2 + $0x40] sm:$0x1] %vm1570_vm13, %v8443_v17 }
  0x7d   : > { %v1021_v42 = vor.u32 %v1019_v33, %v1005_v25  ;;  %1580 = vst.msk [vmem:[#allocation2 + $0x88] sm:$0x1] %vm1570_vm13, %v8443_v17 }
  0x7f   : > { %1177 = vmatpush1.bf16.msra.mxu0 %v7820_v41  ;;  %v6495_v41 = vld [vmem:[%s8610_s17 + $0x90] sm:$0x1]  ;;  %s8444_s17 = smov 8  }
  0x80   : > { %1178 = vmatprep.subr.bf16.mxu0 %v7825_v44  ;;  %v1250_v44 = vpack.c.bf16 %v6496_v35, %v6496_v35 }
  0x82   : > { %942 = vmatmul.mubr.bf16.gmra.mrb[4].mxu0 %v8820_v50  ;;  %v1249_v50 = vpack.c.bf16 %v6495_v41, %v6495_v41 }
  0x83   : > { %1179 = vmatpush1.bf16.msra.mxu0 %v7823_v48  ;;  %6485 = vmatprep.mubr.msk.bf16.mxu0 %vm695_vm0, %v1018_v51  ;;  %v6546_v48 = vcombine.low %v8908_v39, %v8908_v39  ;;  %v1313_v51 = vshll.u32 %v1250_v44, 16 }
  0x84   : > { %1180 = vmatprep.subr.bf16.mxu0 %v7828_v49  ;;  %v1026_v49 = vsel %vm994_vm2, %v1021_v42, %v1025_v43 }
  0x87   : > { %1181 = vmatpush1.bf16.msra.mxu0 %v7826_v52  ;;  %v7864_v52 = vld [vmem:[%s10587_s1 + $0x288] ss:$8 sps:$4 sm:$0xff]  }
  0x88   : > { %1182 = vmatprep.subr.bf16.mxu0 %v7831_v53  ;;  %v7869_v53 = vld [vmem:[%s10587_s1 + $0x29c] ss:$8 sps:$4 sm:$0xff]  }
  0x8b   : > { %1183 = vmatpush1.bf16.msra.mxu0 %v7829_v54  ;;  %v1451_v54 = vsel %vm702_vm1, %v6546_v48, 0 }
  0x8c   : > { %1184 = vmatprep.subr.bf16.mxu0 %v7834_v55  ;;  %v1309_v55 = vshrl.u32 %v8678_v38, 16  ;;  %v7875_v38 = vld [vmem:[%s10587_s1 + $0x2bc] ss:$8 sps:$4 sm:$0xff]  }
  0x8e   : > { %v1311_v9 = vor.u32 %v1309_v55, %v8742_v6  ;;  %v1519_v6 = vlaneseq }
  0x8f   : > { %1185 = vmatpush1.bf16.msra.mxu0 %v7832_v56  ;;  %v1301_v56 = vshrl.u32 %v8697_v46, 16  ;;  %v7873_v46 = vld [vmem:[%s10587_s1 + $0x2b8] ss:$8 sps:$4 sm:$0xff]  }
  0x90   : > { %1186 = vmatprep.subr.bf16.mxu0 %v7837_v57  ;;  %v1305_v57 = vshll.u32 %v1249_v50, 16 }
  0x92   : > { %v1307_v14 = vrot.slane %v1305_v57, 1 }
  0x93   : > { %1187 = vmatpush1.bf16.msra.mxu0 %v7835_v58  ;;  %v1315_v58 = vrot.slane %v1313_v51, 1 }
  0x94   : > { %1188 = vmatprep.subr.bf16.mxu0 %v7840_v59  ;;  %v7867_v59 = vld [vmem:[%s10587_s1 + $0x298] ss:$8 sps:$4 sm:$0xff]  }
  0x95   : > { %v1316_v10 = vsel %vm994_vm2, %v1311_v9, %v1315_v58  ;;  %v7908_v9 = vld [vmem:[%s10590_s4 + $0x160] ss:$8 sps:$4 sm:$0xff]  }
  0x97   : > { %1189 = vmatpush1.bf16.msra.mxu0 %v7838_v60  ;;  %v7872_v60 = vld [vmem:[%s10587_s1 + $0x2ac] ss:$8 sps:$4 sm:$0xff]  }
  0x98   : > { %1190 = vmatprep.subr.bf16.mxu0 %v7843_v61  ;;  %v7878_v61 = vld [vmem:[%s10587_s1 + $0x2cc] ss:$8 sps:$4 sm:$0xff]  }
  0x9b   : > { %1191 = vmatpush1.bf16.msra.mxu0 %v7841_v62  ;;  %v7876_v62 = vld [vmem:[%s10587_s1 + $0x2c8] ss:$8 sps:$4 sm:$0xff]  }
  0x9c   : > { %1192 = vmatprep.subr.bf16.mxu0 %v7846_v63  ;;  %v7881_v63 = vld [vmem:[%s10587_s1 + $0x2dc] ss:$8 sps:$4 sm:$0xff]  }
  0x9f   : > { %1193 = vmatpush1.bf16.msra.mxu0 %v7844_v1  ;;  %v7884_v1 = vld [vmem:[%s10587_s1 + $0x2ec] ss:$8 sps:$4 sm:$0xff]  }
  0xa0   : > { %1194 = vmatprep.subr.bf16.mxu0 %v7849_v2  ;;  %v7882_v2 = vld [vmem:[%s10587_s1 + $0x2e8] ss:$8 sps:$4 sm:$0xff]  }
  0xa3   : > { %1195 = vmatpush1.bf16.msra.mxu0 %v7847_v5  ;;  %v7890_v5 = vld [vmem:[%s10587_s1 + $0x30c] ss:$8 sps:$4 sm:$0xff]  }
  0xa4   : > { %1196 = vmatprep.subr.bf16.mxu0 %v7852_v7  ;;  %v7888_v7 = vld [vmem:[%s10587_s1 + $0x308] ss:$8 sps:$4 sm:$0xff]  }
  0xa7   : > { %1197 = vmatpush1.bf16.msra.mxu0 %v7850_v12  ;;  %v1303_v12 = vor.u32 %v1301_v56, %v8745_v11  ;;  %v1520_v11 = vshrl.u32 %v1519_v6, 7  ;;  %v7919_v6 = vld [vmem:[%s10590_s4 + $0x194] ss:$8 sps:$4 sm:$0xff]  }
  0xa8   : > { %6484 = vmatprep.subr.msk.bf16.mxu0 %vm702_vm1, %v6483_v19 }
  0xa9   : > { %v1308_v16 = vsel %vm994_vm2, %v1303_v12, %v1307_v14  ;;  %v9019_v19 = vsub.s32 1, %v1520_v11  ;;  %v7911_v12 = vld [vmem:[%s10590_s4 + $0x170] ss:$8 sps:$4 sm:$0xff]   ;;  %v7916_v14 = vld [vmem:[%s10590_s4 + $0x184] ss:$8 sps:$4 sm:$0xff]  }
  0xab   : > { %1199 = vmatpush1.bf16.msra.mxu0 %v1169_v27  ;;  %v1526_v21 = vrot.slane %v1517_v18, %v9019_v19 }
  0xac   : > { %1456 = vmatprep.subr.bf16.mxu0 %v7857_v23 }
  0xae   : > { %1207 = vmatmul.mubr.bf16.vlgmr.msra.gmra.mrb[0].mxu0 %v1006_v32 }
  0xaf   : > { %1457 = vmatpush1.bf16.msra.mxu0 %v7855_v30  ;;  %6486 = vmatprep.mubr.msk.bf16.mxu0 %vm695_vm0, %v1034_v36 }
  0xb0   : > { %1458 = vmatprep.subr.bf16.mxu0 %v7860_v31 }
  0xb3   : > { %1459 = vmatpush1.bf16.msra.mxu0 %v7858_v37 }
  0xb4   : > { %1460 = vmatprep.subr.bf16.mxu0 %v7863_v40 }
  0xb6   : > { %1217 = vmatmul.mubr.bf16.gmra.mrb[4].mxu0 %v1026_v49 }
  0xb7   : > { %1461 = vmatpush1.bf16.msra.mxu0 %v7861_v45  ;;  %6549 = vmatprep.mubr.msk.bf16.mxu0 %vm695_vm0, %v8752_v13  ;;  %v7870_v13 = vld [vmem:[%s10587_s1 + $0x2a8] ss:$8 sps:$4 sm:$0xff]  }
  0xb8   : > { %1462 = vmatprep.subr.bf16.mxu0 %v7866_v47 }
  0xbb   : > { %1463 = vmatpush1.bf16.msra.mxu0 %v7864_v52 }
  0xbc   : > { %1464 = vmatprep.subr.bf16.mxu0 %v7869_v53 }
  0xbf   : > { %1465 = vmatpush1.bf16.msra.mxu0 %v7867_v59 }
  0xc0   : > { %1466 = vmatprep.subr.bf16.mxu0 %v7872_v60  ;;  %v1581_v60 = vld [vmem:[%s10589_s3] sm:$0xff] }
  0xc3   : > { %1467 = vmatpush1.bf16.msra.mxu0 %v7870_v13  ;;  %v1582_v13 = vld [vmem:[%s10589_s3 + $0x8] sm:$0xff] }
  0xc4   : > { %1468 = vmatprep.subr.bf16.mxu0 %v7875_v38  ;;  %v6553_v38 = vld [vmem:[%s10589_s3 + $0x10] sm:$0xff] }
  0xc7   : > { %1469 = vmatpush1.bf16.msra.mxu0 %v7873_v46  ;;  %v6554_v46 = vld [vmem:[%s10589_s3 + $0x18] sm:$0xff] }
  0xc8   : > { %1470 = vmatprep.subr.bf16.mxu0 %v7878_v61  ;;  %v7893_v61 = vld [vmem:[%s10590_s4 + $0x110] ss:$8 sps:$4 sm:$0xff]  }
  0xcb   : > { %1471 = vmatpush1.bf16.msra.mxu0 %v7876_v62  ;;  %v7895_v62 = vld [vmem:[%s10590_s4 + $0x114] ss:$8 sps:$4 sm:$0xff]  }
  0xcc   : > { %1472 = vmatprep.subr.bf16.mxu0 %v7881_v63  ;;  %v7896_v63 = vld [vmem:[%s10590_s4 + $0x120] ss:$8 sps:$4 sm:$0xff]  }
  0xcf   : > { %1473 = vmatpush1.bf16.msra.mxu0 %v7879_v0  ;;  %v7898_v0 = vld [vmem:[%s10590_s4 + $0x124] ss:$8 sps:$4 sm:$0xff]  }
  0xd0   : > { %1474 = vmatprep.subr.bf16.mxu0 %v7884_v1  ;;  %v7899_v1 = vld [vmem:[%s10590_s4 + $0x130] ss:$8 sps:$4 sm:$0xff]  }
  0xd3   : > { %1475 = vmatpush1.bf16.msra.mxu0 %v7882_v2  ;;  %v7901_v2 = vld [vmem:[%s10590_s4 + $0x134] ss:$8 sps:$4 sm:$0xff]  }
  0xd4   : > { %1476 = vmatprep.subr.bf16.mxu0 %v7887_v3  ;;  %v7904_v3 = vld [vmem:[%s10590_s4 + $0x144] ss:$8 sps:$4 sm:$0xff]  }
  0xd7   : > { %1477 = vmatpush1.bf16.msra.mxu0 %v7885_v4  ;;  %v7902_v4 = vld [vmem:[%s10590_s4 + $0x140] ss:$8 sps:$4 sm:$0xff]  }
  0xd8   : > { %1478 = vmatprep.subr.bf16.mxu0 %v7890_v5  ;;  %v7907_v5 = vld [vmem:[%s10590_s4 + $0x154] ss:$8 sps:$4 sm:$0xff]  }
  0xdb   : > { %1479 = vmatpush1.bf16.msra.mxu0 %v7888_v7  ;;  %v7905_v7 = vld [vmem:[%s10590_s4 + $0x150] ss:$8 sps:$4 sm:$0xff]  }
  0xdc   : > { %6548 = vmatprep.subr.msk.bf16.mxu0 %vm702_vm1, %v6547_v8  ;;  %v7910_v8 = vld [vmem:[%s10590_s4 + $0x164] ss:$8 sps:$4 sm:$0xff]   ;;  %vm1817_vm1 = vcmask 1047617  }
  0xdf   : > { %1481 = vmatpush1.bf16.msra.mxu0 %v1451_v54 }
  0xe2   : > { %1489 = vmatmul.mubr.bf16.vlgmr.msra.gmra.mrb[0].mxu0 %v8759_v15  ;;  %v9014_v15 = vsub.s32 0, %v1520_v11  ;;  %v7917_v11 = vld [vmem:[%s10590_s4 + $0x190] ss:$8 sps:$4 sm:$0xff]  }
  0xe3   : > { %6550 = vmatprep.mubr.msk.bf16.mxu0 %vm695_vm0, %v1316_v10  ;;  %v7913_v10 = vld [vmem:[%s10590_s4 + $0x174] ss:$8 sps:$4 sm:$0xff]   ;;  %vm1765_vm0 = vcmask 64512  }
  0xe4   : > { %v1522_v20 = vrot.slane %v1517_v18, %v9014_v15  ;;  %v7922_v18 = vld [vmem:[%s10590_s4 + $0x1a4] ss:$8 sps:$4 sm:$0xff]  }
  0xea   : > { %1499 = vmatmul.mubr.bf16.gmra.mrb[4].mxu0 %v1308_v16  ;;  %v7914_v16 = vld [vmem:[%s10590_s4 + $0x180] ss:$8 sps:$4 sm:$0xff]  }
 0x1b5   : > { %v1490_v22 = vpop.f32.mrb[0].mxu0 }
 0x1b6   : > { %v1529_v23 = vadd.f32 %v1522_v20, %v1490_v22  ;;  %v1492_v24 = vpop.f32.mrb[1].mxu0  ;;  %v7923_v22 = vld [vmem:[%s10590_s4 + $0x1b0] ss:$8 sps:$4 sm:$0xff]  }
 0x1b7   : > { %v1530_v25 = vadd.f32 %v1526_v21, %v1492_v24  ;;  %v1494_v26 = vpop.f32.mrb[2].mxu0  ;;  %v7926_v24 = vld [vmem:[%s10590_s4 + $0x1c0] ss:$8 sps:$4 sm:$0xff]  }
 0x1b8   : > { %v1545_v27 = vmul.f32 0.2, %v1529_v23  ;;  %v1531_v28 = vadd.f32 %v1522_v20, %v1494_v26  ;;  %v1496_v29 = vpop.f32.mrb[3].mxu0  ;;  %vm1537_vm4 = vcmp.ge.f32.partialorder %v1529_v23, 0.0  ;;  %v7929_v26 = vld [vmem:[%s10590_s4 + $0x1d0] ss:$8 sps:$4 sm:$0xff]  }
 0x1b9   : > { %v1546_v30 = vmul.f32 0.2, %v1530_v25  ;;  %v1532_v31 = vadd.f32 %v1526_v21, %v1496_v29  ;;  %vm1538_vm5 = vcmp.ge.f32.partialorder %v1530_v25, 0.0  ;;  %v7937_v29 = vld [vmem:[%s10590_s4 + $0x1f4] ss:$8 sps:$4 sm:$0xff]  }
 0x1ba   : > { %v1547_v32 = vmul.f32 0.2, %v1531_v28  ;;  %vm1539_vm6 = vcmp.ge.f32.partialorder %v1531_v28, 0.0  ;;  %v1553_v34 = vsel %vm1537_vm4, %v1529_v23, %v1545_v27  ;;  %v7928_v23 = vld [vmem:[%s10590_s4 + $0x1c4] ss:$8 sps:$4 sm:$0xff]   ;;  %vm1820_vm4 = vcmask 64513  }
 0x1bb   : > { %v1548_v33 = vmul.f32 0.2, %v1532_v31  ;;  %vm1540_vm7 = vcmp.ge.f32.partialorder %v1532_v31, 0.0  ;;  %v1554_v37 = vsel %vm1538_vm5, %v1530_v25, %v1546_v30  ;;  %v7931_v25 = vld [vmem:[%s10590_s4 + $0x1d4] ss:$8 sps:$4 sm:$0xff]   ;;  %vm1825_vm5 = vcmask 1040448  }
 0x1bc   : > { %v1555_v35 = vsel %vm1539_vm6, %v1531_v28, %v1547_v32  ;;  %v7934_v27 = vld [vmem:[%s10590_s4 + $0x1e4] ss:$8 sps:$4 sm:$0xff]   ;;  %v7932_v28 = vld [vmem:[%s10590_s4 + $0x1e0] ss:$8 sps:$4 sm:$0xff]   ;;  %v7935_v30 = vld [vmem:[%s10590_s4 + $0x1f0] ss:$8 sps:$4 sm:$0xff]  }
 0x1bd   : > { %v1500_v36 = vpop.f32.mrb[4].mxu0  ;;  %v1556_v39 = vsel %vm1540_vm7, %v1532_v31, %v1548_v33  ;;  %v7469_v40 = vpack.c.bf16 %v1555_v35, %v1553_v34  ;;  %v7940_v31 = vld [vmem:[%s10590_s4 + $0x204] ss:$8 sps:$4 sm:$0xff]   ;;  %v7938_v32 = vld [vmem:[%s10590_s4 + $0x200] ss:$8 sps:$4 sm:$0xff]   ;;  %vm1828_vm6 = vcmask 57344  }
 0x1be   : > { %v1533_v41 = vadd.f32 %v1522_v20, %v1500_v36  ;;  %v1502_v42 = vpop.f32.mrb[5].mxu0  ;;  %v7467_v43 = vpack.c.bf16 %v1556_v39, %v1554_v37  ;;  %v7943_v35 = vld [vmem:[%s10590_s4 + $0x214] ss:$8 sps:$4 sm:$0xff]  }
 0x1bf   : > { %v1534_v44 = vadd.f32 %v1526_v21, %v1502_v42  ;;  %v1504_v45 = vpop.f32.mrb[6].mxu0 }
 0x1c0   : > { %v1549_v47 = vmul.f32 0.2, %v1533_v41  ;;  %v1535_v48 = vadd.f32 %v1522_v20, %v1504_v45  ;;  %v1506_v49 = vpop.f32.mrb[7].mxu0  ;;  %7468 = vmatprep.subr.bf16.mxu1 %v7467_v43  ;;  %vm1541_vm8 = vcmp.ge.f32.partialorder %v1533_v41, 0.0  ;;  %v7920_v20 = vld [vmem:[%s10590_s4 + $0x1a0] ss:$8 sps:$4 sm:$0xff]  }
 0x1c1   : > { %v1550_v50 = vmul.f32 0.2, %v1534_v44  ;;  %v1536_v51 = vadd.f32 %v1526_v21, %v1506_v49  ;;  %7470 = vmatpush1.bf16.msra.mxu1 %v7469_v40  ;;  %vm1542_vm9 = vcmp.ge.f32.partialorder %v1534_v44, 0.0  ;;  %v7925_v21 = vld [vmem:[%s10590_s4 + $0x1b4] ss:$8 sps:$4 sm:$0xff]  }
 0x1c2   : > { %vm1543_vm10 = vcmp.ge.f32.partialorder %v1535_v48, 0.0  ;;  %v1551_v52 = vmul.f32 0.2, %v1535_v48  ;;  %v1557_v54 = vsel %vm1541_vm8, %v1533_v41, %v1549_v47 }
 0x1c3   : > { %vm1544_vm11 = vcmp.ge.f32.partialorder %v1536_v51, 0.0  ;;  %v1552_v53 = vmul.f32 0.2, %v1536_v51  ;;  %v1558_v56 = vsel %vm1542_vm9, %v1534_v44, %v1550_v50 }
 0x1c4   : > { %v1559_v55 = vsel %vm1543_vm10, %v1535_v48, %v1551_v52  ;;  %vm3556_vm10 = vcmask 253952  }
 0x1c5   : > { %v1560_v57 = vsel %vm1544_vm11, %v1536_v51, %v1552_v53  ;;  %v7473_v58 = vpack.c.bf16 %v1559_v55, %v1557_v54  ;;  %vm3742_vm11 = vcmask 1047681  }
 0x1c6   : > { %v7471_v59 = vpack.c.bf16 %v1560_v57, %v1558_v56 }
 0x1c8   : > { %7472 = vmatprep.subr.bf16.mxu1 %v7471_v59 }
 0x1c9   : > { %7474 = vmatpush1.bf16.msra.mxu1 %v7473_v58 }
 0x1ca   : > { %7476 = vmatprep.subr.bf16.mxu1 %v7467_v43 }
 0x1cc   : > { %6551 = vmatmul.mubr.msk.f32.vlgmr.msra.gmra.mrb[0].mxu1 %vm1583_vm3, %v1581_v60 }
 0x1cd   : > { %7478 = vmatpush1.bf16.msra.mxu1 %v7469_v40  ;;  %1660 = vmatprep.mubr.f32.mxu1 %v8443_v17 }
 0x1ce   : > { %7480 = vmatprep.subr.bf16.mxu1 %v7471_v59  ;;  %v7941_v59 = vld [vmem:[%s10590_s4 + $0x210] ss:$8 sps:$4 sm:$0xff]  }
 0x1d0   : > { %6552 = vmatmul.mubr.msk.f32.gmra.mrb[2].mxu1 %vm1583_vm3, %v1582_v13 }
 0x1d1   : > { %7482 = vmatpush1.bf16.msra.mxu1 %v7473_v58  ;;  %1740 = vmatprep.mubr.f32.mxu1 %v8443_v17 }
 0x1d2   : > { %2090 = vmatprep.subr.bf16.mxu1 %v7895_v62  ;;  %v8445_v62 = vmov 0  }
 0x1d4   : > { %6555 = vmatmul.mubr.msk.f32.vlgmr.msra.gmra.mrb[4].mxu1 %vm1583_vm3, %v6553_v38  ;;  %v7946_v38 = vld [vmem:[%s10590_s4 + $0x4] ss:$8 sps:$4 sm:$0xff]  }
 0x1d5   : > { %1746 = vmatprep.mubr.f32.mxu1 %v8443_v17  ;;  %2091 = vmatpush1.bf16.msra.mxu1 %v7893_v61 }
 0x1d6   : > { %2092 = vmatprep.subr.bf16.mxu1 %v7898_v0 }
 0x1d8   : > { %6556 = vmatmul.mubr.msk.f32.gmra.mrb[6].mxu1 %vm1583_vm3, %v6554_v46 }
 0x1d9   : > { %2093 = vmatpush1.bf16.msra.mxu1 %v7896_v63 }
 0x1da   : > { %2094 = vmatprep.subr.bf16.mxu1 %v7901_v2 }
 0x1dd   : > { %2095 = vmatpush1.bf16.msra.mxu1 %v7899_v1 }
 0x1de   : > { %2096 = vmatprep.subr.bf16.mxu1 %v7904_v3 }
 0x1e1   : > { %2097 = vmatpush1.bf16.msra.mxu1 %v7902_v4 }
 0x1e2   : > { %2098 = vmatprep.subr.bf16.mxu1 %v7907_v5 }
 0x1e5   : > { %2099 = vmatpush1.bf16.msra.mxu1 %v7905_v7  ;;  %v7944_v7 = vld [vmem:[%s10590_s4] ss:$8 sps:$4 sm:$0xff]  }
 0x1e6   : > { %2100 = vmatprep.subr.bf16.mxu1 %v7910_v8 }
 0x1e9   : > { %2101 = vmatpush1.bf16.msra.mxu1 %v7908_v9 }
 0x1ea   : > { %2102 = vmatprep.subr.bf16.mxu1 %v7913_v10 }
 0x1ed   : > { %2103 = vmatpush1.bf16.msra.mxu1 %v7911_v12  ;;  %v7949_v12 = vld [vmem:[%s10590_s4 + $0x14] ss:$8 sps:$4 sm:$0xff]  }
 0x1ee   : > { %2104 = vmatprep.subr.bf16.mxu1 %v7916_v14  ;;  %v7947_v14 = vld [vmem:[%s10590_s4 + $0x10] ss:$8 sps:$4 sm:$0xff]  }
 0x1f1   : > { %2105 = vmatpush1.bf16.msra.mxu1 %v7914_v16  ;;  %v7952_v16 = vld [vmem:[%s10590_s4 + $0x24] ss:$8 sps:$4 sm:$0xff]  }
 0x1f2   : > { %2106 = vmatprep.subr.bf16.mxu1 %v7919_v6  ;;  %v7950_v6 = vld [vmem:[%s10590_s4 + $0x20] ss:$8 sps:$4 sm:$0xff]  }
 0x1f5   : > { %2107 = vmatpush1.bf16.msra.mxu1 %v7917_v11  ;;  %v7955_v11 = vld [vmem:[%s10590_s4 + $0x34] ss:$8 sps:$4 sm:$0xff]  }
 0x1f6   : > { %2108 = vmatprep.subr.bf16.mxu1 %v7922_v18  ;;  %v7953_v18 = vld [vmem:[%s10590_s4 + $0x30] ss:$8 sps:$4 sm:$0xff]  }
 0x1f9   : > { %2109 = vmatpush1.bf16.msra.mxu1 %v7920_v20  ;;  %v7958_v20 = vld [vmem:[%s10590_s4 + $0x44] ss:$8 sps:$4 sm:$0xff]  }
 0x1fa   : > { %2110 = vmatprep.subr.bf16.mxu1 %v7925_v21  ;;  %v7956_v21 = vld [vmem:[%s10590_s4 + $0x40] ss:$8 sps:$4 sm:$0xff]  }
 0x1fd   : > { %2111 = vmatpush1.bf16.msra.mxu1 %v7923_v22  ;;  %v7961_v22 = vld [vmem:[%s10590_s4 + $0x54] ss:$8 sps:$4 sm:$0xff]  }
 0x1fe   : > { %2112 = vmatprep.subr.bf16.mxu1 %v7928_v23  ;;  %v7959_v23 = vld [vmem:[%s10590_s4 + $0x50] ss:$8 sps:$4 sm:$0xff]  }
 0x201   : > { %2113 = vmatpush1.bf16.msra.mxu1 %v7926_v24  ;;  %v7964_v24 = vld [vmem:[%s10590_s4 + $0x64] ss:$8 sps:$4 sm:$0xff]  }
 0x202   : > { %2114 = vmatprep.subr.bf16.mxu1 %v7931_v25  ;;  %v7962_v25 = vld [vmem:[%s10590_s4 + $0x60] ss:$8 sps:$4 sm:$0xff]  }
 0x205   : > { %2115 = vmatpush1.bf16.msra.mxu1 %v7929_v26  ;;  %v7967_v26 = vld [vmem:[%s10590_s4 + $0x74] ss:$8 sps:$4 sm:$0xff]  }
 0x206   : > { %2116 = vmatprep.subr.bf16.mxu1 %v7934_v27  ;;  %v7965_v27 = vld [vmem:[%s10590_s4 + $0x70] ss:$8 sps:$4 sm:$0xff]  }
 0x209   : > { %2117 = vmatpush1.bf16.msra.mxu1 %v7932_v28  ;;  %v7970_v28 = vld [vmem:[%s10590_s4 + $0x84] ss:$8 sps:$4 sm:$0xff]  }
 0x20a   : > { %2118 = vmatprep.subr.bf16.mxu1 %v7937_v29  ;;  %v7968_v29 = vld [vmem:[%s10590_s4 + $0x80] ss:$8 sps:$4 sm:$0xff]  }
 0x20d   : > { %2119 = vmatpush1.bf16.msra.mxu1 %v7935_v30  ;;  %v7973_v30 = vld [vmem:[%s10590_s4 + $0x94] ss:$8 sps:$4 sm:$0xff]  }
 0x20e   : > { %2120 = vmatprep.subr.bf16.mxu1 %v7940_v31  ;;  %v7971_v31 = vld [vmem:[%s10590_s4 + $0x90] ss:$8 sps:$4 sm:$0xff]  }
 0x211   : > { %2121 = vmatpush1.bf16.msra.mxu1 %v7938_v32  ;;  %v7976_v32 = vld [vmem:[%s10590_s4 + $0xa4] ss:$8 sps:$4 sm:$0xff]  }
 0x212   : > { %2133 = vmatprep.subr.bf16.mxu1 %v7943_v35  ;;  %v7977_v35 = vld [vmem:[%s10590_s4 + $0xb0] ss:$8 sps:$4 sm:$0xff]  }
 0x29f   : > { %v1656_v33 = vpop.f32.mrb[0].mxu1 }
 0x2a0   : > { %1757 = vrot.lane.b32.xlu0 %v1656_v33, %s8444_s17  ;;  %v1658_v34 = vpop.f32.mrb[1].mxu1  ;;  %v7974_v33 = vld [vmem:[%s10590_s4 + $0xa0] ss:$8 sps:$4 sm:$0xff]  }
 0x2a3   : > { %v1662_v36 = vpop.f32.mrb[2].mxu1 }
 0x2a4   : > { %1759 = vrot.lane.b32.xlu0 %v1658_v34, %s8444_s17  ;;  %1761 = vrot.lane.b32.xlu1 %v1662_v36, %s8444_s17  ;;  %v1664_v37 = vpop.f32.mrb[3].mxu1  ;;  %v7979_v34 = vld [vmem:[%s10590_s4 + $0xb4] ss:$8 sps:$4 sm:$0xff]   ;;  %v7982_v36 = vld [vmem:[%s10590_s4 + $0xc4] ss:$8 sps:$4 sm:$0xff]  }
 0x2a7   : > { %v1742_v39 = vpop.f32.mrb[4].mxu1 }
 0x2a8   : > { %1763 = vrot.lane.b32.xlu1 %v1664_v37, %s8444_s17  ;;  %v1787_v40 = vrot.slane %v1742_v39, 7  ;;  %v1744_v41 = vpop.f32.mrb[5].mxu1  ;;  %v7980_v37 = vld [vmem:[%s10590_s4 + $0xc0] ss:$8 sps:$4 sm:$0xff]   ;;  %v7985_v39 = vld [vmem:[%s10590_s4 + $0xd4] ss:$8 sps:$4 sm:$0xff]  }
 0x2a9   : > { %v1788_v42 = vrot.slane %v1744_v41, 7  ;;  %v7988_v41 = vld [vmem:[%s10590_s4 + $0xe4] ss:$8 sps:$4 sm:$0xff]  }
 0x2aa   : > { %1793 = vrot.lane.b32.xlu0 %v1787_v40, %s8444_s17 }
 0x2ab   : > { %v1748_v17 = vpop.f32.mrb[6].mxu1 }
 0x2ac   : > { %v1789_v43 = vrot.slane %v1748_v17, 7  ;;  %1795 = vrot.lane.b32.xlu1 %v1788_v42, %s8444_s17  ;;  %v1750_v44 = vpop.f32.mrb[7].mxu1  ;;  %v7991_v17 = vld [vmem:[%s10590_s4 + $0xf4] ss:$8 sps:$4 sm:$0xff]  }
 0x2ad   : > { %v1791_v45 = vrot.slane %v1750_v44, 7 }
 0x2ae   : > { %v1790_v47 = vsel %vm1786_vm14, %v1787_v40, %v1789_v43  ;;  %v7983_v40 = vld [vmem:[%s10590_s4 + $0xd0] ss:$8 sps:$4 sm:$0xff]  }
 0x2af   : > { %1797 = vrot.lane.b32.xlu0 %v1790_v47, %s8444_s17  ;;  %v1792_v48 = vsel %vm1786_vm14, %v1788_v42, %v1791_v45  ;;  %v7986_v42 = vld [vmem:[%s10590_s4 + $0xe0] ss:$8 sps:$4 sm:$0xff]   ;;  %vm3747_vm14 = vcmask 1040512  }
 0x2b0   : > { %1799 = vrot.lane.b32.xlu1 %v1792_v48, %s8444_s17 }
 0x2b3   : > { %1801 = vrot.lane.b32.xlu0 %v1789_v43, %s8444_s17  ;;  %v7989_v43 = vld [vmem:[%s10590_s4 + $0xf0] ss:$8 sps:$4 sm:$0xff]  }
 0x2b4   : > { %1803 = vrot.lane.b32.xlu1 %v1791_v45, %s8444_s17  ;;  %v7994_v45 = vld [vmem:[%s10590_s4 + $0x104] ss:$8 sps:$4 sm:$0xff]   ;;  %s6340_s17 = sshll.u32 %s485_s18, 3 }
 0x312   : > { %v1758_v49 = vpop.permute.xlu0 %1757 }
 0x313   : > { %1776 = vst.msk [vmem:[#allocation2 + $0x48] sm:$0xff] %vm1775_vm15, %v1758_v49 }
 0x316   : > { %v1760_v50 = vpop.permute.xlu0 %1759  ;;  %v1762_v51 = vpop.permute.xlu1 %1761 }
 0x317   : > { %v1766_v52 = vsel %vm1765_vm0, %v1758_v49, %v1760_v50  ;;  %1778 = vst.msk [vmem:[#allocation2 + $0x58] sm:$0xff] %vm1765_vm0, %v1760_v50  ;;  %v7992_v50 = vld [vmem:[%s10590_s4 + $0x100] ss:$8 sps:$4 sm:$0xff]  }
 0x318   : > { %1779 = vst.msk [vmem:[#allocation2 + $0x60] sm:$0xff] %vm1775_vm15, %v1762_v51  ;;  %1777 = vst [vmem:[#allocation2 + $0x50] sm:$0xff] %v1766_v52 }
 0x31a   : > { %v1764_v53 = vpop.permute.xlu1 %1763  ;;  %v1873_v57 = vld [vmem:[#allocation2 + $0x48] sm:$0xff] }
 0x31b   : > { %v9158_v54 = vsel %vm1765_vm0, %v1762_v51, %v1764_v53  ;;  %1781 = vst.msk [vmem:[#allocation2 + $0x70] sm:$0xff] %vm1765_vm0, %v1764_v53  ;;  %v7997_v53 = vld [vmem:[%s10590_s4 + $0x224] ss:$8 sps:$4 sm:$0xff]  }
 0x31c   : > { %v1880_v55 = vpack.c.bf16 %v9158_v54, %v1766_v52  ;;  %v1794_v56 = vpop.permute.xlu0 %1793 }
 0x31d   : > { %1818 = vst.msk [vmem:[#allocation2] sm:$0xfe] %vm1817_vm1, %v1794_v56  ;;  %vm3726_vm1 = vcmask 1047680  }
 0x31e   : > { %2122 = vmatprep.mubr.bf16.mxu1 %v1880_v55  ;;  %v1796_v60 = vpop.permute.xlu1 %1795  ;;  %v1875_v8 = vld [vmem:[#allocation2 + $0x58] sm:$0xff] }
 0x31f   : > { %v9162_v58 = vld [vmem:[#allocation2 + $0x60] sm:$0xff]  ;;  %v1805_v46 = vsel %vm1765_vm0, %v1794_v56, %v1796_v60  ;;  %1821 = vst.msk [vmem:[#allocation2 + $0x10] sm:$0xfe] %vm1820_vm4, %v1796_v60  ;;  %vm8447_vm4 = vmmov 0  }
 0x320   : > { %v1879_v13 = vpack.c.bf16 %v9162_v58, %v1873_v57  ;;  %1819 = vst [vmem:[#allocation2 + $0x8] sm:$0xfe] %v1805_v46 }
 0x321   : > { %v1798_v61 = vpop.permute.xlu0 %1797 }
 0x322   : > { %2123 = vmatmul.mubr.bf16.vlgmr.msra.gmra.mrb[8].mxu1 %v1879_v13  ;;  %1822 = vst.msk [vmem:[#allocation2 + $0x18] sm:$0xff] %vm1775_vm15, %v1798_v61  ;;  %v1800_v63 = vpop.permute.xlu1 %1799  ;;  %v9179_v5 = vld [vmem:[#allocation2 + $0x70] sm:$0xff]  ;;  %vm3745_vm15 = vcmask 130049  }
 0x323   : > { %2134 = vmatpush1.bf16.msra.mxu1 %v7941_v59  ;;  %2165 = vmatprep.mubr.bf16.mxu1 %v8445_v62  ;;  %v9175_v0 = vsel %vm1765_vm0, %v1798_v61, %v1800_v63  ;;  %1824 = vst.msk [vmem:[#allocation2 + $0x28] sm:$0xff] %vm1765_vm0, %v1800_v63  ;;  %v1881_v10 = vpack.c.bf16 %v9179_v5, %v1875_v8  ;;  %v7995_v61 = vld [vmem:[%s10590_s4 + $0x220] ss:$8 sps:$4 sm:$0xff]   ;;  %v8006_v8 = vld [vmem:[%s10590_s4 + $0x254] ss:$8 sps:$4 sm:$0xff]  }
 0x324   : > { %2349 = vmatprep.subr.bf16.mxu1 %v7946_v38  ;;  %v1830_v47 = vld [vmem:[#allocation2] sm:$0xff] }
 0x325   : > { %v1802_v1 = vpop.permute.xlu0 %1801 }
 0x326   : > { %1826 = vst.msk [vmem:[#allocation2 + $0x30] sm:$0x1] %vm1825_vm5, %v1802_v1  ;;  %v1804_v2 = vpop.permute.xlu1 %1803  ;;  %v1832_v13 = vld [vmem:[#allocation2 + $0x10] sm:$0xff] }
 0x327   : > { %v1807_v3 = vsel %vm1765_vm0, %v1802_v1, %v1804_v2  ;;  %1829 = vst.msk [vmem:[#allocation2 + $0x40] sm:$0x1] %vm1828_vm6, %v1804_v2  ;;  %v1831_v4 = vld [vmem:[#allocation2 + $0x8] sm:$0xff]  ;;  %v8000_v1 = vld [vmem:[%s10590_s4 + $0x234] ss:$8 sps:$4 sm:$0xff]  }
 0x328   : > { %1827 = vst [vmem:[#allocation2 + $0x38] sm:$0x1] %v1807_v3  ;;  %v1837_v9 = vpack.c.bf16 %v9175_v0, %v1831_v4  ;;  %v2436_v44 = vld [vmem:[#allocation2 + $0x8] sm:$0xfe]  ;;  %v7998_v3 = vld [vmem:[%s10590_s4 + $0x230] ss:$8 sps:$4 sm:$0xff]  }
 0x329   : > { %v2445_v48 = vpack.c.bf16 %v9175_v0, %v2436_v44  ;;  %v9281_v49 = vld [vmem:[#allocation2 + $0x18] sm:$0xff]  ;;  %v8003_v4 = vld [vmem:[%s10590_s4 + $0x244] ss:$8 sps:$4 sm:$0xff]   ;;  %v8025_v44 = vld [vmem:[%s10590_s4 + $0x2c0] ss:$8 sps:$4 sm:$0xff]  }
 0x32a   : > { %v1836_v52 = vpack.c.bf16 %v9281_v49, %v1830_v47  ;;  %v9294_v63 = vld [vmem:[#allocation2 + $0x28] sm:$0xff]  ;;  %v8028_v47 = vld [vmem:[%s10590_s4 + $0x2d0] ss:$8 sps:$4 sm:$0xff]  }
 0x32b   : > { %v2500_v56 = vshll.u32 %v2445_v48, 16  ;;  %v2498_v57 = vshrl.u32 %v2445_v48, 16  ;;  %v1838_v0 = vpack.c.bf16 %v9294_v63, %v1832_v13  ;;  %v8033_v48 = vld [vmem:[%s10590_s4 + $0x2e4] ss:$8 sps:$4 sm:$0xff]   ;;  %v8037_v13 = vld [vmem:[%s10590_s4 + $0x300] ss:$8 sps:$4 sm:$0xff]  }
 0x32d   : > { %v2502_v59 = vrot.slane %v2500_v56, 1  ;;  %v8034_v56 = vld [vmem:[%s10590_s4 + $0x2f0] ss:$8 sps:$4 sm:$0xff]  }
 0x32e   : > { %6625 = vmatmul.mubr.msk.bf16.vlgmr.msra.gmra.mrb[8].mxu1 %vm1563_vm12, %v1881_v10  ;;  %v8009_v10 = vld [vmem:[%s10590_s4 + $0x264] ss:$8 sps:$4 sm:$0xff]  }
 0x32f   : > { %2350 = vmatpush1.bf16.msra.mxu1 %v7944_v7  ;;  %2381 = vmatprep.mubr.bf16.mxu1 %v1837_v9  ;;  %v2442_v51 = vld [vmem:[#allocation2 + $0x38] sm:$0x1]  ;;  %v2503_v38 = vor.u32 %v2502_v59, %v2498_v57  ;;  %v8001_v7 = vld [vmem:[%s10590_s4 + $0x240] ss:$8 sps:$4 sm:$0xff]   ;;  %v8039_v57 = vld [vmem:[%s10590_s4 + $0x304] ss:$8 sps:$4 sm:$0xff]  }
 0x330   : > { %2351 = vmatprep.subr.bf16.mxu1 %v7949_v12  ;;  %v2448_v55 = vpack.c.bf16 %v2442_v51, %v2442_v51  ;;  %v8004_v9 = vld [vmem:[%s10590_s4 + $0x250] ss:$8 sps:$4 sm:$0xff]   ;;  %v8007_v12 = vld [vmem:[%s10590_s4 + $0x260] ss:$8 sps:$4 sm:$0xff]  }
 0x331   : > { %v8031_v51 = vld [vmem:[%s10590_s4 + $0x2e0] ss:$8 sps:$4 sm:$0xff]  }
 0x332   : > { %v2505_v60 = vshll.u32 %v2448_v55, 16  ;;  %v2441_v55 = vld [vmem:[#allocation2 + $0x30] sm:$0x1] }
 0x333   : > { %2352 = vmatpush1.bf16.msra.mxu1 %v7947_v14  ;;  %v8012_v14 = vld [vmem:[%s10590_s4 + $0x274] ss:$8 sps:$4 sm:$0xff]   ;;  %v2447_v59 = vpack.c.bf16 %v2441_v55, %v2441_v55  ;;  %v8067_v55 = vld [vmem:[%s10590_s4 + $0x3a0] ss:$8 sps:$4 sm:$0xff]  }
 0x334   : > { %2353 = vmatprep.subr.bf16.mxu1 %v7952_v16  ;;  %v2507_v46 = vrot.slane %v2505_v60, 1  ;;  %v8010_v16 = vld [vmem:[%s10590_s4 + $0x270] ss:$8 sps:$4 sm:$0xff]  }
 0x336   : > { %v2508_v2 = vsel %vm994_vm2, %v2503_v38, %v2507_v46 }
 0x337   : > { %2354 = vmatpush1.bf16.msra.mxu1 %v7950_v6  ;;  %v8015_v6 = vld [vmem:[%s10590_s4 + $0x284] ss:$8 sps:$4 sm:$0xff]  }
 0x338   : > { %2355 = vmatprep.subr.bf16.mxu1 %v7955_v11  ;;  %v8013_v11 = vld [vmem:[%s10590_s4 + $0x280] ss:$8 sps:$4 sm:$0xff]  }
 0x33b   : > { %2356 = vmatpush1.bf16.msra.mxu1 %v7953_v18  ;;  %v8018_v18 = vld [vmem:[%s10590_s4 + $0x294] ss:$8 sps:$4 sm:$0xff]  }
 0x33c   : > { %2357 = vmatprep.subr.bf16.mxu1 %v7958_v20  ;;  %v8016_v20 = vld [vmem:[%s10590_s4 + $0x290] ss:$8 sps:$4 sm:$0xff]  }
 0x33f   : > { %2358 = vmatpush1.bf16.msra.mxu1 %v7956_v21  ;;  %v8021_v21 = vld [vmem:[%s10590_s4 + $0x2a4] ss:$8 sps:$4 sm:$0xff]  }
 0x340   : > { %2359 = vmatprep.subr.bf16.mxu1 %v7961_v22  ;;  %v3201_v22 = vld [vmem:[%s10592_s6 + $0x80] sm:$0xff] }
 0x343   : > { %2360 = vmatpush1.bf16.msra.mxu1 %v7959_v23  ;;  %v3202_v23 = vld [vmem:[%s10592_s6 + $0x88] sm:$0xff] }
 0x344   : > { %2361 = vmatprep.subr.bf16.mxu1 %v7964_v24  ;;  %v3185_v24 = vld [vmem:[%s10592_s6] sm:$0xff] }
 0x347   : > { %2362 = vmatpush1.bf16.msra.mxu1 %v7962_v25  ;;  %v9353_v25 = vpack.c.bf16 %v3202_v23, %v3201_v22 }
 0x348   : > { %2363 = vmatprep.subr.bf16.mxu1 %v7967_v26  ;;  %v3186_v26 = vld [vmem:[%s10592_s6 + $0x8] sm:$0xff] }
 0x349   : > { %7484 = vmatprep.subr.bf16.mxu0 %v9353_v25 }
 0x34b   : > { %2364 = vmatpush1.bf16.msra.mxu1 %v7965_v27  ;;  %v3203_v27 = vld [vmem:[%s10592_s6 + $0x90] sm:$0xff] }
 0x34c   : > { %2365 = vmatprep.subr.bf16.mxu1 %v7970_v28  ;;  %v3204_v28 = vld [vmem:[%s10592_s6 + $0x98] sm:$0xff] }
 0x34f   : > { %2366 = vmatpush1.bf16.msra.mxu1 %v7968_v29  ;;  %v9364_v29 = vpack.c.bf16 %v3186_v26, %v3185_v24 }
 0x350   : > { %2367 = vmatprep.subr.bf16.mxu1 %v7973_v30  ;;  %v9366_v30 = vpack.c.bf16 %v3204_v28, %v3203_v27 }
 0x351   : > { %7486 = vmatpush3.bf16.msra.mxu0 %v9364_v29 }
 0x352   : > { %7488 = vmatprep.subr.bf16.mxu0 %v9366_v30 }
 0x353   : > { %2368 = vmatpush1.bf16.msra.mxu1 %v7971_v31  ;;  %v3187_v31 = vld [vmem:[%s10592_s6 + $0x10] sm:$0xff] }
 0x354   : > { %2369 = vmatprep.subr.bf16.mxu1 %v7976_v32  ;;  %v3188_v32 = vld [vmem:[%s10592_s6 + $0x18] sm:$0xff] }
 0x357   : > { %2370 = vmatpush1.bf16.msra.mxu1 %v7974_v33  ;;  %v3205_v33 = vld [vmem:[%s10592_s6 + $0xa0] sm:$0xff] }
 0x358   : > { %2371 = vmatprep.subr.bf16.mxu1 %v7979_v34  ;;  %v3206_v34 = vld [vmem:[%s10592_s6 + $0xa8] sm:$0xff] }
 0x35b   : > { %2372 = vmatpush1.bf16.msra.mxu1 %v7977_v35  ;;  %v9382_v35 = vpack.c.bf16 %v3188_v32, %v3187_v31 }
 0x35c   : > { %2373 = vmatprep.subr.bf16.mxu1 %v7982_v36  ;;  %v8019_v36 = vld [vmem:[%s10590_s4 + $0x2a0] ss:$8 sps:$4 sm:$0xff]  }
 0x35d   : > { %7490 = vmatpush3.bf16.msra.mxu0 %v9382_v35 }
 0x35f   : > { %2374 = vmatpush1.bf16.msra.mxu1 %v7980_v37  ;;  %v9388_v37 = vpack.c.bf16 %v3206_v34, %v3205_v33  ;;  %v8046_v33 = vld [vmem:[%s10590_s4 + $0x330] ss:$8 sps:$4 sm:$0xff]   ;;  %v8051_v34 = vld [vmem:[%s10590_s4 + $0x344] ss:$8 sps:$4 sm:$0xff]  }
 0x360   : > { %2375 = vmatprep.subr.bf16.mxu1 %v7985_v39  ;;  %v3189_v39 = vld [vmem:[%s10592_s6 + $0x20] sm:$0xff] }
 0x361   : > { %7492 = vmatprep.subr.bf16.mxu0 %v9388_v37 }
 0x363   : > { %2376 = vmatpush1.bf16.msra.mxu1 %v7983_v40  ;;  %v3190_v40 = vld [vmem:[%s10592_s6 + $0x28] sm:$0xff] }
 0x364   : > { %2377 = vmatprep.subr.bf16.mxu1 %v7988_v41  ;;  %v8024_v41 = vld [vmem:[%s10590_s4 + $0x2b4] ss:$8 sps:$4 sm:$0xff]  }
 0x367   : > { %2378 = vmatpush1.bf16.msra.mxu1 %v7986_v42  ;;  %v9400_v42 = vpack.c.bf16 %v3190_v40, %v3189_v39  ;;  %v8049_v40 = vld [vmem:[%s10590_s4 + $0x340] ss:$8 sps:$4 sm:$0xff]  }
 0x368   : > { %2379 = vmatprep.subr.bf16.mxu1 %v7991_v17  ;;  %v8022_v17 = vld [vmem:[%s10590_s4 + $0x2b0] ss:$8 sps:$4 sm:$0xff]  }
 0x369   : > { %7494 = vmatpush3.bf16.msra.mxu0 %v9400_v42 }
 0x36b   : > { %2380 = vmatpush1.bf16.msra.mxu1 %v7989_v43  ;;  %v8027_v43 = vld [vmem:[%s10590_s4 + $0x2c4] ss:$8 sps:$4 sm:$0xff]  }
 0x36c   : > { %2392 = vmatprep.subr.bf16.mxu1 %v7994_v45  ;;  %v8030_v45 = vld [vmem:[%s10590_s4 + $0x2d4] ss:$8 sps:$4 sm:$0xff]  }
 0x36e   : > { %2382 = vmatmul.mubr.bf16.vlgmr.msra.gmra.mrb[8].mxu1 %v1836_v52  ;;  %v8036_v52 = vld [vmem:[%s10590_s4 + $0x2f4] ss:$8 sps:$4 sm:$0xff]  }
 0x36f   : > { %2393 = vmatpush1.bf16.msra.mxu1 %v7992_v50  ;;  %2424 = vmatprep.mubr.bf16.mxu1 %v8445_v62  ;;  %v2435_v50 = vld [vmem:[#allocation2] sm:$0xfe] }
 0x370   : > { %2696 = vmatprep.subr.bf16.mxu1 %v7997_v53  ;;  %v2444_v53 = vpack.c.bf16 %v9281_v49, %v2435_v50  ;;  %v8042_v49 = vld [vmem:[%s10590_s4 + $0x314] ss:$8 sps:$4 sm:$0xff]   ;;  %v8061_v50 = vld [vmem:[%s10590_s4 + $0x380] ss:$8 sps:$4 sm:$0xff]  }
 0x372   : > { %v2488_v60 = vshll.u32 %v2444_v53, 16  ;;  %v2486_v38 = vshrl.u32 %v2444_v53, 16  ;;  %v8069_v53 = vld [vmem:[%s10590_s4 + $0x3a4] ss:$8 sps:$4 sm:$0xff]  }
 0x374   : > { %v2490_v46 = vrot.slane %v2488_v60, 1  ;;  %v8073_v60 = vld [vmem:[%s10590_s4 + $0x3c0] ss:$8 sps:$4 sm:$0xff]  }
 0x37a   : > { %6660 = vmatmul.mubr.msk.bf16.vlgmr.msra.gmra.mrb[8].mxu1 %vm1563_vm12, %v1838_v0  ;;  %v2437_v0 = vld [vmem:[#allocation2 + $0x10] sm:$0xfe] }
 0x37b   : > { %2697 = vmatpush1.bf16.msra.mxu1 %v7995_v61  ;;  %2728 = vmatprep.mubr.bf16.mxu1 %v2508_v2  ;;  %v2493_v61 = vshll.u32 %v2447_v59, 16  ;;  %v2787_v2 = vld [vmem:[#allocation2 + $0x50] sm:$0xfe]  ;;  %v8075_v59 = vld [vmem:[%s10590_s4 + $0x3c4] ss:$8 sps:$4 sm:$0xff]  }
 0x37c   : > { %2698 = vmatprep.subr.bf16.mxu1 %v8000_v1  ;;  %v8040_v1 = vld [vmem:[%s10590_s4 + $0x310] ss:$8 sps:$4 sm:$0xff]  }
 0x37f   : > { %2699 = vmatpush1.bf16.msra.mxu1 %v7998_v3  ;;  %v8045_v3 = vld [vmem:[%s10590_s4 + $0x324] ss:$8 sps:$4 sm:$0xff]  }
 0x380   : > { %2700 = vmatprep.subr.bf16.mxu1 %v8003_v4  ;;  %v2491_v4 = vor.u32 %v2490_v46, %v2486_v38  ;;  %v8081_v38 = vld [vmem:[%s10590_s4 + $0x3e4] ss:$8 sps:$4 sm:$0xff]   ;;  %v8079_v46 = vld [vmem:[%s10590_s4 + $0x3e0] ss:$8 sps:$4 sm:$0xff]  }
 0x383   : > { %2701 = vmatpush1.bf16.msra.mxu1 %v8001_v7  ;;  %v2495_v7 = vrot.slane %v2493_v61, 1  ;;  %v8084_v61 = vld [vmem:[%s10590_s4 + $0x3f4] ss:$8 sps:$4 sm:$0xff]  }
 0x384   : > { %2702 = vmatprep.subr.bf16.mxu1 %v8006_v8  ;;  %v2446_v8 = vpack.c.bf16 %v9294_v63, %v2437_v0  ;;  %v8082_v0 = vld [vmem:[%s10590_s4 + $0x3f0] ss:$8 sps:$4 sm:$0xff]  }
 0x387   : > { %2703 = vmatpush1.bf16.msra.mxu1 %v8004_v9  ;;  %v2443_v9 = vld [vmem:[#allocation2 + $0x40] sm:$0x1] }
 0x388   : > { %2704 = vmatprep.subr.bf16.mxu1 %v8009_v10  ;;  %v2796_v10 = vpack.c.bf16 %v9158_v54, %v2787_v2  ;;  %v2510_v54 = vshrl.u32 %v2446_v8, 16  ;;  %v2786_v2 = vld [vmem:[#allocation2 + $0x48] sm:$0xfe] }
 0x38a   : > { %v2849_v26 = vshrl.u32 %v2796_v10, 16 }
 0x38b   : > { %2705 = vmatpush1.bf16.msra.mxu1 %v8007_v12  ;;  %v8043_v12 = vld [vmem:[%s10590_s4 + $0x320] ss:$8 sps:$4 sm:$0xff]  }
 0x38c   : > { %2706 = vmatprep.subr.bf16.mxu1 %v8012_v14  ;;  %v2793_v14 = vld [vmem:[#allocation2 + $0x80] sm:$0x1] }
 0x38d   : > { %v2799_v63 = vpack.c.bf16 %v2793_v14, %v2793_v14 }
 0x38f   : > { %2707 = vmatpush1.bf16.msra.mxu1 %v8010_v16  ;;  %v8048_v16 = vld [vmem:[%s10590_s4 + $0x334] ss:$8 sps:$4 sm:$0xff]   ;;  %v2856_v24 = vshll.u32 %v2799_v63, 16 }
 0x390   : > { %2708 = vmatprep.subr.bf16.mxu1 %v8015_v6  ;;  %v2496_v6 = vsel %vm994_vm2, %v2491_v4, %v2495_v7  ;;  %v2792_v4 = vld [vmem:[#allocation2 + $0x78] sm:$0x1]  ;;  %v8085_v7 = vld [vmem:[%s10590_s4 + $0x400] ss:$8 sps:$4 sm:$0xff]   ;;  %v2788_v63 = vld [vmem:[#allocation2 + $0x58] sm:$0xfe] }
 0x391   : > { %v2858_v32 = vrot.slane %v2856_v24, 1 }
 0x393   : > { %2709 = vmatpush1.bf16.msra.mxu1 %v8013_v11  ;;  %v2449_v11 = vpack.c.bf16 %v2443_v9, %v2443_v9  ;;  %v2798_v9 = vpack.c.bf16 %v2792_v4, %v2792_v4  ;;  %v3200_v4 = vld [vmem:[%s10592_s6 + $0x78] sm:$0xff] }
 0x394   : > { %2710 = vmatprep.subr.bf16.mxu1 %v8018_v18  ;;  %v2512_v18 = vshll.u32 %v2446_v8, 16  ;;  %v8090_v8 = vld [vmem:[%s10590_s4 + $0x414] ss:$8 sps:$4 sm:$0xff]  }
 0x395   : > { %v2517_v22 = vshll.u32 %v2449_v11, 16 }
 0x397   : > { %2711 = vmatpush1.bf16.msra.mxu1 %v8016_v20  ;;  %v2851_v20 = vshll.u32 %v2796_v10, 16  ;;  %v2519_v28 = vrot.slane %v2517_v22, 1  ;;  %v2794_v22 = vld [vmem:[#allocation2 + $0x88] sm:$0x1] }
 0x398   : > { %2712 = vmatprep.subr.bf16.mxu1 %v8021_v21  ;;  %v2514_v21 = vrot.slane %v2512_v18, 1  ;;  %v8096_v18 = vld [vmem:[%s10590_s4 + $0x434] ss:$8 sps:$4 sm:$0xff]  }
 0x399   : > { %v2853_v23 = vrot.slane %v2851_v20, 1 }
 0x39a   : > { %v2515_v27 = vor.u32 %v2514_v21, %v2510_v54  ;;  %v2797_v21 = vpack.c.bf16 %v9179_v5, %v2788_v63 }
 0x39b   : > { %2713 = vmatpush1.bf16.msra.mxu1 %v8019_v36  ;;  %v2854_v31 = vor.u32 %v2853_v23, %v2849_v26  ;;  %v8094_v23 = vld [vmem:[%s10590_s4 + $0x430] ss:$8 sps:$4 sm:$0xff]   ;;  %v2800_v26 = vpack.c.bf16 %v2794_v22, %v2794_v22 }
 0x39c   : > { %2714 = vmatprep.subr.bf16.mxu1 %v8024_v41  ;;  %v2520_v36 = vsel %vm994_vm2, %v2515_v27, %v2519_v28  ;;  %v8054_v41 = vld [vmem:[%s10590_s4 + $0x354] ss:$8 sps:$4 sm:$0xff]   ;;  %v2863_v27 = vshll.u32 %v2797_v21, 16 }
 0x39d   : > { %v2859_v39 = vsel %vm994_vm2, %v2854_v31, %v2858_v32  ;;  %v2868_v31 = vshll.u32 %v2800_v26, 16  ;;  %v2861_v32 = vshrl.u32 %v2797_v21, 16 }
 0x39e   : > { %v2865_v28 = vrot.slane %v2863_v27, 1 }
 0x39f   : > { %2715 = vmatpush1.bf16.msra.mxu1 %v8022_v17  ;;  %v8052_v17 = vld [vmem:[%s10590_s4 + $0x350] ss:$8 sps:$4 sm:$0xff]   ;;  %v2870_v5 = vrot.slane %v2868_v31, 1 }
 0x3a0   : > { %2716 = vmatprep.subr.bf16.mxu1 %v8027_v43  ;;  %v8057_v43 = vld [vmem:[%s10590_s4 + $0x364] ss:$8 sps:$4 sm:$0xff]  }
 0x3a3   : > { %2717 = vmatpush1.bf16.msra.mxu1 %v8025_v44  ;;  %v8055_v44 = vld [vmem:[%s10590_s4 + $0x360] ss:$8 sps:$4 sm:$0xff]  }
 0x3a4   : > { %2718 = vmatprep.subr.bf16.mxu1 %v8030_v45  ;;  %v8060_v45 = vld [vmem:[%s10590_s4 + $0x374] ss:$8 sps:$4 sm:$0xff]  }
 0x3a7   : > { %2719 = vmatpush1.bf16.msra.mxu1 %v8028_v47  ;;  %v8058_v47 = vld [vmem:[%s10590_s4 + $0x370] ss:$8 sps:$4 sm:$0xff]  }
 0x3a8   : > { %2720 = vmatprep.subr.bf16.mxu1 %v8033_v48  ;;  %v8063_v48 = vld [vmem:[%s10590_s4 + $0x384] ss:$8 sps:$4 sm:$0xff]  }
 0x3ab   : > { %2721 = vmatpush1.bf16.msra.mxu1 %v8031_v51  ;;  %v8066_v51 = vld [vmem:[%s10590_s4 + $0x394] ss:$8 sps:$4 sm:$0xff]  }
 0x3ac   : > { %2722 = vmatprep.subr.bf16.mxu1 %v8036_v52  ;;  %v8064_v52 = vld [vmem:[%s10590_s4 + $0x390] ss:$8 sps:$4 sm:$0xff]  }
 0x3af   : > { %2723 = vmatpush1.bf16.msra.mxu1 %v8034_v56  ;;  %v8072_v56 = vld [vmem:[%s10590_s4 + $0x3b4] ss:$8 sps:$4 sm:$0xff]  }
 0x3b0   : > { %2724 = vmatprep.subr.bf16.mxu1 %v8039_v57  ;;  %v8070_v57 = vld [vmem:[%s10590_s4 + $0x3b0] ss:$8 sps:$4 sm:$0xff]  }
 0x3b3   : > { %2725 = vmatpush1.bf16.msra.mxu1 %v8037_v13  ;;  %v8078_v13 = vld [vmem:[%s10590_s4 + $0x3d4] ss:$8 sps:$4 sm:$0xff]  }
 0x3b4   : > { %2726 = vmatprep.subr.bf16.mxu1 %v8042_v49  ;;  %v8076_v49 = vld [vmem:[%s10590_s4 + $0x3d0] ss:$8 sps:$4 sm:$0xff]  }
 0x3b7   : > { %2727 = vmatpush1.bf16.msra.mxu1 %v8040_v1  ;;  %v8087_v1 = vld [vmem:[%s10590_s4 + $0x404] ss:$8 sps:$4 sm:$0xff]  }
 0x3b8   : > { %2739 = vmatprep.subr.bf16.mxu1 %v8045_v3  ;;  %v2795_v3 = vpack.c.bf16 %v9162_v58, %v2786_v2  ;;  %v8093_v58 = vld [vmem:[%s10590_s4 + $0x424] ss:$8 sps:$4 sm:$0xff]  }
 0x3ba   : > { %2729 = vmatmul.mubr.bf16.vlgmr.msra.gmra.mrb[8].mxu1 %v2496_v6  ;;  %v2839_v10 = vshll.u32 %v2795_v3, 16  ;;  %v8091_v6 = vld [vmem:[%s10590_s4 + $0x420] ss:$8 sps:$4 sm:$0xff]   ;;  %v2837_v11 = vshrl.u32 %v2795_v3, 16  ;;  %v3199_v3 = vld [vmem:[%s10592_s6 + $0x70] sm:$0xff] }
 0x3bb   : > { %2740 = vmatpush1.bf16.msra.mxu1 %v8043_v12  ;;  %2771 = vmatprep.mubr.bf16.mxu1 %v8445_v62  ;;  %v8088_v12 = vld [vmem:[%s10590_s4 + $0x410] ss:$8 sps:$4 sm:$0xff]  }
 0x3bc   : > { %3047 = vmatprep.subr.bf16.mxu1 %v8048_v16  ;;  %v2841_v14 = vrot.slane %v2839_v10, 1  ;;  %v2844_v16 = vshll.u32 %v2798_v9, 16 }
 0x3be   : > { %v2842_v20 = vor.u32 %v2841_v14, %v2837_v11  ;;  %v2846_v54 = vrot.slane %v2844_v16, 1 }
 0x3c0   : > { %v2847_v24 = vsel %vm994_vm2, %v2842_v20, %v2846_v54 }
 0x3c6   : > { %6729 = vmatmul.mubr.msk.bf16.vlgmr.msra.gmra.mrb[8].mxu1 %vm1563_vm12, %v2520_v36  ;;  %v3207_v36 = vld [vmem:[%s10592_s6 + $0xb0] sm:$0xff] }
 0x3c7   : > { %3048 = vmatpush1.bf16.msra.mxu1 %v8046_v33  ;;  %3079 = vmatprep.mubr.bf16.mxu1 %v2859_v39  ;;  %v2866_v33 = vor.u32 %v2865_v28, %v2861_v32  ;;  %v3208_v39 = vld [vmem:[%s10592_s6 + $0xb8] sm:$0xff] }
 0x3c8   : > { %3049 = vmatprep.subr.bf16.mxu1 %v8051_v34 }
 0x3c9   : > { %v2871_v34 = vsel %vm994_vm2, %v2866_v33, %v2870_v5 }
 0x3cb   : > { %3050 = vmatpush1.bf16.msra.mxu1 %v8049_v40  ;;  %v9572_v40 = vpack.c.bf16 %v3208_v39, %v3207_v36 }
 0x3cc   : > { %3051 = vmatprep.subr.bf16.mxu1 %v8054_v41  ;;  %v3191_v41 = vld [vmem:[%s10592_s6 + $0x30] sm:$0xff] }
 0x3cd   : > { %7496 = vmatprep.subr.bf16.mxu0 %v9572_v40 }
 0x3cf   : > { %3052 = vmatpush1.bf16.msra.mxu1 %v8052_v17  ;;  %v3192_v17 = vld [vmem:[%s10592_s6 + $0x38] sm:$0xff] }
 0x3d0   : > { %3053 = vmatprep.subr.bf16.mxu1 %v8057_v43  ;;  %v9580_v43 = vpack.c.bf16 %v3192_v17, %v3191_v41 }
 0x3d2   : > { %7498 = vmatpush3.bf16.msra.mxu0 %v9580_v43 }
 0x3d3   : > { %3054 = vmatpush1.bf16.msra.mxu1 %v8055_v44  ;;  %v3209_v44 = vld [vmem:[%s10592_s6 + $0xc0] sm:$0xff] }
 0x3d4   : > { %3055 = vmatprep.subr.bf16.mxu1 %v8060_v45  ;;  %v3210_v45 = vld [vmem:[%s10592_s6 + $0xc8] sm:$0xff] }
 0x3d7   : > { %3056 = vmatpush1.bf16.msra.mxu1 %v8058_v47  ;;  %v9590_v47 = vpack.c.bf16 %v3210_v45, %v3209_v44 }
 0x3d8   : > { %3057 = vmatprep.subr.bf16.mxu1 %v8063_v48  ;;  %v3193_v48 = vld [vmem:[%s10592_s6 + $0x40] sm:$0xff] }
 0x3d9   : > { %7500 = vmatprep.subr.bf16.mxu0 %v9590_v47 }
 0x3db   : > { %3058 = vmatpush1.bf16.msra.mxu1 %v8061_v50  ;;  %v3194_v50 = vld [vmem:[%s10592_s6 + $0x48] sm:$0xff] }
 0x3dc   : > { %3059 = vmatprep.subr.bf16.mxu1 %v8066_v51  ;;  %v9598_v51 = vpack.c.bf16 %v3194_v50, %v3193_v48 }
 0x3de   : > { %7502 = vmatpush3.bf16.msra.mxu0 %v9598_v51 }
 0x3df   : > { %3060 = vmatpush1.bf16.msra.mxu1 %v8064_v52  ;;  %v3211_v52 = vld [vmem:[%s10592_s6 + $0xd0] sm:$0xff] }
 0x3e0   : > { %3061 = vmatprep.subr.bf16.mxu1 %v8069_v53  ;;  %v3212_v53 = vld [vmem:[%s10592_s6 + $0xd8] sm:$0xff] }
 0x3e3   : > { %3062 = vmatpush1.bf16.msra.mxu1 %v8067_v55  ;;  %v9608_v55 = vpack.c.bf16 %v3212_v53, %v3211_v52 }
 0x3e4   : > { %3063 = vmatprep.subr.bf16.mxu1 %v8072_v56  ;;  %v3195_v56 = vld [vmem:[%s10592_s6 + $0x50] sm:$0xff] }
 0x3e5   : > { %7504 = vmatprep.subr.bf16.mxu0 %v9608_v55 }
 0x3e7   : > { %3064 = vmatpush1.bf16.msra.mxu1 %v8070_v57  ;;  %v3196_v57 = vld [vmem:[%s10592_s6 + $0x58] sm:$0xff] }
 0x3e8   : > { %3065 = vmatprep.subr.bf16.mxu1 %v8075_v59  ;;  %v9616_v59 = vpack.c.bf16 %v3196_v57, %v3195_v56 }
 0x3ea   : > { %7506 = vmatpush3.bf16.msra.mxu0 %v9616_v59 }
 0x3eb   : > { %3066 = vmatpush1.bf16.msra.mxu1 %v8073_v60  ;;  %v3213_v60 = vld [vmem:[%s10592_s6 + $0xe0] sm:$0xff] }
 0x3ec   : > { %3067 = vmatprep.subr.bf16.mxu1 %v8078_v13  ;;  %v3214_v13 = vld [vmem:[%s10592_s6 + $0xe8] sm:$0xff] }
 0x3ef   : > { %3068 = vmatpush1.bf16.msra.mxu1 %v8076_v49  ;;  %v9626_v49 = vpack.c.bf16 %v3214_v13, %v3213_v60 }
 0x3f0   : > { %3069 = vmatprep.subr.bf16.mxu1 %v8081_v38  ;;  %v3197_v38 = vld [vmem:[%s10592_s6 + $0x60] sm:$0xff] }
 0x3f1   : > { %7508 = vmatprep.subr.bf16.mxu0 %v9626_v49 }
 0x3f3   : > { %3070 = vmatpush1.bf16.msra.mxu1 %v8079_v46  ;;  %v3198_v46 = vld [vmem:[%s10592_s6 + $0x68] sm:$0xff] }
 0x3f4   : > { %3071 = vmatprep.subr.bf16.mxu1 %v8084_v61  ;;  %v9634_v61 = vpack.c.bf16 %v3198_v46, %v3197_v38 }
 0x3f6   : > { %7510 = vmatpush3.bf16.msra.mxu0 %v9634_v61 }
 0x3f7   : > { %3072 = vmatpush1.bf16.msra.mxu1 %v8082_v0  ;;  %v3215_v0 = vld [vmem:[%s10592_s6 + $0xf0] sm:$0xff] }
 0x3f8   : > { %3073 = vmatprep.subr.bf16.mxu1 %v8087_v1  ;;  %v3216_v1 = vld [vmem:[%s10592_s6 + $0xf8] sm:$0xff] }
 0x3f9   : > { %v9644_v2 = vpack.c.bf16 %v3216_v1, %v3215_v0 }
 0x3fb   : > { %3074 = vmatpush1.bf16.msra.mxu1 %v8085_v7  ;;  %v7513_v7 = vpack.c.bf16 %v3200_v4, %v3199_v3  ;;  %7512 = vmatprep.subr.bf16.mxu0 %v9644_v2 }
 0x3fc   : > { %3075 = vmatprep.subr.bf16.mxu1 %v8090_v8  ;;  %v3137_v8 = vld [vmem:[%s10591_s5] sm:$0x3] }
 0x3fd   : > { %7514 = vmatpush3.bf16.msra.mxu0 %v7513_v7  ;;  %v3146_v9 = vrot.slane %v3137_v8, %v9019_v19  ;;  %v3142_v10 = vrot.slane %v3137_v8, %v9014_v15 }
 0x3fe   : > { %7516 = vmatprep.subr.bf16.mxu0 %v9353_v25 }
 0x3ff   : > { %3076 = vmatpush1.bf16.msra.mxu1 %v8088_v12 }
 0x400   : > { %3077 = vmatprep.subr.bf16.mxu1 %v8093_v58 }
 0x403   : > { %3078 = vmatpush1.bf16.msra.mxu1 %v8091_v6 }
 0x404   : > { %3090 = vmatprep.subr.bf16.mxu1 %v8096_v18 }
 0x406   : > { %3080 = vmatmul.mubr.bf16.vlgmr.msra.gmra.mrb[8].mxu1 %v2847_v24 }
 0x407   : > { %3091 = vmatpush1.bf16.msra.mxu1 %v8094_v23  ;;  %3122 = vmatprep.mubr.bf16.mxu1 %v8445_v62 }
 0x412   : > { %6798 = vmatmul.mubr.msk.bf16.vlgmr.msra.gmra.mrb[8].mxu1 %vm1563_vm12, %v2871_v34 }
 0x413   : > { %4092 = vmatprep.mubr.bf16.mxu1 %v8445_v62 }
 0x4e5   : > { %v3124_v12 = vpop.f32.mrb[8].mxu1 }
 0x4e6   : > { %v3126_v58 = vpop.f32.mrb[9].mxu1  ;;  %v9661_v6 = vadd.f32 %v3142_v10, %v3124_v12 }
 0x4e7   : > { %v9659_v14 = vadd.f32 %v3146_v9, %v3126_v58  ;;  %v3128_v16 = vpop.f32.mrb[10].mxu1 }
 0x4e8   : > { %v9663_v11 = vadd.f32 %v3142_v10, %v3128_v16  ;;  %v3130_v18 = vpop.f32.mrb[11].mxu1  ;;  %v3167_v53 = vmul.f32 %v9661_v6, %v9661_v6 }
 0x4e9   : > { %v9665_v63 = vadd.f32 %v3146_v9, %v3130_v18  ;;  %v3168_v20 = vmul.f32 %v9659_v14, %v9659_v14 }
 0x4ea   : > { %v3153_v25 = vadd.f32 %v9663_v11, %v9661_v6  ;;  %v3169_v52 = vmul.f32 %v9663_v11, %v9663_v11 }
 0x4eb   : > { %v3160_v54 = vadd.f32 %v9665_v63, %v9659_v14  ;;  %v3170_v21 = vmul.f32 %v9665_v63, %v9665_v63 }
 0x4ec   : > { %v3154_v22 = vrot.slane %v3153_v25, 4  ;;  %v3171_v56 = vadd.f32 %v3169_v52, %v3167_v53  ;;  %v8103_v52 = vld [vmem:[%s10595_s9 + $0x140] ss:$8 sps:$4 sm:$0xff]   ;;  %v8108_v53 = vld [vmem:[%s10595_s9 + $0x154] ss:$8 sps:$4 sm:$0xff]  }
 0x4ed   : > { %v3161_v23 = vrot.slane %v3160_v54, 4  ;;  %v3178_v24 = vadd.f32 %v3170_v21, %v3168_v20 }
 0x4ee   : > { %v3155_v26 = vadd.f32 %v3154_v22, %v3153_v25  ;;  %v3172_v57 = vrot.slane %v3171_v56, 4 }
 0x4ef   : > { %v3162_v27 = vadd.f32 %v3161_v23, %v3160_v54  ;;  %v3179_v28 = vrot.slane %v3178_v24, 4 }
 0x4f0   : > { %v3156_v31 = vrot.slane %v3155_v26, 2 }
 0x4f1   : > { %v3163_v32 = vrot.slane %v3162_v27, 2  ;;  %v3180_v33 = vadd.f32 %v3179_v28, %v3178_v24 }
 0x4f2   : > { %v3157_v5 = vadd.f32 %v3156_v31, %v3155_v26 }
 0x4f3   : > { %v3164_v34 = vadd.f32 %v3163_v32, %v3162_v27  ;;  %v3181_v36 = vrot.slane %v3180_v33, 2 }
 0x4f4   : > { %v3158_v39 = vrot.slane %v3157_v5, 1 }
 0x4f5   : > { %v3165_v41 = vrot.slane %v3164_v34, 1  ;;  %v3182_v17 = vadd.f32 %v3181_v36, %v3180_v33 }
 0x4f6   : > { %v3159_v48 = vadd.f32 %v3158_v39, %v3157_v5  ;;  %v3564_v39 = vld [vmem:[%s10594_s8] sm:$0xff] }
 0x4f7   : > { %v3166_v44 = vadd.f32 %v3165_v41, %v3164_v34  ;;  %v3183_v45 = vrot.slane %v3182_v17, 1  ;;  %v6802_v41 = vld [vmem:[%s10594_s8 + $0x8] sm:$0xff] }
 0x4f9   : > { %3281 = vmatprep.mubr.f32.mxu0 %v3166_v44  ;;  %v3184_v50 = vadd.f32 %v3183_v45, %v3182_v17  ;;  %v8097_v17 = vld [vmem:[%s10595_s9 + $0x120] ss:$8 sps:$4 sm:$0xff]   ;;  %v8099_v44 = vld [vmem:[%s10595_s9 + $0x124] ss:$8 sps:$4 sm:$0xff]   ;;  %v8102_v45 = vld [vmem:[%s10595_s9 + $0x134] ss:$8 sps:$4 sm:$0xff]  }
 0x4fa   : > { %3282 = vmatmul.mubr.f32.vlgmr.msra.gmra.mrb[8].mxu0 %v3159_v48  ;;  %v8100_v48 = vld [vmem:[%s10595_s9 + $0x130] ss:$8 sps:$4 sm:$0xff]  }
 0x4fb   : > { %7518 = vmatpush3.bf16.msra.mxu0 %v9364_v29  ;;  %3351 = vmatprep.mubr.f32.mxu0 %v3184_v50  ;;  %v3173_v29 = vadd.f32 %v3172_v57, %v3171_v56  ;;  %v8105_v50 = vld [vmem:[%s10595_s9 + $0x144] ss:$8 sps:$4 sm:$0xff]   ;;  %v8106_v56 = vld [vmem:[%s10595_s9 + $0x150] ss:$8 sps:$4 sm:$0xff]  }
 0x4fc   : > { %7520 = vmatprep.subr.bf16.mxu0 %v9366_v30  ;;  %v8111_v57 = vld [vmem:[%s10595_s9 + $0x164] ss:$8 sps:$4 sm:$0xff]  }
 0x4fd   : > { %v3174_v30 = vrot.slane %v3173_v29, 2 }
 0x4ff   : > { %7522 = vmatpush3.bf16.msra.mxu0 %v9382_v35  ;;  %v3175_v35 = vadd.f32 %v3174_v30, %v3173_v29  ;;  %v8109_v29 = vld [vmem:[%s10595_s9 + $0x160] ss:$8 sps:$4 sm:$0xff]   ;;  %v8114_v30 = vld [vmem:[%s10595_s9 + $0x174] ss:$8 sps:$4 sm:$0xff]  }
 0x500   : > { %7524 = vmatprep.subr.bf16.mxu0 %v9388_v37 }
 0x501   : > { %v3176_v37 = vrot.slane %v3175_v35, 1 }
 0x503   : > { %7526 = vmatpush3.bf16.msra.mxu0 %v9400_v42  ;;  %v3177_v42 = vadd.f32 %v3176_v37, %v3175_v35  ;;  %v8112_v35 = vld [vmem:[%s10595_s9 + $0x170] ss:$8 sps:$4 sm:$0xff]   ;;  %v8117_v37 = vld [vmem:[%s10595_s9 + $0x184] ss:$8 sps:$4 sm:$0xff]  }
 0x504   : > { %7528 = vmatprep.subr.bf16.mxu0 %v9572_v40  ;;  %v9693_v40 = vld [vmem:[#allocation3] sm:$0xff] }
 0x505   : > { %3557 = vst.msk [vmem:[#allocation3 + $0x28] sm:$0x1] %vm3556_vm10, %v9693_v40  ;;  %3563 = vst.msk [vmem:[#allocation3 + $0x58] sm:$0x1] %vm3556_vm10, %v9693_v40 }
 0x507   : > { %7530 = vmatpush3.bf16.msra.mxu0 %v9580_v43  ;;  %v3364_v43 = vld [vmem:[%s10593_s7 + $0x8] sm:$0xff] }
 0x508   : > { %7532 = vmatprep.subr.bf16.mxu0 %v9590_v47  ;;  %v3366_v47 = vld [vmem:[%s10593_s7 + $0x18] sm:$0xff] }
 0x50b   : > { %7534 = vmatpush3.bf16.msra.mxu0 %v9598_v51  ;;  %v7547_v51 = vpack.c.bf16 %v3366_v47, %v3364_v43  ;;  %v8120_v43 = vld [vmem:[%s10595_s9 + $0x194] ss:$8 sps:$4 sm:$0xff]   ;;  %v8118_v47 = vld [vmem:[%s10595_s9 + $0x190] ss:$8 sps:$4 sm:$0xff]  }
 0x50c   : > { %7536 = vmatprep.subr.bf16.mxu0 %v9608_v55  ;;  %v3363_v55 = vld [vmem:[%s10593_s7] sm:$0xff] }
 0x50f   : > { %7538 = vmatpush3.bf16.msra.mxu0 %v9616_v59  ;;  %v3365_v59 = vld [vmem:[%s10593_s7 + $0x10] sm:$0xff] }
 0x510   : > { %7540 = vmatprep.subr.bf16.mxu0 %v9626_v49  ;;  %v7549_v60 = vpack.c.bf16 %v3365_v59, %v3363_v55  ;;  %v8121_v55 = vld [vmem:[%s10595_s9 + $0x1a0] ss:$8 sps:$4 sm:$0xff]   ;;  %v8126_v59 = vld [vmem:[%s10595_s9 + $0x1b4] ss:$8 sps:$4 sm:$0xff]  }
 0x513   : > { %7542 = vmatpush3.bf16.msra.mxu0 %v9634_v61 }
 0x514   : > { %7544 = vmatprep.subr.bf16.mxu0 %v9644_v2 }
 0x517   : > { %7546 = vmatpush3.bf16.msra.mxu0 %v7513_v7 }
 0x518   : > { %7548 = vmatprep.subr.bf16.mxu0 %v7547_v51 }
 0x51a   : > { %3352 = vmatmul.mubr.f32.vlgmr.msra.gmra.mrb[10].mxu0 %v3177_v42  ;;  %v8115_v42 = vld [vmem:[%s10595_s9 + $0x180] ss:$8 sps:$4 sm:$0xff]  }
 0x51b   : > { %3434 = vmatprep.mubr.f32.mxu0 %v9693_v40  ;;  %7550 = vmatpush1.bf16.msra.mxu0 %v7549_v60 }
 0x51c   : > { %7552 = vmatprep.subr.bf16.mxu0 %v7547_v51  ;;  %v8123_v51 = vld [vmem:[%s10595_s9 + $0x1a4] ss:$8 sps:$4 sm:$0xff]  }
 0x5cd   : > { %v7242_v13 = vpop.f32.mrb[8].mxu0 }
 0x5ce   : > { %v7243_v49 = vpop.f32.mrb[9].mxu0 }
 0x5cf   : > { %v7244_v38 = vadd.f32 %v7243_v49, %v7242_v13  ;;  %v8129_v13 = vld [vmem:[%s10595_s9 + $0x1c4] ss:$8 sps:$4 sm:$0xff]   ;;  %v8127_v49 = vld [vmem:[%s10595_s9 + $0x1c0] ss:$8 sps:$4 sm:$0xff]  }
 0x5d1   : > { %v3357_v46 = vmul.f32 0.00390625, %v7244_v38  ;;  %v8132_v38 = vld [vmem:[%s10595_s9 + $0x1d4] ss:$8 sps:$4 sm:$0xff]  }
 0x5d3   : > { %6799 = vmatmul.mubr.msk.f32.vlgmr.msra.gmra.mrb[12].mxu0 %vm1563_vm12, %v3357_v46  ;;  %v3359_v2 = vmul.f32 %v3357_v46, %v3357_v46  ;;  %v8130_v46 = vld [vmem:[%s10595_s9 + $0x1d0] ss:$8 sps:$4 sm:$0xff]  }
 0x5d4   : > { %7554 = vmatpush1.bf16.msra.mxu0 %v7549_v60  ;;  %3508 = vmatprep.mubr.f32.mxu0 %v9693_v40  ;;  %v8124_v60 = vld [vmem:[%s10595_s9 + $0x1b0] ss:$8 sps:$4 sm:$0xff]  }
 0x5ed   : > { %v7277_v61 = vpop.f32.mrb[10].mxu0 }
 0x5ee   : > { %v7278_v0 = vpop.f32.mrb[11].mxu0 }
 0x5ef   : > { %v7279_v1 = vadd.f32 %v7278_v0, %v7277_v61  ;;  %v8135_v61 = vld [vmem:[%s10595_s9 + $0x224] ss:$8 sps:$4 sm:$0xff]   ;;  %v8133_v0 = vld [vmem:[%s10595_s9 + $0x220] ss:$8 sps:$4 sm:$0xff]  }
 0x5f0   : > { %4060 = vmatprep.subr.bf16.mxu1 %v8135_v61  ;;  %v8184_v61 = vld [vmem:[%s10595_s9 + $0x280] ss:$8 sps:$4 sm:$0xff]  }
 0x5f1   : > { %v3358_v3 = vmul.f32 0.00390625, %v7279_v1  ;;  %v8136_v1 = vld [vmem:[%s10595_s9 + $0x1e0] ss:$8 sps:$4 sm:$0xff]   ;;  %4061 = vmatpush1.bf16.msra.mxu1 %v8133_v0  ;;  %v8189_v0 = vld [vmem:[%s10595_s9 + $0x74] ss:$8 sps:$4 sm:$0xff]  }
 0x5f3   : > { %v3360_v4 = vsub.f32 %v3358_v3, %v3359_v2  ;;  %v8138_v2 = vld [vmem:[%s10595_s9 + $0x1e4] ss:$8 sps:$4 sm:$0xff]   ;;  %v8141_v3 = vld [vmem:[%s10595_s9 + $0x234] ss:$8 sps:$4 sm:$0xff]  }
 0x5f4   : > { %4062 = vmatprep.subr.bf16.mxu1 %v8141_v3  ;;  %v8190_v3 = vld [vmem:[%s10595_s9 + $0x290] ss:$8 sps:$4 sm:$0xff]  }
 0x5f5   : > { %v3361_v7 = vadd.f32 1e-05, %v3360_v4  ;;  %v8139_v4 = vld [vmem:[%s10595_s9 + $0x230] ss:$8 sps:$4 sm:$0xff]  }
 0x5f6   : > { %4063 = vmatpush1.bf16.msra.mxu1 %v8139_v4  ;;  %v8195_v4 = vld [vmem:[%s10595_s9 + $0x84] ss:$8 sps:$4 sm:$0xff]  }
 0x5f7   : > { %8373 = vrsqrt.f32 %v3361_v7  ;;  %v8144_v7 = vld [vmem:[%s10595_s9 + $0x1f4] ss:$8 sps:$4 sm:$0xff]  }
 0x601   : > { %v8374_v8 = vpop.eup %8373 }
 0x602   : > { %6800 = vmatmul.mubr.msk.f32.vlgmr.msra.gmra.mrb[14].mxu0 %vm1563_vm12, %v8374_v8  ;;  %v8142_v8 = vld [vmem:[%s10595_s9 + $0x1f0] ss:$8 sps:$4 sm:$0xff]  }
 0x603   : > { %3632 = vmatprep.mubr.f32.mxu0 %v9693_v40 }
 0x6a6   : > { %v3436_v9 = vpop.f32.mrb[12].mxu0 }
 0x6a7   : > { %v3438_v10 = vpop.f32.mrb[13].mxu0  ;;  %v3518_v12 = vrot.slane %v3436_v9, %v9014_v15  ;;  %v8150_v9 = vld [vmem:[%s10595_s9 + $0x204] ss:$8 sps:$4 sm:$0xff]  }
 0x6a8   : > { %v3522_v58 = vrot.slane %v3438_v10, %v9014_v15  ;;  %v8148_v10 = vld [vmem:[%s10595_s9 + $0x200] ss:$8 sps:$4 sm:$0xff]  }
 0x6a9   : > { %v3523_v18 = vsub.f32 %v9661_v6, %v3518_v12  ;;  %v3525_v25 = vsub.f32 %v9663_v11, %v3518_v12 }
 0x6aa   : > { %v3524_v21 = vsub.f32 %v9659_v14, %v3522_v58  ;;  %v3526_v22 = vsub.f32 %v9665_v63, %v3522_v58 }
 0x6d5   : > { %v3510_v16 = vpop.f32.mrb[14].mxu0 }
 0x6d6   : > { %v3530_v20 = vrot.slane %v3510_v16, %v9014_v15  ;;  %v3512_v54 = vpop.f32.mrb[15].mxu0  ;;  %v8156_v16 = vld [vmem:[%s10595_s9 + $0x214] ss:$8 sps:$4 sm:$0xff]  }
 0x6d7   : > { %v3534_v23 = vrot.slane %v3512_v54, %v9014_v15 }
 0x6d8   : > { %v3535_v24 = vmul.f32 %v3530_v20, %v3523_v18  ;;  %v3537_v26 = vmul.f32 %v3530_v20, %v3525_v25  ;;  %v8154_v18 = vld [vmem:[%s10595_s9 + $0x210] ss:$8 sps:$4 sm:$0xff]  }
 0x6d9   : > { %v3536_v27 = vmul.f32 %v3534_v23, %v3524_v21  ;;  %v3538_v28 = vmul.f32 %v3534_v23, %v3526_v22  ;;  %v8162_v22 = vld [vmem:[%s10595_s9 + $0x244] ss:$8 sps:$4 sm:$0xff]  }
 0x6da   : > { %vm3539_vm2 = vcmp.ge.f32.partialorder %v3535_v24, 0.0  ;;  %vm3541_vm7 = vcmp.ge.f32.partialorder %v3537_v26, 0.0  ;;  %v3543_v31 = vmul.f32 0.2, %v3535_v24  ;;  %v3545_v32 = vmul.f32 0.2, %v3537_v26 }
 0x6db   : > { %vm3540_vm8 = vcmp.ge.f32.partialorder %v3536_v27, 0.0  ;;  %vm3542_vm9 = vcmp.ge.f32.partialorder %v3538_v28, 0.0  ;;  %v3544_v6 = vmul.f32 0.2, %v3536_v27  ;;  %v3546_v11 = vmul.f32 0.2, %v3538_v28 }
 0x6dc   : > { %v3547_v33 = vsel %vm3539_vm2, %v3535_v24, %v3543_v31  ;;  %v3549_v5 = vsel %vm3541_vm7, %v3537_v26, %v3545_v32  ;;  %vm5458_vm2 = vcmask 1047809   ;;  %vm5463_vm7 = vcmask 1040640  }
 0x6dd   : > { %v3548_v34 = vsel %vm3540_vm8, %v3536_v27, %v3544_v6  ;;  %v3550_v14 = vsel %vm3542_vm9, %v3538_v28, %v3546_v11  ;;  %v7557_v36 = vpack.c.bf16 %v3549_v5, %v3547_v33  ;;  %v8145_v28 = vld [vmem:[%s10595_s9] ss:$8 sps:$4 sm:$0xff]   ;;  %v8153_v11 = vld [vmem:[%s10595_s9 + $0x14] ss:$8 sps:$4 sm:$0xff]   ;;  %vm5461_vm8 = vcmask 261121  }
 0x6de   : > { %v7555_v63 = vpack.c.bf16 %v3550_v14, %v3548_v34  ;;  %v8151_v34 = vld [vmem:[%s10595_s9 + $0x10] ss:$8 sps:$4 sm:$0xff]   ;;  %v8159_v14 = vld [vmem:[%s10595_s9 + $0x24] ss:$8 sps:$4 sm:$0xff]  }
 0x6e0   : > { %7556 = vmatprep.subr.bf16.mxu0 %v7555_v63 }
 0x6e1   : > { %7558 = vmatpush1.bf16.msra.mxu0 %v7557_v36 }
 0x6e2   : > { %7560 = vmatprep.subr.bf16.mxu0 %v7555_v63 }
 0x6e4   : > { %6801 = vmatmul.mubr.msk.f32.vlgmr.msra.gmra.mrb[16].mxu0 %vm1563_vm12, %v3564_v39 }
 0x6e5   : > { %7562 = vmatpush1.bf16.msra.mxu0 %v7557_v36  ;;  %3708 = vmatprep.mubr.f32.mxu0 %v9693_v40  ;;  %v8147_v40 = vld [vmem:[%s10595_s9 + $0x4] ss:$8 sps:$4 sm:$0xff]  }
 0x6e6   : > { %4019 = vmatprep.subr.bf16.mxu0 %v8099_v44  ;;  %4284 = vmatprep.subr.bf16.mxu1 %v8147_v40  ;;  %v8196_v40 = vld [vmem:[%s10595_s9 + $0x2a0] ss:$8 sps:$4 sm:$0xff]  }
 0x6e8   : > { %6803 = vmatmul.mubr.msk.f32.vlgmr.msra.gmra.mrb[18].mxu0 %vm1563_vm12, %v6802_v41  ;;  %v8157_v41 = vld [vmem:[%s10595_s9 + $0x20] ss:$8 sps:$4 sm:$0xff]  }
 0x6e9   : > { %4020 = vmatpush1.bf16.msra.mxu0 %v8097_v17 }
 0x6ea   : > { %4021 = vmatprep.subr.bf16.mxu0 %v8102_v45  ;;  %v8160_v45 = vld [vmem:[%s10595_s9 + $0x240] ss:$8 sps:$4 sm:$0xff]  }
 0x6ed   : > { %4022 = vmatpush1.bf16.msra.mxu0 %v8100_v48 }
 0x6ee   : > { %4023 = vmatprep.subr.bf16.mxu0 %v8105_v50  ;;  %v8165_v50 = vld [vmem:[%s10595_s9 + $0x34] ss:$8 sps:$4 sm:$0xff]  }
 0x6f1   : > { %4024 = vmatpush1.bf16.msra.mxu0 %v8103_v52 }
 0x6f2   : > { %4025 = vmatprep.subr.bf16.mxu0 %v8108_v53  ;;  %v8168_v53 = vld [vmem:[%s10595_s9 + $0x254] ss:$8 sps:$4 sm:$0xff]  }
 0x6f5   : > { %4026 = vmatpush1.bf16.msra.mxu0 %v8106_v56 }
 0x6f6   : > { %4027 = vmatprep.subr.bf16.mxu0 %v8111_v57 }
 0x6f9   : > { %4028 = vmatpush1.bf16.msra.mxu0 %v8109_v29  ;;  %v8163_v29 = vld [vmem:[%s10595_s9 + $0x30] ss:$8 sps:$4 sm:$0xff]  }
 0x6fa   : > { %4029 = vmatprep.subr.bf16.mxu0 %v8114_v30 }
 0x6fd   : > { %4030 = vmatpush1.bf16.msra.mxu0 %v8112_v35  ;;  %v8166_v35 = vld [vmem:[%s10595_s9 + $0x250] ss:$8 sps:$4 sm:$0xff]  }
 0x6fe   : > { %4031 = vmatprep.subr.bf16.mxu0 %v8117_v37  ;;  %v8171_v37 = vld [vmem:[%s10595_s9 + $0x44] ss:$8 sps:$4 sm:$0xff]  }
 0x701   : > { %4032 = vmatpush1.bf16.msra.mxu0 %v8115_v42  ;;  %v8174_v42 = vld [vmem:[%s10595_s9 + $0x264] ss:$8 sps:$4 sm:$0xff]  }
 0x702   : > { %4033 = vmatprep.subr.bf16.mxu0 %v8120_v43 }
 0x705   : > { %4034 = vmatpush1.bf16.msra.mxu0 %v8118_v47  ;;  %v8169_v47 = vld [vmem:[%s10595_s9 + $0x40] ss:$8 sps:$4 sm:$0xff]  }
 0x706   : > { %4035 = vmatprep.subr.bf16.mxu0 %v8123_v51  ;;  %v8172_v51 = vld [vmem:[%s10595_s9 + $0x260] ss:$8 sps:$4 sm:$0xff]  }
 0x709   : > { %4036 = vmatpush1.bf16.msra.mxu0 %v8121_v55  ;;  %v8177_v55 = vld [vmem:[%s10595_s9 + $0x54] ss:$8 sps:$4 sm:$0xff]  }
 0x70a   : > { %4037 = vmatprep.subr.bf16.mxu0 %v8126_v59  ;;  %v8180_v59 = vld [vmem:[%s10595_s9 + $0x274] ss:$8 sps:$4 sm:$0xff]  }
 0x70d   : > { %4038 = vmatpush1.bf16.msra.mxu0 %v8124_v60  ;;  %v8175_v60 = vld [vmem:[%s10595_s9 + $0x50] ss:$8 sps:$4 sm:$0xff]  }
 0x70e   : > { %4039 = vmatprep.subr.bf16.mxu0 %v8129_v13  ;;  %v8178_v13 = vld [vmem:[%s10595_s9 + $0x270] ss:$8 sps:$4 sm:$0xff]  }
 0x711   : > { %4040 = vmatpush1.bf16.msra.mxu0 %v8127_v49  ;;  %v8183_v49 = vld [vmem:[%s10595_s9 + $0x64] ss:$8 sps:$4 sm:$0xff]  }
 0x712   : > { %4041 = vmatprep.subr.bf16.mxu0 %v8132_v38  ;;  %v8186_v38 = vld [vmem:[%s10595_s9 + $0x284] ss:$8 sps:$4 sm:$0xff]  }
 0x715   : > { %4042 = vmatpush1.bf16.msra.mxu0 %v8130_v46  ;;  %v8181_v46 = vld [vmem:[%s10595_s9 + $0x60] ss:$8 sps:$4 sm:$0xff]  }
 0x716   : > { %4043 = vmatprep.subr.bf16.mxu0 %v8138_v2  ;;  %v8187_v2 = vld [vmem:[%s10595_s9 + $0x70] ss:$8 sps:$4 sm:$0xff]  }
 0x719   : > { %4044 = vmatpush1.bf16.msra.mxu0 %v8136_v1  ;;  %v8192_v1 = vld [vmem:[%s10595_s9 + $0x294] ss:$8 sps:$4 sm:$0xff]  }
 0x71a   : > { %4045 = vmatprep.subr.bf16.mxu0 %v8144_v7  ;;  %v8198_v7 = vld [vmem:[%s10595_s9 + $0x2a4] ss:$8 sps:$4 sm:$0xff]  }
 0x71d   : > { %4046 = vmatpush1.bf16.msra.mxu0 %v8142_v8  ;;  %v8193_v8 = vld [vmem:[%s10595_s9 + $0x80] ss:$8 sps:$4 sm:$0xff]  }
 0x71e   : > { %4047 = vmatprep.subr.bf16.mxu0 %v8150_v9  ;;  %v8201_v9 = vld [vmem:[%s10595_s9 + $0x94] ss:$8 sps:$4 sm:$0xff]  }
 0x721   : > { %4048 = vmatpush1.bf16.msra.mxu0 %v8148_v10  ;;  %v8204_v10 = vld [vmem:[%s10595_s9 + $0x2b4] ss:$8 sps:$4 sm:$0xff]  }
 0x722   : > { %4049 = vmatprep.subr.bf16.mxu0 %v8156_v16  ;;  %v8207_v16 = vld [vmem:[%s10595_s9 + $0xa4] ss:$8 sps:$4 sm:$0xff]  }
 0x725   : > { %4050 = vmatpush1.bf16.msra.mxu0 %v8154_v18  ;;  %v8210_v18 = vld [vmem:[%s10595_s9 + $0x2c4] ss:$8 sps:$4 sm:$0xff]  }
 0x726   : > { %4618 = vmatprep.subr.bf16.mxu0 %v8162_v22  ;;  %v8211_v22 = vld [vmem:[%s10595_s9 + $0xb0] ss:$8 sps:$4 sm:$0xff]  }
 0x7b7   : > { %v3634_v12 = vpop.f32.mrb[16].mxu0 }
 0x7b8   : > { %v3636_v58 = vpop.f32.mrb[17].mxu0 }
 0x7b9   : > { %3719 = vrot.lane.b32.xlu0 %v3636_v58, %s8446_s23  ;;  %v8202_v58 = vld [vmem:[%s10595_s9 + $0x2b0] ss:$8 sps:$4 sm:$0xff]  }
 0x7bb   : > { %v3710_v25 = vpop.f32.mrb[18].mxu0 }
 0x7bc   : > { %v3732_v20 = vrot.slane %v3710_v25, 7  ;;  %v3712_v54 = vpop.f32.mrb[19].mxu0  ;;  %v8205_v25 = vld [vmem:[%s10595_s9 + $0xa0] ss:$8 sps:$4 sm:$0xff]  }
 0x7bd   : > { %v3733_v21 = vrot.slane %v3712_v54, 7  ;;  %v8213_v54 = vld [vmem:[%s10595_s9 + $0xb4] ss:$8 sps:$4 sm:$0xff]  }
 0x7be   : > { %3734 = vrot.lane.b32.xlu1 %v3732_v20, %s8446_s23  ;;  %v8208_v20 = vld [vmem:[%s10595_s9 + $0x2c0] ss:$8 sps:$4 sm:$0xff]  }
 0x7bf   : > { %3736 = vrot.lane.b32.xlu0 %v3733_v21, %s8446_s23  ;;  %v8216_v21 = vld [vmem:[%s10595_s9 + $0x2d4] ss:$8 sps:$4 sm:$0xff]  }
 0x7c2   : > { %3717 = vrot.lane.b32.xlu1 %v3634_v12, %s8446_s23  ;;  %v8199_v12 = vld [vmem:[%s10595_s9 + $0x90] ss:$8 sps:$4 sm:$0xff]   ;;  %s6264_s23 = scalar_lea.sflag [#allocation6], %s485_s18 }
 0x82b   : > { %v3720_v23 = vpop.permute.xlu0 %3719 }
 0x82c   : > { %3729 = vst.msk [vmem:[#allocation3 + $0x40] sm:$0xff] %vm1563_vm12, %v3720_v23 }
 0x830   : > { %v3735_v24 = vpop.permute.xlu1 %3734 }
 0x831   : > { %3743 = vst.msk [vmem:[#allocation3] sm:$0xfe] %vm3742_vm11, %v3735_v24  ;;  %v3737_v26 = vpop.permute.xlu0 %3736 }
 0x832   : > { %3748 = vst.msk [vmem:[#allocation3 + $0x18] sm:$0x1] %vm3747_vm14, %v3735_v24  ;;  %v3738_v27 = vsel %vm1563_vm12, %v3735_v24, %v3737_v26  ;;  %v8219_v24 = vld [vmem:[%s10595_s9 + $0xc4] ss:$8 sps:$4 sm:$0xff]  }
 0x833   : > { %3746 = vst.msk [vmem:[#allocation3 + $0x10] sm:$0xfe] %vm3745_vm15, %v3737_v26  ;;  %v3795_v31 = vld [vmem:[#allocation3 + $0x40] sm:$0xff]  ;;  %3744 = vst [vmem:[#allocation3 + $0x8] sm:$0xfe] %v3738_v27 }
 0x834   : > { %3750 = vst.msk [vmem:[#allocation3 + $0x28] sm:$0x1] %vm1570_vm13, %v3737_v26  ;;  %3749 = vst [vmem:[#allocation3 + $0x20] sm:$0x1] %v3738_v27  ;;  %v3718_v32 = vpop.permute.xlu1 %3717  ;;  %v3798_v6 = vpack.c.bf16 %v3795_v31, %v3795_v31  ;;  %v8222_v26 = vld [vmem:[%s10595_s9 + $0x2e4] ss:$8 sps:$4 sm:$0xff]  }
 0x835   : > { %v3721_v33 = vsel %vm1563_vm12, %v3718_v32, %v3720_v23  ;;  %3727 = vst.msk [vmem:[#allocation3 + $0x30] sm:$0xff] %vm3726_vm1, %v3718_v32  ;;  %v8214_v23 = vld [vmem:[%s10595_s9 + $0x2d0] ss:$8 sps:$4 sm:$0xff]   ;;  %v8217_v27 = vld [vmem:[%s10595_s9 + $0xc0] ss:$8 sps:$4 sm:$0xff]   ;;  %vm5440_vm12 = vcmask 523264  }
 0x836   : > { %3728 = vst [vmem:[#allocation3 + $0x38] sm:$0xff] %v3721_v33  ;;  %6876 = vmatmul.mubr.msk.bf16.vlgmr.msra.gmra.mrb[12].mxu1 %vm1583_vm3, %v3798_v6  ;;  %v3797_v5 = vpack.c.bf16 %v3721_v33, %v3721_v33  ;;  %v8225_v31 = vld [vmem:[%s10595_s9 + $0xd4] ss:$8 sps:$4 sm:$0xff]   ;;  %v8223_v6 = vld [vmem:[%s10595_s9 + $0xd0] ss:$8 sps:$4 sm:$0xff]   ;;  %vm5444_vm13 = vcmask 517120  }
 0x837   : > { %4285 = vmatpush1.bf16.msra.mxu1 %v8145_v28  ;;  %v8220_v28 = vld [vmem:[%s10595_s9 + $0x2e0] ss:$8 sps:$4 sm:$0xff]   ;;  %v8228_v32 = vld [vmem:[%s10595_s9 + $0x2f4] ss:$8 sps:$4 sm:$0xff]   ;;  %v8231_v33 = vld [vmem:[%s10595_s9 + $0xe4] ss:$8 sps:$4 sm:$0xff]  }
 0x838   : > { %4286 = vmatprep.subr.bf16.mxu1 %v8153_v11  ;;  %4051 = vmatprep.mubr.bf16.mxu0 %v3797_v5  ;;  %v8226_v11 = vld [vmem:[%s10595_s9 + $0x2f0] ss:$8 sps:$4 sm:$0xff]   ;;  %v8234_v5 = vld [vmem:[%s10595_s9 + $0x304] ss:$8 sps:$4 sm:$0xff]  }
 0x83a   : > { %v3752_v36 = vld [vmem:[#allocation3 + $0x8] sm:$0xff] }
 0x83b   : > { %v4367_v63 = vld [vmem:[#allocation3 + $0x8] sm:$0xfe]  ;;  %v4370_v39 = vld [vmem:[#allocation3 + $0x20] sm:$0x1]  ;;  %4287 = vmatpush1.bf16.msra.mxu1 %v8151_v34  ;;  %v3755_v17 = vpack.c.bf16 %v3752_v36, %v3752_v36  ;;  %v8229_v34 = vld [vmem:[%s10595_s9 + $0xe0] ss:$8 sps:$4 sm:$0xff]  }
 0x83c   : > { %v4373_v44 = vpack.c.bf16 %v4370_v39, %v4367_v63  ;;  %4288 = vmatprep.subr.bf16.mxu1 %v8159_v14  ;;  %v3793_v48 = vld [vmem:[#allocation3 + $0x30] sm:$0xff]  ;;  %v8237_v36 = vld [vmem:[%s10595_s9 + $0xf4] ss:$8 sps:$4 sm:$0xff]  }
 0x83d   : > { %v3796_v52 = vpack.c.bf16 %v3793_v48, %v3793_v48  ;;  %4316 = vmatprep.mubr.bf16.mxu1 %v3755_v17  ;;  %v8232_v14 = vld [vmem:[%s10595_s9 + $0x300] ss:$8 sps:$4 sm:$0xff]   ;;  %v8240_v63 = vld [vmem:[%s10595_s9 + $0x314] ss:$8 sps:$4 sm:$0xff]   ;;  %v8235_v17 = vld [vmem:[%s10595_s9 + $0xf0] ss:$8 sps:$4 sm:$0xff]  }
 0x83e   : > { %v4420_v56 = vshrl.u32 %v4373_v44, 16  ;;  %v4422_v57 = vshll.u32 %v4373_v44, 16  ;;  %v4366_v39 = vld [vmem:[#allocation3] sm:$0xfe] }
 0x83f   : > { %4289 = vmatpush1.bf16.msra.mxu1 %v8157_v41  ;;  %4052 = vmatmul.mubr.bf16.vlgmr.msra.gmra.mrb[20].mxu0 %v3796_v52  ;;  %v4369_v41 = vld [vmem:[#allocation3 + $0x18] sm:$0x1]  ;;  %v8238_v44 = vld [vmem:[%s10595_s9 + $0x310] ss:$8 sps:$4 sm:$0xff]  }
 0x840   : > { %v4424_v30 = vrot.slane %v4422_v57, 1  ;;  %4290 = vmatprep.subr.bf16.mxu1 %v8165_v50  ;;  %4619 = vmatpush1.bf16.msra.mxu0 %v8160_v45  ;;  %v8243_v45 = vld [vmem:[%s10595_s9 + $0x104] ss:$8 sps:$4 sm:$0xff]   ;;  %v3751_v48 = vld [vmem:[#allocation3] sm:$0xff]  ;;  %v4372_v52 = vpack.c.bf16 %v4369_v41, %v4366_v39  ;;  %v8244_v57 = vld [vmem:[%s10595_s9 + $0x320] ss:$8 sps:$4 sm:$0xff]  }
 0x841   : > { %4620 = vmatprep.subr.bf16.mxu0 %v8168_v53  ;;  %v8246_v50 = vld [vmem:[%s10595_s9 + $0x324] ss:$8 sps:$4 sm:$0xff]   ;;  %v8241_v53 = vld [vmem:[%s10595_s9 + $0x100] ss:$8 sps:$4 sm:$0xff]  }
 0x842   : > { %v4425_v43 = vor.u32 %v4424_v30, %v4420_v56  ;;  %v3754_v56 = vpack.c.bf16 %v3751_v48, %v3751_v48  ;;  %v8252_v30 = vld [vmem:[%s10595_s9 + $0x334] ss:$8 sps:$4 sm:$0xff]   ;;  %v8285_v39 = vld [vmem:[%s10595_s9 + $0x3c4] ss:$8 sps:$4 sm:$0xff]   ;;  %v8283_v41 = vld [vmem:[%s10595_s9 + $0x3c0] ss:$8 sps:$4 sm:$0xff]  }
 0x843   : > { %4291 = vmatpush1.bf16.msra.mxu1 %v8163_v29  ;;  %v8249_v29 = vld [vmem:[%s10595_s9 + $0x114] ss:$8 sps:$4 sm:$0xff]   ;;  %v8289_v48 = vld [vmem:[%s10595_s9 + $0x3e0] ss:$8 sps:$4 sm:$0xff]  }
 0x844   : > { %4650 = vmatprep.mubr.bf16.mxu0 %v4425_v43  ;;  %4292 = vmatprep.subr.bf16.mxu1 %v8171_v37  ;;  %v4368_v37 = vld [vmem:[#allocation3 + $0x10] sm:$0xfe]  ;;  %v4703_v43 = vld [vmem:[#allocation3 + $0x38] sm:$0xfe] }
 0x845   : > { %4621 = vmatpush1.bf16.msra.mxu0 %v8166_v35  ;;  %v4415_v35 = vshll.u32 %v4372_v52, 16 }
 0x846   : > { %4622 = vmatprep.subr.bf16.mxu0 %v8174_v42  ;;  %v4371_v42 = vld [vmem:[#allocation3 + $0x28] sm:$0x1] }
 0x847   : > { %4293 = vmatpush1.bf16.msra.mxu1 %v8169_v47  ;;  %v4706_v47 = vld [vmem:[#allocation3 + $0x50] sm:$0x1] }
 0x848   : > { %4294 = vmatprep.subr.bf16.mxu1 %v8177_v55  ;;  %v4704_v55 = vld [vmem:[#allocation3 + $0x40] sm:$0xfe] }
 0x849   : > { %4623 = vmatpush1.bf16.msra.mxu0 %v8172_v51  ;;  %v8247_v51 = vld [vmem:[%s10595_s9 + $0x110] ss:$8 sps:$4 sm:$0xff]  }
 0x84a   : > { %4624 = vmatprep.subr.bf16.mxu0 %v8180_v59  ;;  %v4707_v59 = vld [vmem:[#allocation3 + $0x58] sm:$0x1] }
 0x84b   : > { %4295 = vmatpush1.bf16.msra.mxu1 %v8175_v60  ;;  %v8250_v60 = vld [vmem:[%s10595_s9 + $0x330] ss:$8 sps:$4 sm:$0xff]  }
 0x84c   : > { %4296 = vmatprep.subr.bf16.mxu1 %v8183_v49  ;;  %v4374_v49 = vpack.c.bf16 %v4371_v42, %v4368_v37  ;;  %v8306_v37 = vld [vmem:[%s10595_s9 + $0x434] ss:$8 sps:$4 sm:$0xff]   ;;  %v4702_v42 = vld [vmem:[#allocation3 + $0x30] sm:$0xfe] }
 0x84d   : > { %4625 = vmatpush1.bf16.msra.mxu0 %v8178_v13  ;;  %v8255_v13 = vld [vmem:[%s10595_s9 + $0x344] ss:$8 sps:$4 sm:$0xff]  }
 0x84e   : > { %4626 = vmatprep.subr.bf16.mxu0 %v8186_v38  ;;  %v3753_v38 = vld [vmem:[#allocation3 + $0x10] sm:$0xff] }
 0x84f   : > { %4297 = vmatpush1.bf16.msra.mxu1 %v8181_v46  ;;  %v4413_v46 = vshrl.u32 %v4372_v52, 16  ;;  %v8292_v52 = vld [vmem:[%s10595_s9 + $0x3f0] ss:$8 sps:$4 sm:$0xff]  }
 0x850   : > { %4298 = vmatprep.subr.bf16.mxu1 %v8189_v0  ;;  %v8258_v0 = vld [vmem:[%s10595_s9 + $0x464] ss:$8 sps:$4 sm:$0xff]  }
 0x851   : > { %4627 = vmatpush1.bf16.msra.mxu0 %v8184_v61  ;;  %v4417_v61 = vrot.slane %v4415_v35, 1  ;;  %v8301_v35 = vld [vmem:[%s10595_s9 + $0x420] ss:$8 sps:$4 sm:$0xff]  }
 0x852   : > { %4628 = vmatprep.subr.bf16.mxu0 %v8192_v1  ;;  %v4709_v1 = vpack.c.bf16 %v4706_v47, %v4703_v43  ;;  %v4705_v43 = vld [vmem:[#allocation3 + $0x48] sm:$0x1] }
 0x853   : > { %4299 = vmatpush1.bf16.msra.mxu1 %v8187_v2  ;;  %v4710_v2 = vpack.c.bf16 %v4707_v59, %v4704_v55  ;;  %v8304_v47 = vld [vmem:[%s10595_s9 + $0x430] ss:$8 sps:$4 sm:$0xff]   ;;  %v4708_v55 = vpack.c.bf16 %v4705_v43, %v4702_v42  ;;  %v8307_v59 = vld [vmem:[%s10595_s9 + $0x440] ss:$8 sps:$4 sm:$0xff]  }
 0x854   : > { %4300 = vmatprep.subr.bf16.mxu1 %v8195_v4  ;;  %v3756_v4 = vpack.c.bf16 %v3753_v38, %v3753_v38  ;;  %v5091_v42 = vld [vmem:[%s10597_s11 + $0x68] sm:$0xff]  ;;  %v5108_v43 = vld [vmem:[%s10597_s11 + $0xf0] sm:$0xff] }
 0x855   : > { %4629 = vmatpush1.bf16.msra.mxu0 %v8190_v3  ;;  %v8253_v3 = vld [vmem:[%s10595_s9 + $0x340] ss:$8 sps:$4 sm:$0xff]  }
 0x856   : > { %4630 = vmatprep.subr.bf16.mxu0 %v8198_v7  ;;  %v8256_v7 = vld [vmem:[%s10595_s9 + $0x460] ss:$8 sps:$4 sm:$0xff]  }
 0x857   : > { %4301 = vmatpush1.bf16.msra.mxu1 %v8193_v8  ;;  %v8261_v8 = vld [vmem:[%s10595_s9 + $0x354] ss:$8 sps:$4 sm:$0xff]  }
 0x858   : > { %4302 = vmatprep.subr.bf16.mxu1 %v8201_v9  ;;  %v4418_v9 = vor.u32 %v4417_v61, %v4413_v46  ;;  %v4749_v46 = vshrl.u32 %v4708_v55, 16 }
 0x859   : > { %4631 = vmatpush1.bf16.msra.mxu0 %v8196_v40  ;;  %v4429_v40 = vshll.u32 %v4374_v49, 16 }
 0x85a   : > { %4632 = vmatprep.subr.bf16.mxu0 %v8204_v10  ;;  %v8264_v10 = vld [vmem:[%s10595_s9 + $0x474] ss:$8 sps:$4 sm:$0xff]  }
 0x85b   : > { %4303 = vmatpush1.bf16.msra.mxu1 %v8199_v12  ;;  %v4758_v12 = vshll.u32 %v4709_v1, 16 }
 0x85c   : > { %4304 = vmatprep.subr.bf16.mxu1 %v8207_v16  ;;  %v8259_v16 = vld [vmem:[%s10595_s9 + $0x350] ss:$8 sps:$4 sm:$0xff]  }
 0x85d   : > { %4633 = vmatpush1.bf16.msra.mxu0 %v8202_v58  ;;  %v4765_v58 = vshll.u32 %v4710_v2, 16 }
 0x85e   : > { %4634 = vmatprep.subr.bf16.mxu0 %v8210_v18  ;;  %v8262_v18 = vld [vmem:[%s10595_s9 + $0x470] ss:$8 sps:$4 sm:$0xff]  }
 0x85f   : > { %4305 = vmatpush1.bf16.msra.mxu1 %v8205_v25  ;;  %v4427_v25 = vshrl.u32 %v4374_v49, 16  ;;  %v8310_v49 = vld [vmem:[%s10595_s9 + $0x450] ss:$8 sps:$4 sm:$0xff]  }
 0x860   : > { %4306 = vmatprep.subr.bf16.mxu1 %v8213_v54  ;;  %v8267_v54 = vld [vmem:[%s10595_s9 + $0x364] ss:$8 sps:$4 sm:$0xff]  }
 0x861   : > { %4635 = vmatpush1.bf16.msra.mxu0 %v8208_v20  ;;  %v4431_v20 = vrot.slane %v4429_v40, 1 }
 0x862   : > { %4636 = vmatprep.subr.bf16.mxu0 %v8216_v21  ;;  %v4760_v21 = vrot.slane %v4758_v12, 1  ;;  %v5081_v12 = vld [vmem:[%s10597_s11 + $0x18] sm:$0xff] }
 0x863   : > { %4307 = vmatpush1.bf16.msra.mxu1 %v8211_v22  ;;  %v4767_v22 = vrot.slane %v4765_v58, 1  ;;  %v5098_v58 = vld [vmem:[%s10597_s11 + $0xa0] sm:$0xff] }
 0x864   : > { %4308 = vmatprep.subr.bf16.mxu1 %v8219_v24  ;;  %v4756_v24 = vshrl.u32 %v4709_v1, 16  ;;  %v5095_v1 = vld [vmem:[%s10597_s11 + $0x88] sm:$0xff] }
 0x865   : > { %4637 = vmatpush1.bf16.msra.mxu0 %v8214_v23  ;;  %v8265_v23 = vld [vmem:[%s10595_s9 + $0x360] ss:$8 sps:$4 sm:$0xff]  }
 0x866   : > { %4638 = vmatprep.subr.bf16.mxu0 %v8222_v26  ;;  %v4432_v26 = vor.u32 %v4431_v20, %v4427_v25  ;;  %v5082_v20 = vld [vmem:[%s10597_s11 + $0x20] sm:$0xff] }
 0x867   : > { %4309 = vmatpush1.bf16.msra.mxu1 %v8217_v27  ;;  %v4763_v27 = vshrl.u32 %v4710_v2, 16  ;;  %v5078_v2 = vld [vmem:[%s10597_s11] sm:$0xff] }
 0x868   : > { %4310 = vmatprep.subr.bf16.mxu1 %v8225_v31  ;;  %v4761_v31 = vor.u32 %v4760_v21, %v4756_v24 }
 0x869   : > { %4639 = vmatpush1.bf16.msra.mxu0 %v8220_v28  ;;  %v8270_v28 = vld [vmem:[%s10595_s9 + $0x374] ss:$8 sps:$4 sm:$0xff]  }
 0x86a   : > { %4640 = vmatprep.subr.bf16.mxu0 %v8228_v32  ;;  %v4768_v32 = vor.u32 %v4767_v22, %v4763_v27 }
 0x86b   : > { %4311 = vmatpush1.bf16.msra.mxu1 %v8223_v6  ;;  %v8273_v6 = vld [vmem:[%s10595_s9 + $0x384] ss:$8 sps:$4 sm:$0xff]  }
 0x86c   : > { %4312 = vmatprep.subr.bf16.mxu1 %v8231_v33  ;;  %v8276_v33 = vld [vmem:[%s10595_s9 + $0x394] ss:$8 sps:$4 sm:$0xff]  }
 0x86d   : > { %4641 = vmatpush1.bf16.msra.mxu0 %v8226_v11  ;;  %v8271_v11 = vld [vmem:[%s10595_s9 + $0x380] ss:$8 sps:$4 sm:$0xff]  }
 0x86e   : > { %4642 = vmatprep.subr.bf16.mxu0 %v8234_v5  ;;  %v8274_v5 = vld [vmem:[%s10595_s9 + $0x390] ss:$8 sps:$4 sm:$0xff]  }
 0x86f   : > { %4313 = vmatpush1.bf16.msra.mxu1 %v8229_v34  ;;  %v8279_v34 = vld [vmem:[%s10595_s9 + $0x3a4] ss:$8 sps:$4 sm:$0xff]  }
 0x870   : > { %4314 = vmatprep.subr.bf16.mxu1 %v8237_v36  ;;  %v8282_v36 = vld [vmem:[%s10595_s9 + $0x3b4] ss:$8 sps:$4 sm:$0xff]  }
 0x871   : > { %4643 = vmatpush1.bf16.msra.mxu0 %v8232_v14  ;;  %v8277_v14 = vld [vmem:[%s10595_s9 + $0x3a0] ss:$8 sps:$4 sm:$0xff]  }
 0x872   : > { %4644 = vmatprep.subr.bf16.mxu0 %v8240_v63  ;;  %v8280_v63 = vld [vmem:[%s10595_s9 + $0x3b0] ss:$8 sps:$4 sm:$0xff]  }
 0x873   : > { %4315 = vmatpush1.bf16.msra.mxu1 %v8235_v17  ;;  %v8288_v17 = vld [vmem:[%s10595_s9 + $0x3d4] ss:$8 sps:$4 sm:$0xff]  }
 0x874   : > { %4325 = vmatprep.subr.bf16.mxu1 %v8243_v45  ;;  %v8291_v45 = vld [vmem:[%s10595_s9 + $0x3e4] ss:$8 sps:$4 sm:$0xff]  }
 0x875   : > { %4645 = vmatpush1.bf16.msra.mxu0 %v8238_v44  ;;  %v8286_v44 = vld [vmem:[%s10595_s9 + $0x3d0] ss:$8 sps:$4 sm:$0xff]  }
 0x876   : > { %4646 = vmatprep.subr.bf16.mxu0 %v8246_v50  ;;  %4317 = vmatmul.mubr.bf16.vlgmr.msra.gmra.mrb[16].mxu1 %v3754_v56  ;;  %v8294_v50 = vld [vmem:[%s10595_s9 + $0x3f4] ss:$8 sps:$4 sm:$0xff]   ;;  %v8295_v56 = vld [vmem:[%s10595_s9 + $0x400] ss:$8 sps:$4 sm:$0xff]  }
 0x877   : > { %4326 = vmatpush1.bf16.msra.mxu1 %v8241_v53  ;;  %4357 = vmatprep.mubr.bf16.mxu1 %v8445_v62  ;;  %v8297_v53 = vld [vmem:[%s10595_s9 + $0x404] ss:$8 sps:$4 sm:$0xff]  }
 0x878   : > { %4327 = vmatprep.subr.bf16.mxu1 %v8249_v29  ;;  %v8298_v29 = vld [vmem:[%s10595_s9 + $0x410] ss:$8 sps:$4 sm:$0xff]  }
 0x879   : > { %4647 = vmatpush1.bf16.msra.mxu0 %v8244_v57  ;;  %v8300_v57 = vld [vmem:[%s10595_s9 + $0x414] ss:$8 sps:$4 sm:$0xff]  }
 0x87a   : > { %4648 = vmatprep.subr.bf16.mxu0 %v8252_v30  ;;  %v8303_v30 = vld [vmem:[%s10595_s9 + $0x424] ss:$8 sps:$4 sm:$0xff]  }
 0x87b   : > { %4328 = vmatpush1.bf16.msra.mxu1 %v8247_v51  ;;  %v8309_v51 = vld [vmem:[%s10595_s9 + $0x444] ss:$8 sps:$4 sm:$0xff]  }
 0x87c   : > { %4659 = vmatprep.subr.bf16.mxu1 %v8255_v13  ;;  %v4751_v13 = vshll.u32 %v4708_v55, 16 }
 0x87d   : > { %4649 = vmatpush1.bf16.msra.mxu0 %v8250_v60  ;;  %v8312_v60 = vld [vmem:[%s10595_s9 + $0x454] ss:$8 sps:$4 sm:$0xff]  }
 0x87e   : > { %4995 = vmatprep.subr.bf16.mxu0 %v8258_v0  ;;  %6913 = vmatmul.mubr.msk.bf16.vlgmr.msra.gmra.mrb[20].mxu1 %vm1583_vm3, %v3756_v4  ;;  %v4753_v38 = vrot.slane %v4751_v13, 1  ;;  %v5094_v0 = vld [vmem:[%s10597_s11 + $0x80] sm:$0xff]  ;;  %v5079_v4 = vld [vmem:[%s10597_s11 + $0x8] sm:$0xff] }
 0x87f   : > { %4660 = vmatpush1.bf16.msra.mxu1 %v8253_v3  ;;  %4691 = vmatprep.mubr.bf16.mxu1 %v8445_v62  ;;  %v7563_v3 = vpack.c.bf16 %v5095_v1, %v5094_v0  ;;  %v7565_v40 = vpack.c.bf16 %v5079_v4, %v5078_v2 }
 0x880   : > { %4651 = vmatmul.mubr.bf16.vlgmr.msra.gmra.mrb[24].mxu0 %v4418_v9  ;;  %4661 = vmatprep.subr.bf16.mxu1 %v8261_v8  ;;  %v4754_v61 = vor.u32 %v4753_v38, %v4749_v46  ;;  %v5097_v8 = vld [vmem:[%s10597_s11 + $0x98] sm:$0xff]  ;;  %v5257_v38 = vld [vmem:[%s10598_s12 + $0x8] sm:$0xff] }
 0x881   : > { %4996 = vmatpush1.bf16.msra.mxu0 %v8256_v7  ;;  %5027 = vmatprep.mubr.bf16.mxu0 %v8445_v62  ;;  %v8268_v62 = vld [vmem:[%s10595_s9 + $0x370] ss:$8 sps:$4 sm:$0xff]  }
 0x882   : > { %4997 = vmatprep.subr.bf16.mxu0 %v8264_v10  ;;  %v5096_v7 = vld [vmem:[%s10597_s11 + $0x90] sm:$0xff]  ;;  %v5259_v46 = vld [vmem:[%s10598_s12 + $0x18] sm:$0xff] }
 0x883   : > { %4662 = vmatpush1.bf16.msra.mxu1 %v8259_v16  ;;  %v7567_v9 = vpack.c.bf16 %v5097_v8, %v5096_v7  ;;  %v5080_v10 = vld [vmem:[%s10597_s11 + $0x10] sm:$0xff]  ;;  %v5099_v16 = vld [vmem:[%s10597_s11 + $0xa8] sm:$0xff] }
 0x884   : > { %4954 = vmatprep.subr.bf16.mxu1 %v8267_v54  ;;  %v7571_v25 = vpack.c.bf16 %v5099_v16, %v5098_v58  ;;  %v5083_v54 = vld [vmem:[%s10597_s11 + $0x28] sm:$0xff] }
 0x885   : > { %4998 = vmatpush1.bf16.msra.mxu0 %v8262_v18  ;;  %v7569_v18 = vpack.c.bf16 %v5081_v12, %v5080_v10  ;;  %v7573_v21 = vpack.c.bf16 %v5083_v54, %v5082_v20 }
 0x886   : > { %6986 = vmatmul.mubr.msk.bf16.vlgmr.msra.gmra.mrb[24].mxu1 %vm1583_vm3, %v4432_v26  ;;  %7564 = vmatprep.subr.bf16.mxu0 %v7563_v3 }
 0x887   : > { %4955 = vmatpush1.bf16.msra.mxu1 %v8265_v23  ;;  %4986 = vmatprep.mubr.bf16.mxu1 %v4761_v31 }
 0x888   : > { %7059 = vmatmul.mubr.msk.bf16.vlgmr.msra.gmra.mrb[28].mxu0 %vm1583_vm3, %v4768_v32  ;;  %4956 = vmatprep.subr.bf16.mxu1 %v8270_v28 }
 0x889   : > { %7566 = vmatpush3.bf16.msra.mxu0 %v7565_v40 }
 0x88a   : > { %7568 = vmatprep.subr.bf16.mxu0 %v7567_v9 }
 0x88b   : > { %4957 = vmatpush1.bf16.msra.mxu1 %v8268_v62 }
 0x88c   : > { %4958 = vmatprep.subr.bf16.mxu1 %v8273_v6 }
 0x88d   : > { %7570 = vmatpush3.bf16.msra.mxu0 %v7569_v18 }
 0x88e   : > { %7572 = vmatprep.subr.bf16.mxu0 %v7571_v25 }
 0x88f   : > { %4959 = vmatpush1.bf16.msra.mxu1 %v8271_v11  ;;  %v5100_v11 = vld [vmem:[%s10597_s11 + $0xb0] sm:$0xff] }
 0x890   : > { %4960 = vmatprep.subr.bf16.mxu1 %v8276_v33  ;;  %v5101_v33 = vld [vmem:[%s10597_s11 + $0xb8] sm:$0xff] }
 0x891   : > { %7574 = vmatpush3.bf16.msra.mxu0 %v7573_v21 }
 0x893   : > { %4961 = vmatpush1.bf16.msra.mxu1 %v8274_v5  ;;  %v7575_v5 = vpack.c.bf16 %v5101_v33, %v5100_v11  ;;  %v5038_v11 = vld [vmem:[%s10596_s10] sm:$0x3] }
 0x894   : > { %4962 = vmatprep.subr.bf16.mxu1 %v8279_v34  ;;  %v5084_v34 = vld [vmem:[%s10597_s11 + $0x30] sm:$0xff] }
 0x895   : > { %7576 = vmatprep.subr.bf16.mxu0 %v7575_v5 }
 0x897   : > { %4963 = vmatpush1.bf16.msra.mxu1 %v8277_v14  ;;  %v5085_v14 = vld [vmem:[%s10597_s11 + $0x38] sm:$0xff] }
 0x898   : > { %4964 = vmatprep.subr.bf16.mxu1 %v8282_v36  ;;  %v7577_v36 = vpack.c.bf16 %v5085_v14, %v5084_v34  ;;  %v5043_v34 = vrot.slane %v5038_v11, %v9014_v15 }
 0x89a   : > { %7578 = vmatpush3.bf16.msra.mxu0 %v7577_v36 }
 0x89b   : > { %4965 = vmatpush1.bf16.msra.mxu1 %v8280_v63  ;;  %v5102_v63 = vld [vmem:[%s10597_s11 + $0xc0] sm:$0xff] }
 0x89c   : > { %4966 = vmatprep.subr.bf16.mxu1 %v8285_v39  ;;  %v5103_v39 = vld [vmem:[%s10597_s11 + $0xc8] sm:$0xff] }
 0x89f   : > { %4967 = vmatpush1.bf16.msra.mxu1 %v8283_v41  ;;  %v7579_v41 = vpack.c.bf16 %v5103_v39, %v5102_v63  ;;  %v5047_v63 = vrot.slane %v5038_v11, %v9019_v19  ;;  %v8315_v11 = vld [vmem:[%s10599_s13 + $0xe8] sm:$0xff]  }
 0x8a0   : > { %4968 = vmatprep.subr.bf16.mxu1 %v8288_v17  ;;  %v5086_v17 = vld [vmem:[%s10597_s11 + $0x40] sm:$0xff] }
 0x8a1   : > { %7580 = vmatprep.subr.bf16.mxu0 %v7579_v41 }
 0x8a3   : > { %4969 = vmatpush1.bf16.msra.mxu1 %v8286_v44  ;;  %v5087_v44 = vld [vmem:[%s10597_s11 + $0x48] sm:$0xff] }
 0x8a4   : > { %4970 = vmatprep.subr.bf16.mxu1 %v8291_v45  ;;  %v7581_v45 = vpack.c.bf16 %v5087_v44, %v5086_v17 }
 0x8a6   : > { %7582 = vmatpush3.bf16.msra.mxu0 %v7581_v45 }
 0x8a7   : > { %4971 = vmatpush1.bf16.msra.mxu1 %v8289_v48  ;;  %v5104_v48 = vld [vmem:[%s10597_s11 + $0xd0] sm:$0xff] }
 0x8a8   : > { %4972 = vmatprep.subr.bf16.mxu1 %v8294_v50  ;;  %v5105_v50 = vld [vmem:[%s10597_s11 + $0xd8] sm:$0xff] }
 0x8ab   : > { %4973 = vmatpush1.bf16.msra.mxu1 %v8292_v52  ;;  %v5088_v52 = vld [vmem:[%s10597_s11 + $0x50] sm:$0xff] }
 0x8ac   : > { %4974 = vmatprep.subr.bf16.mxu1 %v8297_v53  ;;  %v7583_v53 = vpack.c.bf16 %v5105_v50, %v5104_v48 }
 0x8ae   : > { %7584 = vmatprep.subr.bf16.mxu0 %v7583_v53 }
 0x8af   : > { %4975 = vmatpush1.bf16.msra.mxu1 %v8295_v56  ;;  %v5089_v56 = vld [vmem:[%s10597_s11 + $0x58] sm:$0xff] }
 0x8b0   : > { %4976 = vmatprep.subr.bf16.mxu1 %v8300_v57  ;;  %v5106_v57 = vld [vmem:[%s10597_s11 + $0xe0] sm:$0xff] }
 0x8b3   : > { %4977 = vmatpush1.bf16.msra.mxu1 %v8298_v29  ;;  %v5107_v29 = vld [vmem:[%s10597_s11 + $0xe8] sm:$0xff] }
 0x8b4   : > { %4978 = vmatprep.subr.bf16.mxu1 %v8303_v30  ;;  %v7585_v30 = vpack.c.bf16 %v5089_v56, %v5088_v52 }
 0x8b6   : > { %7586 = vmatpush3.bf16.msra.mxu0 %v7585_v30 }
 0x8b7   : > { %4979 = vmatpush1.bf16.msra.mxu1 %v8301_v35  ;;  %v7587_v35 = vpack.c.bf16 %v5107_v29, %v5106_v57 }
 0x8b8   : > { %4980 = vmatprep.subr.bf16.mxu1 %v8306_v37  ;;  %v5090_v37 = vld [vmem:[%s10597_s11 + $0x60] sm:$0xff] }
 0x8b9   : > { %7588 = vmatprep.subr.bf16.mxu0 %v7587_v35 }
 0x8bb   : > { %4981 = vmatpush1.bf16.msra.mxu1 %v8304_v47  ;;  %v5109_v47 = vld [vmem:[%s10597_s11 + $0xf8] sm:$0xff] }
 0x8bc   : > { %4982 = vmatprep.subr.bf16.mxu1 %v8309_v51  ;;  %v7589_v51 = vpack.c.bf16 %v5091_v42, %v5090_v37  ;;  %v7591_v55 = vpack.c.bf16 %v5109_v47, %v5108_v43 }
 0x8be   : > { %7590 = vmatpush3.bf16.msra.mxu0 %v7589_v51 }
 0x8bf   : > { %4983 = vmatpush1.bf16.msra.mxu1 %v8307_v59  ;;  %v5092_v59 = vld [vmem:[%s10597_s11 + $0x70] sm:$0xff]  ;;  %7592 = vmatprep.subr.bf16.mxu0 %v7591_v55 }
 0x8c0   : > { %4984 = vmatprep.subr.bf16.mxu1 %v8312_v60  ;;  %v5093_v60 = vld [vmem:[%s10597_s11 + $0x78] sm:$0xff] }
 0x8c1   : > { %v7593_v13 = vpack.c.bf16 %v5093_v60, %v5092_v59 }
 0x8c3   : > { %4985 = vmatpush1.bf16.msra.mxu1 %v8310_v49  ;;  %7594 = vmatpush3.bf16.msra.mxu0 %v7593_v13  ;;  %v10272_v49 = vld [vmem:[#allocation4] sm:$0xff] }
 0x8c4   : > { %7596 = vmatprep.subr.bf16.mxu1 %v7563_v3  ;;  %5441 = vst.msk [vmem:[#allocation4 + $0x10] sm:$0xff] %vm5440_vm12, %v10272_v49 }
 0x8c5   : > { %5445 = vst.msk [vmem:[#allocation4 + $0x28] sm:$0x3] %vm5444_vm13, %v10272_v49 }
 0x8c6   : > { %4987 = vmatmul.mubr.bf16.vlgmr.msra.gmra.mrb[28].mxu1 %v4754_v61  ;;  %v10281_v61 = vpack.c.bf16 %v5259_v46, %v5257_v38  ;;  %v5256_v38 = vld [vmem:[%s10598_s12] sm:$0xff]  ;;  %v5258_v46 = vld [vmem:[%s10598_s12 + $0x10] sm:$0xff] }
 0x8c7   : > { %7598 = vmatpush3.bf16.msra.mxu1 %v7565_v40 }
 0x8c8   : > { %7600 = vmatprep.subr.bf16.mxu1 %v7567_v9  ;;  %7628 = vmatprep.subr.bf16.mxu0 %v10281_v61 }
 0x8cb   : > { %7602 = vmatpush3.bf16.msra.mxu1 %v7569_v18 }
 0x8cc   : > { %7604 = vmatprep.subr.bf16.mxu1 %v7571_v25 }
 0x8cf   : > { %7606 = vmatpush3.bf16.msra.mxu1 %v7573_v21 }
 0x8d0   : > { %7608 = vmatprep.subr.bf16.mxu1 %v7575_v5 }
 0x8d3   : > { %7610 = vmatpush3.bf16.msra.mxu1 %v7577_v36 }
 0x8d4   : > { %7612 = vmatprep.subr.bf16.mxu1 %v7579_v41 }
 0x8d7   : > { %7614 = vmatpush3.bf16.msra.mxu1 %v7581_v45 }
 0x8d8   : > { %7616 = vmatprep.subr.bf16.mxu1 %v7583_v53 }
 0x8db   : > { %7618 = vmatpush3.bf16.msra.mxu1 %v7585_v30 }
 0x8dc   : > { %7620 = vmatprep.subr.bf16.mxu1 %v7587_v35 }
 0x8df   : > { %7622 = vmatpush3.bf16.msra.mxu1 %v7589_v51 }
 0x8e0   : > { %7624 = vmatprep.subr.bf16.mxu1 %v7591_v55 }
 0x8e3   : > { %7626 = vmatpush3.bf16.msra.mxu1 %v7593_v13 }
 0x8e4   : > { %7431 = vmatprep.subr.bf16.mxu1 %v10272_v49 }
 0x909   : > { %v4094_v22 = vpop.f32.mrb[12].mxu1 }
 0x90a   : > { %v4096_v23 = vpop.f32.mrb[13].mxu1 }
 0x90b   : > { %v4098_v24 = vpop.f32.mrb[14].mxu1 }
 0x90c   : > { %v4099_v26 = vpop.f32.mrb[15].mxu1 }
 0x912   : > { %v4053_v27 = vpop.f32.mrb[20].mxu0 }
 0x913   : > { %v4095_v28 = vadd.f32 %v4094_v22, %v4053_v27  ;;  %v4055_v31 = vpop.f32.mrb[21].mxu0 }
 0x914   : > { %v4097_v32 = vadd.f32 %v4096_v23, %v4055_v31  ;;  %v4057_v62 = vpop.f32.mrb[22].mxu0 }
 0x915   : > { %v4058_v6 = vpop.f32.mrb[23].mxu0 }
 0x949   : > { %v4318_v0 = vpop.f32.mrb[16].mxu1 }
 0x94a   : > { %v4319_v1 = vadd.f32 %v4318_v0, %v4095_v28  ;;  %v4320_v2 = vpop.f32.mrb[17].mxu1 }
 0x94b   : > { %v4321_v3 = vadd.f32 %v4320_v2, %v4097_v32  ;;  %v4322_v4 = vpop.f32.mrb[18].mxu1 }
 0x94c   : > { %v4323_v7 = vpop.f32.mrb[19].mxu1 }
 0x94d   : > { %v7629_v7 = vpack.c.bf16 %v5258_v46, %v5256_v38 }
 0x951   : > { %v4359_v8 = vpop.f32.mrb[20].mxu1 }
 0x952   : > { %v4360_v40 = vadd.f32 %v4359_v8, %v4319_v1  ;;  %v4361_v9 = vpop.f32.mrb[21].mxu1 }
 0x953   : > { %v4652_v10 = vpop.f32.mrb[24].mxu0  ;;  %v4362_v12 = vadd.f32 %v4361_v9, %v4321_v3  ;;  %v4363_v58 = vpop.f32.mrb[22].mxu1 }
 0x954   : > { %v4654_v16 = vpop.f32.mrb[25].mxu0  ;;  %v4364_v18 = vpop.f32.mrb[23].mxu1 }
 0x955   : > { %v4656_v25 = vpop.f32.mrb[26].mxu0  ;;  %v5262_v18 = vld [vmem:[%s10598_s12 + $0x30] sm:$0xff] }
 0x956   : > { %v4657_v20 = vpop.f32.mrb[27].mxu0 }
 0x959   : > { %v4693_v54 = vpop.f32.mrb[24].mxu1 }
 0x95a   : > { %v4694_v21 = vadd.f32 %v4693_v54, %v4652_v10  ;;  %v4695_v22 = vpop.f32.mrb[25].mxu1  ;;  %v5261_v10 = vld [vmem:[%s10598_s12 + $0x28] sm:$0xff] }
 0x95b   : > { %v4696_v23 = vadd.f32 %v4695_v22, %v4654_v16  ;;  %v4697_v24 = vpop.f32.mrb[26].mxu1  ;;  %v5029_v26 = vpop.f32.mrb[28].mxu0  ;;  %v5260_v16 = vld [vmem:[%s10598_s12 + $0x20] sm:$0xff] }
 0x95c   : > { %v4700_v27 = vadd.f32 %v4694_v21, %v4360_v40  ;;  %v4698_v28 = vpop.f32.mrb[27].mxu1  ;;  %v5031_v31 = vpop.f32.mrb[29].mxu0  ;;  %v7633_v25 = vpack.c.bf16 %v5262_v18, %v5260_v16 }
 0x95d   : > { %v4701_v32 = vadd.f32 %v4696_v23, %v4362_v12  ;;  %v5033_v62 = vpop.f32.mrb[30].mxu0  ;;  %v5263_v12 = vld [vmem:[%s10598_s12 + $0x38] sm:$0xff] }
 0x95e   : > { %v5034_v6 = vpop.f32.mrb[31].mxu0  ;;  %v7631_v58 = vpack.c.bf16 %v5263_v12, %v5261_v10  ;;  %v8313_v62 = vld [vmem:[%s10599_s13 + $0xe0] sm:$0xff]  }
 0x95f   : > { %v8314_v6 = vld [vmem:[%s10599_s13 + $0xa0] sm:$0xff]  }
 0x999   : > { %v4988_v33 = vpop.f32.mrb[28].mxu1 }
 0x99a   : > { %v5030_v5 = vadd.f32 %v5029_v26, %v4988_v33  ;;  %v4990_v14 = vpop.f32.mrb[29].mxu1  ;;  %v8316_v33 = vld [vmem:[%s10599_s13 + $0xa8] sm:$0xff]  }
 0x99b   : > { %v5032_v36 = vadd.f32 %v5031_v31, %v4990_v14  ;;  %v4992_v39 = vpop.f32.mrb[30].mxu1  ;;  %v8319_v14 = vld [vmem:[%s10599_s13 + $0xf8] sm:$0xff]  }
 0x99c   : > { %v5036_v41 = vadd.f32 %v5030_v5, %v4700_v27  ;;  %v4993_v17 = vpop.f32.mrb[31].mxu1  ;;  %v8317_v5 = vld [vmem:[%s10599_s13 + $0xf0] sm:$0xff]  }
 0x99d   : > { %v5037_v44 = vadd.f32 %v5032_v36, %v4701_v32  ;;  %v8320_v36 = vld [vmem:[%s10599_s13 + $0xb8] sm:$0xff]   ;;  %v8321_v17 = vld [vmem:[%s10599_s13 + $0x120] sm:$0xff]  }
 0x99e   : > { %v10289_v45 = vadd.f32 %v5043_v34, %v5036_v41  ;;  %v8318_v34 = vld [vmem:[%s10599_s13 + $0xb0] sm:$0xff]  }
 0x99f   : > { %v10291_v48 = vadd.f32 %v5047_v63, %v5037_v44 }
 0x9a0   : > { %v5052_v50 = vrot.slane %v10289_v45, 4  ;;  %v5064_v52 = vmul.f32 %v10289_v45, %v10289_v45 }
 0x9a1   : > { %v5058_v53 = vrot.slane %v10291_v48, 4  ;;  %v5065_v56 = vmul.f32 %v10291_v48, %v10291_v48 }
 0x9a2   : > { %v5053_v19 = vadd.f32 %v5052_v50, %v10289_v45  ;;  %v5066_v57 = vrot.slane %v5064_v52, 4  ;;  %v8322_v50 = vld [vmem:[%s10599_s13 + $0x100] sm:$0xff]  }
 0x9a3   : > { %v5059_v29 = vadd.f32 %v5058_v53, %v10291_v48  ;;  %v5072_v30 = vrot.slane %v5065_v56, 4  ;;  %v8324_v53 = vld [vmem:[%s10599_s13 + $0x128] sm:$0xff]  }
 0x9a4   : > { %v5054_v35 = vrot.slane %v5053_v19, 2  ;;  %v5067_v37 = vadd.f32 %v5066_v57, %v5064_v52  ;;  %v8323_v52 = vld [vmem:[%s10599_s13 + $0xc0] sm:$0xff]  }
 0x9a5   : > { %v5060_v42 = vrot.slane %v5059_v29, 2  ;;  %v5073_v43 = vadd.f32 %v5072_v30, %v5065_v56  ;;  %v8325_v56 = vld [vmem:[%s10599_s13 + $0x108] sm:$0xff]  }
 0x9a6   : > { %v5055_v47 = vadd.f32 %v5054_v35, %v5053_v19  ;;  %v5068_v51 = vrot.slane %v5067_v37, 2  ;;  %v8326_v35 = vld [vmem:[%s10599_s13 + $0xc8] sm:$0xff]  }
 0x9a7   : > { %v5061_v55 = vadd.f32 %v5060_v42, %v5059_v29  ;;  %v5074_v59 = vrot.slane %v5073_v43, 2 }
 0x9a8   : > { %v5056_v60 = vrot.slane %v5055_v47, 1  ;;  %v5069_v13 = vadd.f32 %v5068_v51, %v5067_v37 }
 0x9a9   : > { %v5062_v0 = vrot.slane %v5061_v55, 1  ;;  %v5075_v1 = vadd.f32 %v5074_v59, %v5073_v43  ;;  %v8331_v59 = vld [vmem:[%s10599_s13 + $0x118] sm:$0xff]  }
 0x9aa   : > { %v5070_v2 = vrot.slane %v5069_v13, 1  ;;  %v5057_v8 = vadd.f32 %v5056_v60, %v5055_v47  ;;  %v8327_v47 = vld [vmem:[%s10599_s13 + $0x130] sm:$0xff]  }
 0x9ab   : > { %v5063_v3 = vadd.f32 %v5062_v0, %v5061_v55  ;;  %v5076_v4 = vrot.slane %v5075_v1, 1  ;;  %v8333_v0 = vld [vmem:[%s10599_s13 + $0x40] sm:$0xff]  }
 0x9ac   : > { %v5071_v9 = vadd.f32 %v5070_v2, %v5069_v13  ;;  %v8330_v13 = vld [vmem:[%s10599_s13 + $0x138] sm:$0xff]  }
 0x9ad   : > { %5174 = vmatprep.mubr.f32.mxu0 %v5063_v3  ;;  %v5077_v40 = vadd.f32 %v5076_v4, %v5075_v1  ;;  %v8332_v2 = vld [vmem:[%s10599_s13 + $0xd8] sm:$0xff]  }
 0x9ae   : > { %5175 = vmatmul.mubr.f32.vlgmr.msra.gmra.mrb[32].mxu0 %v5057_v8 }
 0x9af   : > { %5244 = vmatprep.mubr.f32.mxu1 %v5077_v40  ;;  %7630 = vmatpush1.bf16.msra.mxu0 %v7629_v7 }
 0x9b0   : > { %5245 = vmatmul.mubr.f32.vlgmr.msra.gmra.mrb[32].mxu1 %v5071_v9  ;;  %5331 = vmatprep.mubr.f32.mxu0 %v10272_v49 }
 0x9b1   : > { %7632 = vmatprep.subr.bf16.mxu0 %v7631_v58  ;;  %7432 = vmatpush3.bf16.msra.mxu1 %v8321_v17  ;;  %v8343_v17 = vld [vmem:[%s10599_s13 + $0x18] sm:$0xff]  }
 0x9b2   : > { %7433 = vmatprep.subr.bf16.mxu1 %v10272_v49  ;;  %7439 = vmatprep.mubr.msk.bf16.mxu1 %vm8447_vm4, %v10272_v49 }
 0x9b3   : > { %7634 = vmatpush1.bf16.msra.mxu0 %v7633_v25 }
 0x9b4   : > { %7636 = vmatprep.subr.bf16.mxu0 %v10281_v61 }
 0x9b5   : > { %7434 = vmatpush3.bf16.msra.mxu1 %v8324_v53  ;;  %v8344_v53 = vld [vmem:[%s10599_s13 + $0x98] sm:$0xff]  }
 0x9b6   : > { %7435 = vmatprep.subr.bf16.mxu1 %v10272_v49 }
 0x9b9   : > { %7436 = vmatpush3.bf16.msra.mxu1 %v8327_v47  ;;  %v8353_v47 = vld [vmem:[%s10599_s13 + $0x70] sm:$0xff]  }
 0x9ba   : > { %7437 = vmatprep.subr.bf16.mxu1 %v10272_v49 }
 0x9bd   : > { %7438 = vmatpush3.bf16.msra.mxu1 %v8330_v13  ;;  %v8358_v13 = vld [vmem:[%s10599_s13 + $0x38] sm:$0xff]  }
 0x9be   : > { %7377 = vmatprep.subr.bf16.mxu1 %v8333_v0  ;;  %v8362_v0 = vld [vmem:[%s10599_s13 + $0x1a0] sm:$0xff]  }
 0xa81   : > { %v7312_v20 = vpop.f32.mrb[32].mxu0 }
 0xa82   : > { %v7313_v54 = vpop.f32.mrb[33].mxu0 }
 0xa83   : > { %v7314_v21 = vadd.f32 %v7313_v54, %v7312_v20  ;;  %v7347_v22 = vpop.f32.mrb[32].mxu1 }
 0xa84   : > { %v7348_v23 = vpop.f32.mrb[33].mxu1 }
 0xa85   : > { %v5250_v24 = vmul.f32 0.015625, %v7314_v21  ;;  %v7349_v26 = vadd.f32 %v7348_v23, %v7347_v22 }
 0xa87   : > { %v5252_v27 = vmul.f32 %v5250_v24, %v5250_v24  ;;  %v5251_v28 = vmul.f32 0.015625, %v7349_v26  ;;  %7060 = vmatmul.mubr.msk.f32.vlgmr.msra.gmra.mrb[34].mxu0 %vm1583_vm3, %v5250_v24  ;;  %v8334_v26 = vld [vmem:[%s10599_s13] sm:$0xff]  }
 0xa88   : > { %7638 = vmatpush1.bf16.msra.mxu0 %v7629_v7  ;;  %5405 = vmatprep.mubr.f32.mxu0 %v10272_v49 }
 0xa89   : > { %v5253_v31 = vsub.f32 %v5251_v28, %v5252_v27  ;;  %7640 = vmatprep.subr.bf16.mxu0 %v7631_v58 }
 0xa8b   : > { %v5254_v32 = vadd.f32 1e-05, %v5253_v31 }
 0xa8c   : > { %7642 = vmatpush1.bf16.msra.mxu0 %v7633_v25 }
 0xa8d   : > { %8375 = vrsqrt.f32 %v5254_v32  ;;  %7350 = vmatprep.subr.bf16.mxu0 %v8313_v62 }
 0xa97   : > { %v8376_v61 = vpop.eup %8375 }
 0xa98   : > { %7061 = vmatmul.mubr.msk.f32.vlgmr.msra.gmra.mrb[36].mxu0 %vm1583_vm3, %v8376_v61 }
 0xa99   : > { %7351 = vmatpush3.bf16.msra.mxu0 %v8314_v6  ;;  %v8335_v6 = vld [vmem:[%s10599_s13 + $0x80] sm:$0xff]  }
 0xa9a   : > { %7352 = vmatprep.subr.bf16.mxu0 %v8315_v11  ;;  %v8336_v11 = vld [vmem:[%s10599_s13 + $0x48] sm:$0xff]  }
 0xa9d   : > { %7353 = vmatpush3.bf16.msra.mxu0 %v8316_v33 }
 0xa9e   : > { %7354 = vmatprep.subr.bf16.mxu0 %v8317_v5 }
 0xaa1   : > { %7355 = vmatpush3.bf16.msra.mxu0 %v8318_v34  ;;  %v8337_v34 = vld [vmem:[%s10599_s13 + $0x8] sm:$0xff]  }
 0xaa2   : > { %7356 = vmatprep.subr.bf16.mxu0 %v8319_v14  ;;  %v8339_v14 = vld [vmem:[%s10599_s13 + $0x50] sm:$0xff]  }
 0xaa5   : > { %7357 = vmatpush3.bf16.msra.mxu0 %v8320_v36  ;;  %v8338_v36 = vld [vmem:[%s10599_s13 + $0x88] sm:$0xff]  }
 0xaa6   : > { %7358 = vmatprep.subr.bf16.mxu0 %v8322_v50 }
 0xaa9   : > { %7359 = vmatpush3.bf16.msra.mxu0 %v8323_v52 }
 0xaaa   : > { %7360 = vmatprep.subr.bf16.mxu0 %v8325_v56  ;;  %v8347_v56 = vld [vmem:[%s10599_s13 + $0x180] sm:$0xff]  }
 0xaad   : > { %7361 = vmatpush3.bf16.msra.mxu0 %v8326_v35  ;;  %v8348_v35 = vld [vmem:[%s10599_s13 + $0x140] sm:$0xff]  }
 0xb5a   : > { %v5333_v63 = vpop.f32.mrb[34].mxu0 }
 0xb5b   : > { %v5335_v39 = vpop.f32.mrb[35].mxu0  ;;  %v5415_v41 = vrot.slane %v5333_v63, %v9014_v15  ;;  %v8340_v63 = vld [vmem:[%s10599_s13 + $0x10] sm:$0xff]  }
 0xb5c   : > { %v5419_v44 = vrot.slane %v5335_v39, %v9014_v15  ;;  %v8342_v39 = vld [vmem:[%s10599_s13 + $0x58] sm:$0xff]  }
 0xb5d   : > { %v5420_v57 = vsub.f32 %v10289_v45, %v5415_v41  ;;  %v8328_v45 = vld [vmem:[%s10599_s13 + $0x110] sm:$0xff]  }
 0xb5e   : > { %v5421_v37 = vsub.f32 %v10291_v48, %v5419_v44  ;;  %7362 = vmatprep.subr.bf16.mxu0 %v8328_v45  ;;  %v8341_v41 = vld [vmem:[%s10599_s13 + $0x90] sm:$0xff]   ;;  %v8345_v44 = vld [vmem:[%s10599_s13 + $0x60] sm:$0xff]  }
 0xb6b   : > { %v5407_v19 = vpop.f32.mrb[36].mxu0 }
 0xb6c   : > { %v5425_v29 = vrot.slane %v5407_v19, %v9014_v15  ;;  %v5409_v30 = vpop.f32.mrb[37].mxu0  ;;  %v8346_v19 = vld [vmem:[%s10599_s13 + $0x20] sm:$0xff]  }
 0xb6d   : > { %v5429_v42 = vrot.slane %v5409_v30, %v9014_v15  ;;  %v8329_v15 = vld [vmem:[%s10599_s13 + $0xd0] sm:$0xff]   ;;  %v8349_v30 = vld [vmem:[%s10599_s13 + $0x68] sm:$0xff]  }
 0xb6e   : > { %v5430_v43 = vmul.f32 %v5425_v29, %v5420_v57  ;;  %7363 = vmatpush3.bf16.msra.mxu0 %v8329_v15  ;;  %v8354_v15 = vld [vmem:[%s10599_s13 + $0x30] sm:$0xff]  }
 0xb6f   : > { %v5431_v51 = vmul.f32 %v5429_v42, %v5421_v37  ;;  %7364 = vmatprep.subr.bf16.mxu0 %v8331_v59  ;;  %v8351_v42 = vld [vmem:[%s10599_s13 + $0x188] sm:$0xff]   ;;  %v8356_v59 = vld [vmem:[%s10599_s13 + $0x150] sm:$0xff]  }
 0xb70   : > { %v5434_v55 = vmul.f32 0.2, %v5430_v43  ;;  %vm5432_vm5 = vcmp.ge.f32.partialorder %v5430_v43, 0.0 }
 0xb71   : > { %v5435_v48 = vmul.f32 0.2, %v5431_v51  ;;  %vm5433_vm6 = vcmp.ge.f32.partialorder %v5431_v51, 0.0 }
 0xb72   : > { %v5436_v60 = vsel %vm5432_vm5, %v5430_v43, %v5434_v55  ;;  %7365 = vmatpush3.bf16.msra.mxu0 %v8332_v2  ;;  %v8350_v43 = vld [vmem:[%s10599_s13 + $0x28] sm:$0xff]   ;;  %v8355_v55 = vld [vmem:[%s10599_s13 + $0x190] sm:$0xff]  }
 0xb73   : > { %v5448_v38 = vrot.slane %v5436_v60, 7  ;;  %v5437_v46 = vsel %vm5433_vm6, %v5431_v51, %v5435_v48  ;;  %7443 = vmatprep.subr.bf16.mxu0 %v10272_v49  ;;  %v8352_v51 = vld [vmem:[%s10599_s13 + $0x148] sm:$0xff]   ;;  %v8357_v48 = vld [vmem:[%s10599_s13 + $0x78] sm:$0xff]  }
 0xb74   : > { %v5449_v1 = vrot.slane %v5437_v46, 7  ;;  %v8359_v60 = vld [vmem:[%s10599_s13 + $0x198] sm:$0xff]  }
 0xb75   : > { %5450 = vrot.lane.b32.xlu0 %v5448_v38, %s8448_s27  ;;  %v8360_v38 = vld [vmem:[%s10599_s13 + $0x158] sm:$0xff]  }
 0xb76   : > { %5452 = vrot.lane.b32.xlu1 %v5449_v1, %s8448_s27  ;;  %v8361_v1 = vld [vmem:[%s10599_s13 + $0x1c0] sm:$0xff]   ;;  %s487_s27 = scalar_lea.vmem [#allocation5], %s6340_s17  ;;  %s8383_s17 = sshll.u32 %s8449_s22, 4  ;;  %s8384_s17 = int_to_ptr.vmem [resolvable:$false] %s8383_s17 }
 0xb77   : > { %s6277_s30 = sshll.u32 %s487_s27, 4  ;;  %s8385_s21 = scalar_lea.vmem %s8384_s17, 256  ;;  %s10545_s30 = int_to_ptr.vmem [resolvable:$true] %s6277_s30 }
 0xb78   : > { %s8379_s25 = scalar_lea.vmem %s10545_s30, 128  ;;  %p8386_p0 = scmp.lt.s32.totalorder %s10545_s30, %s8384_s17 }
 0xb79   : > { %p8380_p11 = scmp.ne.s32.totalorder %s10545_s30, %s8379_s25  ;;  %p8387_p1 = scmp.lt.s32.totalorder %s8385_s21, %s8379_s25 }
 0xb7b   : > { %p8381_p12 = pnand %p8380_p11, %p8568_p5  ;;  %p8388_p2 = por %p8387_p1, %p8386_p0 }
 0xb7d   : > { %p8382_p13 = pneg %p8381_p12 }
 0xb7f   : > { %p8389_p3 = pnand %p8388_p2, %p8382_p13 }
 0xbe7   : > { %v5451_v3 = vpop.permute.xlu0 %5450 }
 0xbe8   : > { %5459 = vst.msk [vmem:[#allocation4] sm:$0xfe] %vm5458_vm2, %v5451_v3  ;;  %v5453_v4 = vpop.permute.xlu1 %5452 }
 0xbe9   : > { %5464 = vst.msk [vmem:[#allocation4 + $0x18] sm:$0x1] %vm5463_vm7, %v5451_v3  ;;  %v5454_v7 = vsel %vm1583_vm3, %v5451_v3, %v5453_v4  ;;  %v8363_v3 = vld [vmem:[%s10599_s13 + $0x160] sm:$0xff]  }
 0xbea   : > { %5462 = vst.msk [vmem:[#allocation4 + $0x10] sm:$0xfe] %vm5461_vm8, %v5453_v4  ;;  %5460 = vst [vmem:[#allocation4 + $0x8] sm:$0xfe] %v5454_v7 }
 0xbeb   : > { %5466 = vst.msk [vmem:[#allocation4 + $0x28] sm:$0x1] %vm3556_vm10, %v5453_v4  ;;  %5465 = vst [vmem:[#allocation4 + $0x20] sm:$0x1] %v5454_v7  ;;  %v8365_v4 = vld [vmem:[%s10599_s13 + $0x1a8] sm:$0xff]  }
 0xbec   : > { %v8364_v7 = vld [vmem:[%s10599_s13 + $0x1c8] sm:$0xff]  }
 0xbef   : > { %v5513_v8 = vld [vmem:[#allocation4] sm:$0xfe] }
 0xbf0   : > { %v5516_v40 = vld [vmem:[#allocation4 + $0x18] sm:$0x1]  ;;  %v5467_v46 = vld [vmem:[#allocation4] sm:$0xff] }
 0xbf1   : > { %v5515_v9 = vld [vmem:[#allocation4 + $0x10] sm:$0xfe]  ;;  %v5519_v12 = vpack.c.bf16 %v5516_v40, %v5513_v8  ;;  %v5514_v16 = vld [vmem:[#allocation4 + $0x8] sm:$0xfe]  ;;  %v5470_v2 = vpack.c.bf16 %v5467_v46, %v5467_v46  ;;  %v8366_v8 = vld [vmem:[%s10599_s13 + $0x168] sm:$0xff]  }
 0xbf2   : > { %v5518_v10 = vld [vmem:[#allocation4 + $0x28] sm:$0x1]  ;;  %v5517_v18 = vld [vmem:[#allocation4 + $0x20] sm:$0x1]  ;;  %v5993_v50 = vld [vmem:[#allocation4 + $0x8] sm:$0xfc] }
 0xbf3   : > { %v5521_v58 = vpack.c.bf16 %v5518_v10, %v5515_v9  ;;  %v5520_v25 = vpack.c.bf16 %v5517_v18, %v5514_v16  ;;  %v5566_v20 = vshll.u32 %v5519_v12, 16  ;;  %v5468_v31 = vld [vmem:[#allocation4 + $0x8] sm:$0xff]  ;;  %v5564_v61 = vshrl.u32 %v5519_v12, 16  ;;  %v5996_v52 = vld [vmem:[#allocation4 + $0x20] sm:$0x3]  ;;  %v5469_v57 = vld [vmem:[#allocation4 + $0x10] sm:$0xff] }
 0xbf4   : > { %v5471_v33 = vpack.c.bf16 %v5468_v31, %v5468_v31  ;;  %v5999_v29 = vpack.c.bf16 %v5996_v52, %v5993_v50  ;;  %v5472_v37 = vpack.c.bf16 %v5469_v57, %v5469_v57  ;;  %v8368_v40 = vld [vmem:[%s10599_s13 + $0x1b0] sm:$0xff]   ;;  %v5994_v12 = vld [vmem:[#allocation4 + $0x10] sm:$0xfc]  ;;  %v8371_v16 = vld [vmem:[%s10599_s13 + $0x1b8] sm:$0xff]  }
 0xbf5   : > { %v5580_v54 = vshll.u32 %v5521_v58, 16  ;;  %v5573_v21 = vshll.u32 %v5520_v25, 16  ;;  %v5578_v22 = vshrl.u32 %v5521_v58, 16  ;;  %v5568_v24 = vrot.slane %v5566_v20, 1  ;;  %v8367_v9 = vld [vmem:[%s10599_s13 + $0x1d0] sm:$0xff]   ;;  %v8370_v18 = vld [vmem:[%s10599_s13 + $0x1d8] sm:$0xff]  }
 0xbf6   : > { %v5571_v27 = vshrl.u32 %v5520_v25, 16  ;;  %v6046_v45 = vrot.slane %v5999_v29, 1  ;;  %v8369_v10 = vld [vmem:[%s10599_s13 + $0x170] sm:$0xff]   ;;  %v5997_v58 = vld [vmem:[#allocation4 + $0x28] sm:$0x3] }
 0xbf7   : > { %v5582_v23 = vrot.slane %v5580_v54, 1  ;;  %v5575_v28 = vrot.slane %v5573_v21, 1  ;;  %v5569_v5 = vor.u32 %v5568_v24, %v5564_v61  ;;  %v5992_v25 = vld [vmem:[#allocation4] sm:$0xfc]  ;;  %v5995_v20 = vld [vmem:[#allocation4 + $0x18] sm:$0x3]  ;;  %v6000_v54 = vpack.c.bf16 %v5997_v58, %v5994_v12 }
 0xbf8   : > { %v8372_v21 = vld [vmem:[%s10599_s13 + $0x178] sm:$0xff]  }
 0xbf9   : > { %v5583_v32 = vor.u32 %v5582_v23, %v5578_v22  ;;  %v5576_v62 = vor.u32 %v5575_v28, %v5571_v27  ;;  %v5998_v22 = vpack.c.bf16 %v5995_v20, %v5992_v25  ;;  %v6047_v23 = vrot.slane %v6000_v54, 1 }
 0xbfb   : > { %7440 = vmatmul.mubr.msk.bf16.vlgmr.msra.gmra.mrb[36].mxu1 %vm5440_vm12, %v5583_v32  ;;  %5741 = vmatprep.mubr.bf16.mxu0 %v5576_v62  ;;  %v6045_v24 = vrot.slane %v5998_v22, 1 }
 0xbfc   : > { %7378 = vmatpush3.bf16.msra.mxu1 %v8334_v26  ;;  %5944 = vmatprep.mubr.bf16.mxu1 %v5471_v33 }
 0xbfd   : > { %5742 = vmatmul.mubr.bf16.vlgmr.msra.gmra.mrb[40].mxu0 %v5569_v5  ;;  %7379 = vmatprep.subr.bf16.mxu1 %v8336_v11 }
 0xbfe   : > { %7444 = vmatpush3.bf16.msra.mxu0 %v8335_v6  ;;  %7451 = vmatprep.mubr.msk.bf16.mxu0 %vm8447_vm4, %v10272_v49 }
 0xbff   : > { %7445 = vmatprep.subr.bf16.mxu0 %v10272_v49 }
 0xc00   : > { %7380 = vmatpush3.bf16.msra.mxu1 %v8337_v34 }
 0xc01   : > { %7381 = vmatprep.subr.bf16.mxu1 %v8339_v14 }
 0xc02   : > { %7446 = vmatpush3.bf16.msra.mxu0 %v8338_v36 }
 0xc03   : > { %7447 = vmatprep.subr.bf16.mxu0 %v10272_v49 }
 0xc04   : > { %7382 = vmatpush3.bf16.msra.mxu1 %v8340_v63 }
 0xc05   : > { %7383 = vmatprep.subr.bf16.mxu1 %v8342_v39 }
 0xc06   : > { %7448 = vmatpush3.bf16.msra.mxu0 %v8341_v41 }
 0xc07   : > { %7449 = vmatprep.subr.bf16.mxu0 %v10272_v49 }
 0xc08   : > { %7384 = vmatpush3.bf16.msra.mxu1 %v8343_v17 }
 0xc09   : > { %7385 = vmatprep.subr.bf16.mxu1 %v8345_v44 }
 0xc0a   : > { %7450 = vmatpush3.bf16.msra.mxu0 %v8344_v53 }
 0xc0b   : > { %7404 = vmatprep.subr.bf16.mxu0 %v8347_v56 }
 0xc0c   : > { %7386 = vmatpush3.bf16.msra.mxu1 %v8346_v19 }
 0xc0d   : > { %7452 = vmatmul.mubr.msk.bf16.vlgmr.msra.gmra.mrb[44].mxu0 %vm5440_vm12, %v5472_v37  ;;  %7387 = vmatprep.subr.bf16.mxu1 %v8349_v30 }
 0xc0e   : > { %7405 = vmatpush3.bf16.msra.mxu0 %v8348_v35  ;;  %6205 = vmatprep.mubr.bf16.mxu0 %v6046_v45  ;;  %v7205_v45 = vld [vmem:[%s10600_s14] ss:$0 sm:$0xff] }
 0xc0f   : > { %7406 = vmatprep.subr.bf16.mxu0 %v8351_v42 }
 0xc10   : > { %7388 = vmatpush3.bf16.msra.mxu1 %v8350_v43 }
 0xc11   : > { %7389 = vmatprep.subr.bf16.mxu1 %v8353_v47 }
 0xc12   : > { %7407 = vmatpush3.bf16.msra.mxu0 %v8352_v51 }
 0xc13   : > { %7408 = vmatprep.subr.bf16.mxu0 %v8355_v55 }
 0xc14   : > { %7390 = vmatpush3.bf16.msra.mxu1 %v8354_v15 }
 0xc15   : > { %7391 = vmatprep.subr.bf16.mxu1 %v8357_v48 }
 0xc16   : > { %7409 = vmatpush3.bf16.msra.mxu0 %v8356_v59 }
 0xc17   : > { %7410 = vmatprep.subr.bf16.mxu0 %v8359_v60 }
 0xc18   : > { %7392 = vmatpush3.bf16.msra.mxu1 %v8358_v13 }
 0xc19   : > { %7455 = vmatprep.subr.bf16.mxu1 %v10272_v49 }
 0xc1a   : > { %7411 = vmatpush3.bf16.msra.mxu0 %v8360_v38 }
 0xc1b   : > { %5945 = vmatmul.mubr.bf16.vlgmr.msra.gmra.mrb[40].mxu1 %v5470_v2  ;;  %7412 = vmatprep.subr.bf16.mxu0 %v8362_v0 }
 0xc1c   : > { %7456 = vmatpush3.bf16.msra.mxu1 %v8361_v1  ;;  %7463 = vmatprep.mubr.msk.bf16.mxu1 %vm8447_vm4, %v10272_v49 }
 0xc1d   : > { %7457 = vmatprep.subr.bf16.mxu1 %v10272_v49 }
 0xc1e   : > { %7413 = vmatpush3.bf16.msra.mxu0 %v8363_v3 }
 0xc1f   : > { %7414 = vmatprep.subr.bf16.mxu0 %v8365_v4 }
 0xc20   : > { %7458 = vmatpush3.bf16.msra.mxu1 %v8364_v7 }
 0xc21   : > { %7459 = vmatprep.subr.bf16.mxu1 %v10272_v49 }
 0xc22   : > { %7415 = vmatpush3.bf16.msra.mxu0 %v8366_v8 }
 0xc23   : > { %7416 = vmatprep.subr.bf16.mxu0 %v8368_v40 }
 0xc24   : > { %7460 = vmatpush3.bf16.msra.mxu1 %v8367_v9 }
 0xc25   : > { %7461 = vmatprep.subr.bf16.mxu1 %v10272_v49 }
 0xc26   : > { %7417 = vmatpush3.bf16.msra.mxu0 %v8369_v10 }
 0xc27   : > { %7418 = vmatprep.subr.bf16.mxu0 %v8371_v16 }
 0xc28   : > { %7462 = vmatpush3.bf16.msra.mxu1 %v8370_v18 }
 0xc2a   : > { %7419 = vmatpush3.bf16.msra.mxu0 %v8372_v21 }
 0xc2b   : > { %7464 = vmatmul.mubr.msk.bf16.vlgmr.msra.gmra.mrb[44].mxu1 %vm5440_vm12, %v6047_v23 }
 0xc2d   : > { %6206 = vmatmul.mubr.bf16.vlgmr.msra.gmra.mrb[48].mxu0 %v6045_v24 }
 0xcce   : > { %v5783_v26 = vpop.f32.mrb[36].mxu1 }
 0xccf   : > { %v7441_v27 = vpop.f32.mrb[37].mxu1 }
 0xcd0   : > { %v7366_v28 = vpop.f32.mrb[40].mxu0  ;;  %v5786_v31 = vpop.f32.mrb[38].mxu1 }
 0xcd1   : > { %v7367_v49 = vpop.f32.mrb[41].mxu0  ;;  %v7442_v32 = vpop.f32.mrb[39].mxu1 }
 0xcd2   : > { %v7368_v61 = vadd.f32 %v7367_v49, %v7366_v28  ;;  %v7369_v62 = vpop.f32.mrb[42].mxu0 }
 0xcd3   : > { %v7370_v6 = vpop.f32.mrb[43].mxu0 }
 0xcd4   : > { %v5784_v11 = vadd.f32 %v7368_v61, %v5783_v26 }
 0xce0   : > { %v5986_v33 = vpop.f32.mrb[44].mxu0 }
 0xce1   : > { %v7453_v5 = vpop.f32.mrb[45].mxu0 }
 0xce2   : > { %v5989_v34 = vpop.f32.mrb[46].mxu0 }
 0xce3   : > { %v7454_v14 = vpop.f32.mrb[47].mxu0 }
 0xcee   : > { %v7393_v36 = vpop.f32.mrb[40].mxu1 }
 0xcef   : > { %v7394_v63 = vpop.f32.mrb[41].mxu1 }
 0xcf0   : > { %v7395_v39 = vadd.f32 %v7394_v63, %v7393_v36  ;;  %v7396_v41 = vpop.f32.mrb[42].mxu1 }
 0xcf1   : > { %v7397_v17 = vpop.f32.mrb[43].mxu1 }
 0xcf2   : > { %v5947_v44 = vadd.f32 %v7395_v39, %v5784_v11 }
 0xcf4   : > { %v5987_v50 = vadd.f32 %v5986_v33, %v5947_v44 }
 0xcfe   : > { %v6247_v52 = vpop.f32.mrb[44].mxu1 }
 0xcff   : > { %v7465_v53 = vpop.f32.mrb[45].mxu1 }
 0xd00   : > { %v7420_v56 = vpop.f32.mrb[48].mxu0  ;;  %v6250_v19 = vpop.f32.mrb[46].mxu1 }
 0xd01   : > { %v7421_v57 = vpop.f32.mrb[49].mxu0  ;;  %v7466_v29 = vpop.f32.mrb[47].mxu1 }
 0xd02   : > { %v7422_v30 = vadd.f32 %v7421_v57, %v7420_v56  ;;  %v7423_v35 = vpop.f32.mrb[50].mxu0 }
 0xd03   : > { %v7424_v37 = vpop.f32.mrb[51].mxu0 }
 0xd04   : > { %v6248_v42 = vadd.f32 %v7422_v30, %v6247_v52 }
 0xd06   : > { %v6253_v43 = vadd.f32 %v6248_v42, %v5987_v50 }
 0xd08   : > { %v6261_v47 = vadd.f32 %v7205_v45, %v6253_v43 }
 0xd0a   : > { %6262 = vst.msk [vmem:[%s487_s27] sm:$0xff] %vm1765_vm0, %v6261_v47 }
 0xd0b   : > { %8392 = shalt.err (!%p8389_p3)
}
 0xd0c   : > { %s8393_s18 = scalar_lea.hbm %s10543_s24, 128  ;;  %s8397_s27 = scalar_lea.hbm %s10601_s15, 256 }
 0xd0d   : > { %p8394_p4 = scmp.ne.s32.totalorder %s10543_s24, %s8393_s18  ;;  %p8398_p9 = scmp.lt.u32.totalorder %s10543_s24, %s10601_s15 }
 0xd0e   : > { %p8399_p10 = scmp.lt.u32.totalorder %s8397_s27, %s8393_s18  ;;  %p8401_p12 = scmp.lt.u32.totalorder %s8393_s18, %s10543_s24 }
 0xd0f   : > { %p8395_p7 = pnand %p8394_p4, %p8568_p5 }
 0xd10   : > { %p8400_p11 = por %p8399_p10, %p8398_p9 }
 0xd11   : > { %p8396_p8 = pneg %p8395_p7 }
 0xd12   : > { %p8402_p13 = por %p8401_p12, %p8400_p11 }
 0xd14   : > { %p8403_p0 = pnand %p8402_p13, %p8396_p8 }
 0xd16   : > { %8406 = shalt.err (!%p8403_p0)
}
 0xd17   : > { %7696 = dma.vmem_to_hbm [thread:$0]  (%p8568_p5), %s10545_s30, 128, %s10543_s24, %s6264_s23  }
 0xd18 PF: > { %s10616_s25 = sld [smem:[#allocation10_spill]]  ;;  %s10617_s22 = sld [smem:[#allocation8_spill]] }
 0xd1e   : > { %p7702_p1 = scmp.ge.s32.totalorder %s10616_s25, 2  ;;  %s6289_s21 = sand.u32 1, %s10617_s22  }
 0xd1f   : > { %s6290_s26 = scalar_lea.sflag [#allocation6], %s6289_s21 }
 0xd20   : > { %p7699_p2 = pnand %p7702_p1, %p8572_p6 }
 0xd22   : > { %8424 = dma.done.wait (!%p7699_p2), %s6290_s26, 128  }
 0xd23   : > { %8426 = vsyncadd (!%p7699_p2), %s6290_s26, 4294967168  ;;  %s10619_s21 = sld [smem:[#allocation11_spill]]  ;;  %s10620_s20 = sld [smem:[#allocation9_spill]] }
 0xd24   : > { %s10621_s27 = sld [smem:[#allocation12_spill]]  ;;  %s10622_s18 = smov %s8433_s19 }
 0xd29   : > { %p25_p3 = scmp.ge.s32.totalorder %s10619_s21, 4   ;;  %s10623_s19 = smov %s10620_s20 }
 0xd2a   : > { %s10624_s20 = smov %s10621_s27 }
 0xd2b   :  { %27 = sbr.rel (!%p25_p3) target bundleno = 3 (0x3), region = 131 }
 0xd32   :  { %6295 = vsyncpa [#allocation6], 1 }
 0xd33   :  { %6297 = vsyncpa [#allocation6 + $0x1], 1 }

</bundles_post_ra>
